<compile_context>
chip_gen: v7x
topology: tpu7x:2x2x1
jax: 0.10.0
libtpu: 0.0.40
codegen_flags: <defaults>
</compile_context>

<pallas_src>
import functools

import jax
import jax.numpy as jnp
import numpy as np
from jax import lax
from jax.experimental import pallas as pl
from jax.experimental.pallas import tpu as pltpu


def _rezero_linear_attention_kernel(x_ref, wqkv_ref, wout_ref, bout_ref, g_ref,
                                    o_ref, head_out_ref,
                                    *, heads, dim_head, in_ch):
    """Per-batch kernel.

    x_ref        : (1, C, HW)      input block for batch b           (VMEM)
    wqkv_ref     : (3*hidden, C)   to_qkv 1x1 conv weight (no bias)  (VMEM)
    wout_ref     : (C, hidden)     to_out 1x1 conv weight            (VMEM)
    bout_ref     : (C, 1)          to_out bias                       (VMEM)
    g_ref        : (1, 1)          Rezero scalar g                   (SMEM)
    o_ref        : (1, C, HW)      output block for batch b          (VMEM)
    head_out_ref : (hidden, HW)    f32 scratch holding all head outputs
    """
    hidden = heads * dim_head
    x = x_ref[0]                                    # (C, HW) f32

    # 1x1 conv with only C=in_ch (=4) input channels: `in_ch` broadcast FMAs on
    # the VPU (exact f32).  Avoids a K=4 MXU matmul that wastes >97% of the MXU
    # contraction depth and the 32x lane-padded weight operand.
    def conv1x1(row_start):
        w_rows = wqkv_ref[row_start:row_start + dim_head, :]     # (dh, C)
        acc = w_rows[:, 0:1] * x[0:1, :]                         # (dh, HW)
        for c in range(1, in_ch):
            acc = acc + w_rows[:, c:c + 1] * x[c:c + 1, :]
        return acc

    for h in range(heads):                          # static unroll; heads small
        lo = h * dim_head
        hi = lo + dim_head
        q = conv1x1(lo)                             # (dh, HW)
        k = conv1x1(hidden + lo)                    # (dh, HW)
        v = conv1x1(2 * hidden + lo)                # (dh, HW)

        # softmax over the spatial (lane) axis of k.  The 1/denominator is an
        # EUP reciprocal and is folded into the small (dh, dh) context tile.
        k_max = jnp.max(k, axis=-1, keepdims=True)
        k_exp = jnp.exp(k - k_max)
        inv_den = pl.reciprocal(jnp.sum(k_exp, axis=-1, keepdims=True),
                                approx=True)        # (dh, 1)

        # context[d, e] = sum_n softmax(k)[d, n] * v[e, n]
        # contract the HW axis of both operands directly -- no v.T transpose.
        context = lax.dot_general(k_exp, v, (((1,), (1,)), ((), ())),
                                  preferred_element_type=jnp.float32)
        context = context * inv_den                 # (dh, dh)

        # out[e, n] = sum_d context[d, e] * q[d, n]
        # contract dim 0 of both operands -- no context.T transpose.
        out_h = lax.dot_general(context, q, (((0,), (0,)), ((), ())),
                                preferred_element_type=jnp.float32)

        # Slice-write into scratch (offsets are multiples of 32: sublane
        # aligned) instead of concatenating per-head tiles.
        head_out_ref[lo:hi, :] = out_h

    # to_out 1x1 conv (+ bias), then the Rezero scale by g.
    o = lax.dot_general(wout_ref[...], head_out_ref[...],
                        (((1,), (0,)), ((), ())),
                        preferred_element_type=jnp.float32)      # (C, HW)
    o = (o + bout_ref[...]) * g_ref[0, 0]
    o_ref[0] = o.astype(o_ref.dtype)


def rezero_linear_attention(x, w_qkv, w_out, b_out, g, *, heads, dim_head):
    """x: (B, C, H, W) f32; returns Rezero(LinearAttention)(x): (B, C, H, W)."""
    B, C, H, W = x.shape
    HW = H * W
    hidden = heads * dim_head
    assert w_qkv.shape == (3 * hidden, C)
    assert w_out.shape == (C, hidden)
    assert b_out.shape == (C,)
    # Keep the output lane-dense.  Other configs would need HW padded to a
    # multiple of 128 plus a softmax mask; not needed for H*W = 256.
    assert HW % 128 == 0, "pad H*W to a multiple of 128 (with softmax masking)"

    x2 = x.reshape(B, C, HW)
    bout2 = b_out.reshape(C, 1)
    g2 = jnp.asarray(g, jnp.float32).reshape(1, 1)

    kernel = functools.partial(_rezero_linear_attention_kernel,
                               heads=heads, dim_head=dim_head, in_ch=C)

    out = pl.pallas_call(
        kernel,
        out_shape=jax.ShapeDtypeStruct((B, C, HW), x.dtype),
        grid_spec=pltpu.PrefetchScalarGridSpec(
            num_scalar_prefetch=0,
            # One batch per grid step; "parallel" lets v7x's two TensorCores
            # each take a batch (overhead per step is small vs per-batch work).
            grid=(B,),
            in_specs=[
                pl.BlockSpec((1, C, HW), lambda b: (b, 0, 0)),
                pl.BlockSpec((3 * hidden, C), lambda b: (0, 0)),
                pl.BlockSpec((C, hidden), lambda b: (0, 0)),
                pl.BlockSpec((C, 1), lambda b: (0, 0)),
                pl.BlockSpec(memory_space=pltpu.MemorySpace.SMEM),  # g scalar
            ],
            out_specs=pl.BlockSpec((1, C, HW), lambda b: (b, 0, 0)),
            scratch_shapes=[pltpu.VMEM((hidden, HW), jnp.float32)],
        ),
        compiler_params=pltpu.CompilerParams(
            dimension_semantics=("parallel",)),
    )(x2, w_qkv, w_out, bout2, g2)
    return out.reshape(B, C, H, W)


def rezero_linear_attention_ref(x, w_qkv, w_out, b_out, g, *, heads, dim_head):
    """Pure-JAX reference (HIGHEST precision ground truth)."""
    B, C, H, W = x.shape
    HW = H * W
    hidden = heads * dim_head
    P = jax.lax.Precision.HIGHEST
    x2 = x.reshape(B, C, HW)
    qkv = jnp.einsum('oc,bcn->bon', w_qkv, x2, precision=P)
    qkv = qkv.reshape(B, 3, heads, dim_head, HW)
    q, k, v = qkv[:, 0], qkv[:, 1], qkv[:, 2]
    k = jax.nn.softmax(k, axis=-1)
    context = jnp.einsum('bhdn,bhen->bhde', k, v, precision=P)
    out = jnp.einsum('bhde,bhdn->bhen', context, q, precision=P)
    out = out.reshape(B, hidden, HW)
    o = jnp.einsum('oc,bcn->bon', w_out, out, precision=P) + b_out[None, :, None]
    return (o * g).reshape(B, C, H, W)


if __name__ == "__main__":
    # Module config: dim=4, heads=4, dim_head=32 -> hidden_dim = 128.
    B, DIM, H, W = 2, 4, 16, 16
    HEADS, DIM_HEAD = 4, 32
    HIDDEN = HEADS * DIM_HEAD

    key = jax.random.PRNGKey(0)
    kx, kq, ko, kb = jax.random.split(key, 4)

    x = jax.random.normal(kx, (B, DIM, H, W), dtype=jnp.float32)
    # Deterministic synthetic parameters (1x1 conv weights squeezed to 2D).
    w_qkv = jax.random.normal(kq, (3 * HIDDEN, DIM), dtype=jnp.float32) / jnp.sqrt(DIM)
    w_out = jax.random.normal(ko, (DIM, HIDDEN), dtype=jnp.float32) / jnp.sqrt(HIDDEN)
    b_out = jax.random.normal(kb, (DIM,), dtype=jnp.float32) * 0.01
    # The module initializes g = 0 (output would be trivially zero); use a
    # fixed nonzero g so the fused attention path is actually exercised.
    g = jnp.float32(0.75)

    y = rezero_linear_attention(x, w_qkv, w_out, b_out, g,
                                heads=HEADS, dim_head=DIM_HEAD)
    y = jax.block_until_ready(y)

    y_ref = rezero_linear_attention_ref(x, w_qkv, w_out, b_out, g,
                                        heads=HEADS, dim_head=DIM_HEAD)
    # Tolerance sized for default (possibly single-bf16-pass) MXU precision on
    # the K<=256 contractions vs. the HIGHEST-precision reference; genuine
    # bugs produce O(1) errors and are still caught.
    np.testing.assert_allclose(np.asarray(y), np.asarray(y_ref),
                               rtol=2e-2, atol=2e-2)
    print("KERNEL_OK")
</pallas_src>

<mosaic_0001>
module attributes {stable_mosaic.version = 11 : i64} {
  func.func @_rezero_linear_attention_kernel(%arg0: i32, %arg1: memref<1x4x256xf32, #tpu.memory_space<vmem>>, %arg2: memref<384x4xf32, #tpu.memory_space<vmem>>, %arg3: memref<4x128xf32, #tpu.memory_space<vmem>>, %arg4: memref<4x1xf32, #tpu.memory_space<vmem>>, %arg5: memref<1x1xf32, #tpu.memory_space<smem>>, %arg6: memref<1x4x256xf32, #tpu.memory_space<vmem>>, %arg7: memref<128x256xf32, #tpu.memory_space<vmem>>) attributes {dimension_semantics = [#tpu.dimension_semantics<parallel>], iteration_bounds = array<i64: 2>, scalar_prefetch = 0 : i64, scratch_operands = 1 : i64, tpu.core_type = #tpu.core_type<tc>, window_params = [{transform_indices = @transform_0, window_bounds = array<i64: 1, 4, 256>}, {pipeline_mode = #tpu.pipeline_mode<synchronous>, transform_indices = @transform_1, window_bounds = array<i64: 384, 4>}, {pipeline_mode = #tpu.pipeline_mode<synchronous>, transform_indices = @transform_2, window_bounds = array<i64: 4, 128>}, {pipeline_mode = #tpu.pipeline_mode<synchronous>, transform_indices = @transform_3, window_bounds = array<i64: 4, 1>}, {transform_indices = @transform_4, window_bounds = array<i64: 1, 1>}, {transform_indices = @transform_5, window_bounds = array<i64: 1, 4, 256>}]} {
    %c0 = arith.constant 0 : index
    %c0_0 = arith.constant 0 : index
    %c0_1 = arith.constant 0 : index
    %0 = vector.load %arg1[%c0, %c0_0, %c0_1] : memref<1x4x256xf32, #tpu.memory_space<vmem>>, vector<1x4x256xf32>
    %1 = vector.shape_cast %0 : vector<1x4x256xf32> to vector<4x256xf32>
    %c0_2 = arith.constant 0 : index
    %c0_3 = arith.constant 0 : index
    %2 = vector.load %arg2[%c0_2, %c0_3] : memref<384x4xf32, #tpu.memory_space<vmem>>, vector<32x4xf32>
    %3 = vector.extract_strided_slice %2 {offsets = [0, 0], sizes = [32, 1], strides = [1, 1]} : vector<32x4xf32> to vector<32x1xf32>
    %4 = vector.extract_strided_slice %1 {offsets = [0, 0], sizes = [1, 256], strides = [1, 1]} : vector<4x256xf32> to vector<1x256xf32>
    %5 = vector.broadcast %3 : vector<32x1xf32> to vector<32x256xf32>
    %6 = vector.broadcast %4 : vector<1x256xf32> to vector<32x256xf32>
    %7 = arith.mulf %5, %6 : vector<32x256xf32>
    %8 = vector.extract_strided_slice %2 {offsets = [0, 1], sizes = [32, 1], strides = [1, 1]} : vector<32x4xf32> to vector<32x1xf32>
    %9 = vector.extract_strided_slice %1 {offsets = [1, 0], sizes = [1, 256], strides = [1, 1]} : vector<4x256xf32> to vector<1x256xf32>
    %10 = vector.broadcast %8 : vector<32x1xf32> to vector<32x256xf32>
    %11 = vector.broadcast %9 : vector<1x256xf32> to vector<32x256xf32>
    %12 = arith.mulf %10, %11 : vector<32x256xf32>
    %13 = arith.addf %7, %12 : vector<32x256xf32>
    %14 = vector.extract_strided_slice %2 {offsets = [0, 2], sizes = [32, 1], strides = [1, 1]} : vector<32x4xf32> to vector<32x1xf32>
    %15 = vector.extract_strided_slice %1 {offsets = [2, 0], sizes = [1, 256], strides = [1, 1]} : vector<4x256xf32> to vector<1x256xf32>
    %16 = vector.broadcast %14 : vector<32x1xf32> to vector<32x256xf32>
    %17 = vector.broadcast %15 : vector<1x256xf32> to vector<32x256xf32>
    %18 = arith.mulf %16, %17 : vector<32x256xf32>
    %19 = arith.addf %13, %18 : vector<32x256xf32>
    %20 = vector.extract_strided_slice %2 {offsets = [0, 3], sizes = [32, 1], strides = [1, 1]} : vector<32x4xf32> to vector<32x1xf32>
    %21 = vector.extract_strided_slice %1 {offsets = [3, 0], sizes = [1, 256], strides = [1, 1]} : vector<4x256xf32> to vector<1x256xf32>
    %22 = vector.broadcast %20 : vector<32x1xf32> to vector<32x256xf32>
    %23 = vector.broadcast %21 : vector<1x256xf32> to vector<32x256xf32>
    %24 = arith.mulf %22, %23 : vector<32x256xf32>
    %25 = arith.addf %19, %24 : vector<32x256xf32>
    %c128 = arith.constant 128 : index
    %c0_4 = arith.constant 0 : index
    %26 = vector.load %arg2[%c128, %c0_4] : memref<384x4xf32, #tpu.memory_space<vmem>>, vector<32x4xf32>
    %27 = vector.extract_strided_slice %26 {offsets = [0, 0], sizes = [32, 1], strides = [1, 1]} : vector<32x4xf32> to vector<32x1xf32>
    %28 = vector.extract_strided_slice %1 {offsets = [0, 0], sizes = [1, 256], strides = [1, 1]} : vector<4x256xf32> to vector<1x256xf32>
    %29 = vector.broadcast %27 : vector<32x1xf32> to vector<32x256xf32>
    %30 = vector.broadcast %28 : vector<1x256xf32> to vector<32x256xf32>
    %31 = arith.mulf %29, %30 : vector<32x256xf32>
    %32 = vector.extract_strided_slice %26 {offsets = [0, 1], sizes = [32, 1], strides = [1, 1]} : vector<32x4xf32> to vector<32x1xf32>
    %33 = vector.extract_strided_slice %1 {offsets = [1, 0], sizes = [1, 256], strides = [1, 1]} : vector<4x256xf32> to vector<1x256xf32>
    %34 = vector.broadcast %32 : vector<32x1xf32> to vector<32x256xf32>
    %35 = vector.broadcast %33 : vector<1x256xf32> to vector<32x256xf32>
    %36 = arith.mulf %34, %35 : vector<32x256xf32>
    %37 = arith.addf %31, %36 : vector<32x256xf32>
    %38 = vector.extract_strided_slice %26 {offsets = [0, 2], sizes = [32, 1], strides = [1, 1]} : vector<32x4xf32> to vector<32x1xf32>
    %39 = vector.extract_strided_slice %1 {offsets = [2, 0], sizes = [1, 256], strides = [1, 1]} : vector<4x256xf32> to vector<1x256xf32>
    %40 = vector.broadcast %38 : vector<32x1xf32> to vector<32x256xf32>
    %41 = vector.broadcast %39 : vector<1x256xf32> to vector<32x256xf32>
    %42 = arith.mulf %40, %41 : vector<32x256xf32>
    %43 = arith.addf %37, %42 : vector<32x256xf32>
    %44 = vector.extract_strided_slice %26 {offsets = [0, 3], sizes = [32, 1], strides = [1, 1]} : vector<32x4xf32> to vector<32x1xf32>
    %45 = vector.extract_strided_slice %1 {offsets = [3, 0], sizes = [1, 256], strides = [1, 1]} : vector<4x256xf32> to vector<1x256xf32>
    %46 = vector.broadcast %44 : vector<32x1xf32> to vector<32x256xf32>
    %47 = vector.broadcast %45 : vector<1x256xf32> to vector<32x256xf32>
    %48 = arith.mulf %46, %47 : vector<32x256xf32>
    %49 = arith.addf %43, %48 : vector<32x256xf32>
    %c256 = arith.constant 256 : index
    %c0_5 = arith.constant 0 : index
    %50 = vector.load %arg2[%c256, %c0_5] : memref<384x4xf32, #tpu.memory_space<vmem>>, vector<32x4xf32>
    %51 = vector.extract_strided_slice %50 {offsets = [0, 0], sizes = [32, 1], strides = [1, 1]} : vector<32x4xf32> to vector<32x1xf32>
    %52 = vector.extract_strided_slice %1 {offsets = [0, 0], sizes = [1, 256], strides = [1, 1]} : vector<4x256xf32> to vector<1x256xf32>
    %53 = vector.broadcast %51 : vector<32x1xf32> to vector<32x256xf32>
    %54 = vector.broadcast %52 : vector<1x256xf32> to vector<32x256xf32>
    %55 = arith.mulf %53, %54 : vector<32x256xf32>
    %56 = vector.extract_strided_slice %50 {offsets = [0, 1], sizes = [32, 1], strides = [1, 1]} : vector<32x4xf32> to vector<32x1xf32>
    %57 = vector.extract_strided_slice %1 {offsets = [1, 0], sizes = [1, 256], strides = [1, 1]} : vector<4x256xf32> to vector<1x256xf32>
    %58 = vector.broadcast %56 : vector<32x1xf32> to vector<32x256xf32>
    %59 = vector.broadcast %57 : vector<1x256xf32> to vector<32x256xf32>
    %60 = arith.mulf %58, %59 : vector<32x256xf32>
    %61 = arith.addf %55, %60 : vector<32x256xf32>
    %62 = vector.extract_strided_slice %50 {offsets = [0, 2], sizes = [32, 1], strides = [1, 1]} : vector<32x4xf32> to vector<32x1xf32>
    %63 = vector.extract_strided_slice %1 {offsets = [2, 0], sizes = [1, 256], strides = [1, 1]} : vector<4x256xf32> to vector<1x256xf32>
    %64 = vector.broadcast %62 : vector<32x1xf32> to vector<32x256xf32>
    %65 = vector.broadcast %63 : vector<1x256xf32> to vector<32x256xf32>
    %66 = arith.mulf %64, %65 : vector<32x256xf32>
    %67 = arith.addf %61, %66 : vector<32x256xf32>
    %68 = vector.extract_strided_slice %50 {offsets = [0, 3], sizes = [32, 1], strides = [1, 1]} : vector<32x4xf32> to vector<32x1xf32>
    %69 = vector.extract_strided_slice %1 {offsets = [3, 0], sizes = [1, 256], strides = [1, 1]} : vector<4x256xf32> to vector<1x256xf32>
    %70 = vector.broadcast %68 : vector<32x1xf32> to vector<32x256xf32>
    %71 = vector.broadcast %69 : vector<1x256xf32> to vector<32x256xf32>
    %72 = arith.mulf %70, %71 : vector<32x256xf32>
    %73 = arith.addf %67, %72 : vector<32x256xf32>
    %cst = arith.constant dense<0xFF800000> : vector<32xf32>
    %74 = vector.multi_reduction <maximumf>, %49, %cst [1] : vector<32x256xf32> to vector<32xf32>
    %75 = vector.shape_cast %74 : vector<32xf32> to vector<32x1xf32>
    %76 = vector.broadcast %75 : vector<32x1xf32> to vector<32x256xf32>
    %77 = arith.subf %49, %76 : vector<32x256xf32>
    %78 = math.exp %77 : vector<32x256xf32>
    %cst_6 = arith.constant dense<0.000000e+00> : vector<32xf32>
    %79 = vector.multi_reduction <add>, %78, %cst_6 [1] : vector<32x256xf32> to vector<32xf32>
    %80 = vector.shape_cast %79 : vector<32xf32> to vector<32x1xf32>
    %81 = tpu.reciprocal %80 {approx = true} : vector<32x1xf32> -> vector<32x1xf32>
    %cst_7 = arith.constant dense<0.000000e+00> : vector<32x32xf32>
    %82 = tpu.matmul %78, %73, %cst_7 {dimension_numbers = #tpu.dot_dimension_numbers<[1], [1], [0], [0], [0, 0, 1, 0], [], []>} : vector<32x256xf32>, vector<32x256xf32>, vector<32x32xf32> -> vector<32x32xf32>
    %83 = vector.broadcast %81 : vector<32x1xf32> to vector<32x32xf32>
    %84 = arith.mulf %82, %83 : vector<32x32xf32>
    %cst_8 = arith.constant dense<0.000000e+00> : vector<32x256xf32>
    %85 = tpu.matmul %84, %25, %cst_8 {dimension_numbers = #tpu.dot_dimension_numbers<[0], [0], [1], [1], [0, 1, 1, 1], [], []>} : vector<32x32xf32>, vector<32x256xf32>, vector<32x256xf32> -> vector<32x256xf32>
    %c0_9 = arith.constant 0 : index
    %c0_10 = arith.constant 0 : index
    %86 = vector.load %arg7[%c0_9, %c0_10] : memref<128x256xf32, #tpu.memory_space<vmem>>, vector<32x256xf32>
    tpu.vector_store %arg7[%c0_9, %c0_10], %85 {strides = array<i32>} : memref<128x256xf32, #tpu.memory_space<vmem>>, vector<32x256xf32>,
    %c32 = arith.constant 32 : index
    %c0_11 = arith.constant 0 : index
    %87 = vector.load %arg2[%c32, %c0_11] : memref<384x4xf32, #tpu.memory_space<vmem>>, vector<32x4xf32>
    %88 = vector.extract_strided_slice %87 {offsets = [0, 0], sizes = [32, 1], strides = [1, 1]} : vector<32x4xf32> to vector<32x1xf32>
    %89 = vector.extract_strided_slice %1 {offsets = [0, 0], sizes = [1, 256], strides = [1, 1]} : vector<4x256xf32> to vector<1x256xf32>
    %90 = vector.broadcast %88 : vector<32x1xf32> to vector<32x256xf32>
    %91 = vector.broadcast %89 : vector<1x256xf32> to vector<32x256xf32>
    %92 = arith.mulf %90, %91 : vector<32x256xf32>
    %93 = vector.extract_strided_slice %87 {offsets = [0, 1], sizes = [32, 1], strides = [1, 1]} : vector<32x4xf32> to vector<32x1xf32>
    %94 = vector.extract_strided_slice %1 {offsets = [1, 0], sizes = [1, 256], strides = [1, 1]} : vector<4x256xf32> to vector<1x256xf32>
    %95 = vector.broadcast %93 : vector<32x1xf32> to vector<32x256xf32>
    %96 = vector.broadcast %94 : vector<1x256xf32> to vector<32x256xf32>
    %97 = arith.mulf %95, %96 : vector<32x256xf32>
    %98 = arith.addf %92, %97 : vector<32x256xf32>
    %99 = vector.extract_strided_slice %87 {offsets = [0, 2], sizes = [32, 1], strides = [1, 1]} : vector<32x4xf32> to vector<32x1xf32>
    %100 = vector.extract_strided_slice %1 {offsets = [2, 0], sizes = [1, 256], strides = [1, 1]} : vector<4x256xf32> to vector<1x256xf32>
    %101 = vector.broadcast %99 : vector<32x1xf32> to vector<32x256xf32>
    %102 = vector.broadcast %100 : vector<1x256xf32> to vector<32x256xf32>
    %103 = arith.mulf %101, %102 : vector<32x256xf32>
    %104 = arith.addf %98, %103 : vector<32x256xf32>
    %105 = vector.extract_strided_slice %87 {offsets = [0, 3], sizes = [32, 1], strides = [1, 1]} : vector<32x4xf32> to vector<32x1xf32>
    %106 = vector.extract_strided_slice %1 {offsets = [3, 0], sizes = [1, 256], strides = [1, 1]} : vector<4x256xf32> to vector<1x256xf32>
    %107 = vector.broadcast %105 : vector<32x1xf32> to vector<32x256xf32>
    %108 = vector.broadcast %106 : vector<1x256xf32> to vector<32x256xf32>
    %109 = arith.mulf %107, %108 : vector<32x256xf32>
    %110 = arith.addf %104, %109 : vector<32x256xf32>
    %c160 = arith.constant 160 : index
    %c0_12 = arith.constant 0 : index
    %111 = vector.load %arg2[%c160, %c0_12] : memref<384x4xf32, #tpu.memory_space<vmem>>, vector<32x4xf32>
    %112 = vector.extract_strided_slice %111 {offsets = [0, 0], sizes = [32, 1], strides = [1, 1]} : vector<32x4xf32> to vector<32x1xf32>
    %113 = vector.extract_strided_slice %1 {offsets = [0, 0], sizes = [1, 256], strides = [1, 1]} : vector<4x256xf32> to vector<1x256xf32>
    %114 = vector.broadcast %112 : vector<32x1xf32> to vector<32x256xf32>
    %115 = vector.broadcast %113 : vector<1x256xf32> to vector<32x256xf32>
    %116 = arith.mulf %114, %115 : vector<32x256xf32>
    %117 = vector.extract_strided_slice %111 {offsets = [0, 1], sizes = [32, 1], strides = [1, 1]} : vector<32x4xf32> to vector<32x1xf32>
    %118 = vector.extract_strided_slice %1 {offsets = [1, 0], sizes = [1, 256], strides = [1, 1]} : vector<4x256xf32> to vector<1x256xf32>
    %119 = vector.broadcast %117 : vector<32x1xf32> to vector<32x256xf32>
    %120 = vector.broadcast %118 : vector<1x256xf32> to vector<32x256xf32>
    %121 = arith.mulf %119, %120 : vector<32x256xf32>
    %122 = arith.addf %116, %121 : vector<32x256xf32>
    %123 = vector.extract_strided_slice %111 {offsets = [0, 2], sizes = [32, 1], strides = [1, 1]} : vector<32x4xf32> to vector<32x1xf32>
    %124 = vector.extract_strided_slice %1 {offsets = [2, 0], sizes = [1, 256], strides = [1, 1]} : vector<4x256xf32> to vector<1x256xf32>
    %125 = vector.broadcast %123 : vector<32x1xf32> to vector<32x256xf32>
    %126 = vector.broadcast %124 : vector<1x256xf32> to vector<32x256xf32>
    %127 = arith.mulf %125, %126 : vector<32x256xf32>
    %128 = arith.addf %122, %127 : vector<32x256xf32>
    %129 = vector.extract_strided_slice %111 {offsets = [0, 3], sizes = [32, 1], strides = [1, 1]} : vector<32x4xf32> to vector<32x1xf32>
    %130 = vector.extract_strided_slice %1 {offsets = [3, 0], sizes = [1, 256], strides = [1, 1]} : vector<4x256xf32> to vector<1x256xf32>
    %131 = vector.broadcast %129 : vector<32x1xf32> to vector<32x256xf32>
    %132 = vector.broadcast %130 : vector<1x256xf32> to vector<32x256xf32>
    %133 = arith.mulf %131, %132 : vector<32x256xf32>
    %134 = arith.addf %128, %133 : vector<32x256xf32>
    %c288 = arith.constant 288 : index
    %c0_13 = arith.constant 0 : index
    %135 = vector.load %arg2[%c288, %c0_13] : memref<384x4xf32, #tpu.memory_space<vmem>>, vector<32x4xf32>
    %136 = vector.extract_strided_slice %135 {offsets = [0, 0], sizes = [32, 1], strides = [1, 1]} : vector<32x4xf32> to vector<32x1xf32>
    %137 = vector.extract_strided_slice %1 {offsets = [0, 0], sizes = [1, 256], strides = [1, 1]} : vector<4x256xf32> to vector<1x256xf32>
    %138 = vector.broadcast %136 : vector<32x1xf32> to vector<32x256xf32>
    %139 = vector.broadcast %137 : vector<1x256xf32> to vector<32x256xf32>
    %140 = arith.mulf %138, %139 : vector<32x256xf32>
    %141 = vector.extract_strided_slice %135 {offsets = [0, 1], sizes = [32, 1], strides = [1, 1]} : vector<32x4xf32> to vector<32x1xf32>
    %142 = vector.extract_strided_slice %1 {offsets = [1, 0], sizes = [1, 256], strides = [1, 1]} : vector<4x256xf32> to vector<1x256xf32>
    %143 = vector.broadcast %141 : vector<32x1xf32> to vector<32x256xf32>
    %144 = vector.broadcast %142 : vector<1x256xf32> to vector<32x256xf32>
    %145 = arith.mulf %143, %144 : vector<32x256xf32>
    %146 = arith.addf %140, %145 : vector<32x256xf32>
    %147 = vector.extract_strided_slice %135 {offsets = [0, 2], sizes = [32, 1], strides = [1, 1]} : vector<32x4xf32> to vector<32x1xf32>
    %148 = vector.extract_strided_slice %1 {offsets = [2, 0], sizes = [1, 256], strides = [1, 1]} : vector<4x256xf32> to vector<1x256xf32>
    %149 = vector.broadcast %147 : vector<32x1xf32> to vector<32x256xf32>
    %150 = vector.broadcast %148 : vector<1x256xf32> to vector<32x256xf32>
    %151 = arith.mulf %149, %150 : vector<32x256xf32>
    %152 = arith.addf %146, %151 : vector<32x256xf32>
    %153 = vector.extract_strided_slice %135 {offsets = [0, 3], sizes = [32, 1], strides = [1, 1]} : vector<32x4xf32> to vector<32x1xf32>
    %154 = vector.extract_strided_slice %1 {offsets = [3, 0], sizes = [1, 256], strides = [1, 1]} : vector<4x256xf32> to vector<1x256xf32>
    %155 = vector.broadcast %153 : vector<32x1xf32> to vector<32x256xf32>
    %156 = vector.broadcast %154 : vector<1x256xf32> to vector<32x256xf32>
    %157 = arith.mulf %155, %156 : vector<32x256xf32>
    %158 = arith.addf %152, %157 : vector<32x256xf32>
    %cst_14 = arith.constant dense<0xFF800000> : vector<32xf32>
    %159 = vector.multi_reduction <maximumf>, %134, %cst_14 [1] : vector<32x256xf32> to vector<32xf32>
    %160 = vector.shape_cast %159 : vector<32xf32> to vector<32x1xf32>
    %161 = vector.broadcast %160 : vector<32x1xf32> to vector<32x256xf32>
    %162 = arith.subf %134, %161 : vector<32x256xf32>
    %163 = math.exp %162 : vector<32x256xf32>
    %cst_15 = arith.constant dense<0.000000e+00> : vector<32xf32>
    %164 = vector.multi_reduction <add>, %163, %cst_15 [1] : vector<32x256xf32> to vector<32xf32>
    %165 = vector.shape_cast %164 : vector<32xf32> to vector<32x1xf32>
    %166 = tpu.reciprocal %165 {approx = true} : vector<32x1xf32> -> vector<32x1xf32>
    %cst_16 = arith.constant dense<0.000000e+00> : vector<32x32xf32>
    %167 = tpu.matmul %163, %158, %cst_16 {dimension_numbers = #tpu.dot_dimension_numbers<[1], [1], [0], [0], [0, 0, 1, 0], [], []>} : vector<32x256xf32>, vector<32x256xf32>, vector<32x32xf32> -> vector<32x32xf32>
    %168 = vector.broadcast %166 : vector<32x1xf32> to vector<32x32xf32>
    %169 = arith.mulf %167, %168 : vector<32x32xf32>
    %cst_17 = arith.constant dense<0.000000e+00> : vector<32x256xf32>
    %170 = tpu.matmul %169, %110, %cst_17 {dimension_numbers = #tpu.dot_dimension_numbers<[0], [0], [1], [1], [0, 1, 1, 1], [], []>} : vector<32x32xf32>, vector<32x256xf32>, vector<32x256xf32> -> vector<32x256xf32>
    %c32_18 = arith.constant 32 : index
    %c0_19 = arith.constant 0 : index
    %171 = vector.load %arg7[%c32_18, %c0_19] : memref<128x256xf32, #tpu.memory_space<vmem>>, vector<32x256xf32>
    tpu.vector_store %arg7[%c32_18, %c0_19], %170 {strides = array<i32>} : memref<128x256xf32, #tpu.memory_space<vmem>>, vector<32x256xf32>,
    %c64 = arith.constant 64 : index
    %c0_20 = arith.constant 0 : index
    %172 = vector.load %arg2[%c64, %c0_20] : memref<384x4xf32, #tpu.memory_space<vmem>>, vector<32x4xf32>
    %173 = vector.extract_strided_slice %172 {offsets = [0, 0], sizes = [32, 1], strides = [1, 1]} : vector<32x4xf32> to vector<32x1xf32>
    %174 = vector.extract_strided_slice %1 {offsets = [0, 0], sizes = [1, 256], strides = [1, 1]} : vector<4x256xf32> to vector<1x256xf32>
    %175 = vector.broadcast %173 : vector<32x1xf32> to vector<32x256xf32>
    %176 = vector.broadcast %174 : vector<1x256xf32> to vector<32x256xf32>
    %177 = arith.mulf %175, %176 : vector<32x256xf32>
    %178 = vector.extract_strided_slice %172 {offsets = [0, 1], sizes = [32, 1], strides = [1, 1]} : vector<32x4xf32> to vector<32x1xf32>
    %179 = vector.extract_strided_slice %1 {offsets = [1, 0], sizes = [1, 256], strides = [1, 1]} : vector<4x256xf32> to vector<1x256xf32>
    %180 = vector.broadcast %178 : vector<32x1xf32> to vector<32x256xf32>
    %181 = vector.broadcast %179 : vector<1x256xf32> to vector<32x256xf32>
    %182 = arith.mulf %180, %181 : vector<32x256xf32>
    %183 = arith.addf %177, %182 : vector<32x256xf32>
    %184 = vector.extract_strided_slice %172 {offsets = [0, 2], sizes = [32, 1], strides = [1, 1]} : vector<32x4xf32> to vector<32x1xf32>
    %185 = vector.extract_strided_slice %1 {offsets = [2, 0], sizes = [1, 256], strides = [1, 1]} : vector<4x256xf32> to vector<1x256xf32>
    %186 = vector.broadcast %184 : vector<32x1xf32> to vector<32x256xf32>
    %187 = vector.broadcast %185 : vector<1x256xf32> to vector<32x256xf32>
    %188 = arith.mulf %186, %187 : vector<32x256xf32>
    %189 = arith.addf %183, %188 : vector<32x256xf32>
    %190 = vector.extract_strided_slice %172 {offsets = [0, 3], sizes = [32, 1], strides = [1, 1]} : vector<32x4xf32> to vector<32x1xf32>
    %191 = vector.extract_strided_slice %1 {offsets = [3, 0], sizes = [1, 256], strides = [1, 1]} : vector<4x256xf32> to vector<1x256xf32>
    %192 = vector.broadcast %190 : vector<32x1xf32> to vector<32x256xf32>
    %193 = vector.broadcast %191 : vector<1x256xf32> to vector<32x256xf32>
    %194 = arith.mulf %192, %193 : vector<32x256xf32>
    %195 = arith.addf %189, %194 : vector<32x256xf32>
    %c192 = arith.constant 192 : index
    %c0_21 = arith.constant 0 : index
    %196 = vector.load %arg2[%c192, %c0_21] : memref<384x4xf32, #tpu.memory_space<vmem>>, vector<32x4xf32>
    %197 = vector.extract_strided_slice %196 {offsets = [0, 0], sizes = [32, 1], strides = [1, 1]} : vector<32x4xf32> to vector<32x1xf32>
    %198 = vector.extract_strided_slice %1 {offsets = [0, 0], sizes = [1, 256], strides = [1, 1]} : vector<4x256xf32> to vector<1x256xf32>
    %199 = vector.broadcast %197 : vector<32x1xf32> to vector<32x256xf32>
    %200 = vector.broadcast %198 : vector<1x256xf32> to vector<32x256xf32>
    %201 = arith.mulf %199, %200 : vector<32x256xf32>
    %202 = vector.extract_strided_slice %196 {offsets = [0, 1], sizes = [32, 1], strides = [1, 1]} : vector<32x4xf32> to vector<32x1xf32>
    %203 = vector.extract_strided_slice %1 {offsets = [1, 0], sizes = [1, 256], strides = [1, 1]} : vector<4x256xf32> to vector<1x256xf32>
    %204 = vector.broadcast %202 : vector<32x1xf32> to vector<32x256xf32>
    %205 = vector.broadcast %203 : vector<1x256xf32> to vector<32x256xf32>
    %206 = arith.mulf %204, %205 : vector<32x256xf32>
    %207 = arith.addf %201, %206 : vector<32x256xf32>
    %208 = vector.extract_strided_slice %196 {offsets = [0, 2], sizes = [32, 1], strides = [1, 1]} : vector<32x4xf32> to vector<32x1xf32>
    %209 = vector.extract_strided_slice %1 {offsets = [2, 0], sizes = [1, 256], strides = [1, 1]} : vector<4x256xf32> to vector<1x256xf32>
    %210 = vector.broadcast %208 : vector<32x1xf32> to vector<32x256xf32>
    %211 = vector.broadcast %209 : vector<1x256xf32> to vector<32x256xf32>
    %212 = arith.mulf %210, %211 : vector<32x256xf32>
    %213 = arith.addf %207, %212 : vector<32x256xf32>
    %214 = vector.extract_strided_slice %196 {offsets = [0, 3], sizes = [32, 1], strides = [1, 1]} : vector<32x4xf32> to vector<32x1xf32>
    %215 = vector.extract_strided_slice %1 {offsets = [3, 0], sizes = [1, 256], strides = [1, 1]} : vector<4x256xf32> to vector<1x256xf32>
    %216 = vector.broadcast %214 : vector<32x1xf32> to vector<32x256xf32>
    %217 = vector.broadcast %215 : vector<1x256xf32> to vector<32x256xf32>
    %218 = arith.mulf %216, %217 : vector<32x256xf32>
    %219 = arith.addf %213, %218 : vector<32x256xf32>
    %c320 = arith.constant 320 : index
    %c0_22 = arith.constant 0 : index
    %220 = vector.load %arg2[%c320, %c0_22] : memref<384x4xf32, #tpu.memory_space<vmem>>, vector<32x4xf32>
    %221 = vector.extract_strided_slice %220 {offsets = [0, 0], sizes = [32, 1], strides = [1, 1]} : vector<32x4xf32> to vector<32x1xf32>
    %222 = vector.extract_strided_slice %1 {offsets = [0, 0], sizes = [1, 256], strides = [1, 1]} : vector<4x256xf32> to vector<1x256xf32>
    %223 = vector.broadcast %221 : vector<32x1xf32> to vector<32x256xf32>
    %224 = vector.broadcast %222 : vector<1x256xf32> to vector<32x256xf32>
    %225 = arith.mulf %223, %224 : vector<32x256xf32>
    %226 = vector.extract_strided_slice %220 {offsets = [0, 1], sizes = [32, 1], strides = [1, 1]} : vector<32x4xf32> to vector<32x1xf32>
    %227 = vector.extract_strided_slice %1 {offsets = [1, 0], sizes = [1, 256], strides = [1, 1]} : vector<4x256xf32> to vector<1x256xf32>
    %228 = vector.broadcast %226 : vector<32x1xf32> to vector<32x256xf32>
    %229 = vector.broadcast %227 : vector<1x256xf32> to vector<32x256xf32>
    %230 = arith.mulf %228, %229 : vector<32x256xf32>
    %231 = arith.addf %225, %230 : vector<32x256xf32>
    %232 = vector.extract_strided_slice %220 {offsets = [0, 2], sizes = [32, 1], strides = [1, 1]} : vector<32x4xf32> to vector<32x1xf32>
    %233 = vector.extract_strided_slice %1 {offsets = [2, 0], sizes = [1, 256], strides = [1, 1]} : vector<4x256xf32> to vector<1x256xf32>
    %234 = vector.broadcast %232 : vector<32x1xf32> to vector<32x256xf32>
    %235 = vector.broadcast %233 : vector<1x256xf32> to vector<32x256xf32>
    %236 = arith.mulf %234, %235 : vector<32x256xf32>
    %237 = arith.addf %231, %236 : vector<32x256xf32>
    %238 = vector.extract_strided_slice %220 {offsets = [0, 3], sizes = [32, 1], strides = [1, 1]} : vector<32x4xf32> to vector<32x1xf32>
    %239 = vector.extract_strided_slice %1 {offsets = [3, 0], sizes = [1, 256], strides = [1, 1]} : vector<4x256xf32> to vector<1x256xf32>
    %240 = vector.broadcast %238 : vector<32x1xf32> to vector<32x256xf32>
    %241 = vector.broadcast %239 : vector<1x256xf32> to vector<32x256xf32>
    %242 = arith.mulf %240, %241 : vector<32x256xf32>
    %243 = arith.addf %237, %242 : vector<32x256xf32>
    %cst_23 = arith.constant dense<0xFF800000> : vector<32xf32>
    %244 = vector.multi_reduction <maximumf>, %219, %cst_23 [1] : vector<32x256xf32> to vector<32xf32>
    %245 = vector.shape_cast %244 : vector<32xf32> to vector<32x1xf32>
    %246 = vector.broadcast %245 : vector<32x1xf32> to vector<32x256xf32>
    %247 = arith.subf %219, %246 : vector<32x256xf32>
    %248 = math.exp %247 : vector<32x256xf32>
    %cst_24 = arith.constant dense<0.000000e+00> : vector<32xf32>
    %249 = vector.multi_reduction <add>, %248, %cst_24 [1] : vector<32x256xf32> to vector<32xf32>
    %250 = vector.shape_cast %249 : vector<32xf32> to vector<32x1xf32>
    %251 = tpu.reciprocal %250 {approx = true} : vector<32x1xf32> -> vector<32x1xf32>
    %cst_25 = arith.constant dense<0.000000e+00> : vector<32x32xf32>
    %252 = tpu.matmul %248, %243, %cst_25 {dimension_numbers = #tpu.dot_dimension_numbers<[1], [1], [0], [0], [0, 0, 1, 0], [], []>} : vector<32x256xf32>, vector<32x256xf32>, vector<32x32xf32> -> vector<32x32xf32>
    %253 = vector.broadcast %251 : vector<32x1xf32> to vector<32x32xf32>
    %254 = arith.mulf %252, %253 : vector<32x32xf32>
    %cst_26 = arith.constant dense<0.000000e+00> : vector<32x256xf32>
    %255 = tpu.matmul %254, %195, %cst_26 {dimension_numbers = #tpu.dot_dimension_numbers<[0], [0], [1], [1], [0, 1, 1, 1], [], []>} : vector<32x32xf32>, vector<32x256xf32>, vector<32x256xf32> -> vector<32x256xf32>
    %c64_27 = arith.constant 64 : index
    %c0_28 = arith.constant 0 : index
    %256 = vector.load %arg7[%c64_27, %c0_28] : memref<128x256xf32, #tpu.memory_space<vmem>>, vector<32x256xf32>
    tpu.vector_store %arg7[%c64_27, %c0_28], %255 {strides = array<i32>} : memref<128x256xf32, #tpu.memory_space<vmem>>, vector<32x256xf32>,
    %c96 = arith.constant 96 : index
    %c0_29 = arith.constant 0 : index
    %257 = vector.load %arg2[%c96, %c0_29] : memref<384x4xf32, #tpu.memory_space<vmem>>, vector<32x4xf32>
    %258 = vector.extract_strided_slice %257 {offsets = [0, 0], sizes = [32, 1], strides = [1, 1]} : vector<32x4xf32> to vector<32x1xf32>
    %259 = vector.extract_strided_slice %1 {offsets = [0, 0], sizes = [1, 256], strides = [1, 1]} : vector<4x256xf32> to vector<1x256xf32>
    %260 = vector.broadcast %258 : vector<32x1xf32> to vector<32x256xf32>
    %261 = vector.broadcast %259 : vector<1x256xf32> to vector<32x256xf32>
    %262 = arith.mulf %260, %261 : vector<32x256xf32>
    %263 = vector.extract_strided_slice %257 {offsets = [0, 1], sizes = [32, 1], strides = [1, 1]} : vector<32x4xf32> to vector<32x1xf32>
    %264 = vector.extract_strided_slice %1 {offsets = [1, 0], sizes = [1, 256], strides = [1, 1]} : vector<4x256xf32> to vector<1x256xf32>
    %265 = vector.broadcast %263 : vector<32x1xf32> to vector<32x256xf32>
    %266 = vector.broadcast %264 : vector<1x256xf32> to vector<32x256xf32>
    %267 = arith.mulf %265, %266 : vector<32x256xf32>
    %268 = arith.addf %262, %267 : vector<32x256xf32>
    %269 = vector.extract_strided_slice %257 {offsets = [0, 2], sizes = [32, 1], strides = [1, 1]} : vector<32x4xf32> to vector<32x1xf32>
    %270 = vector.extract_strided_slice %1 {offsets = [2, 0], sizes = [1, 256], strides = [1, 1]} : vector<4x256xf32> to vector<1x256xf32>
    %271 = vector.broadcast %269 : vector<32x1xf32> to vector<32x256xf32>
    %272 = vector.broadcast %270 : vector<1x256xf32> to vector<32x256xf32>
    %273 = arith.mulf %271, %272 : vector<32x256xf32>
    %274 = arith.addf %268, %273 : vector<32x256xf32>
    %275 = vector.extract_strided_slice %257 {offsets = [0, 3], sizes = [32, 1], strides = [1, 1]} : vector<32x4xf32> to vector<32x1xf32>
    %276 = vector.extract_strided_slice %1 {offsets = [3, 0], sizes = [1, 256], strides = [1, 1]} : vector<4x256xf32> to vector<1x256xf32>
    %277 = vector.broadcast %275 : vector<32x1xf32> to vector<32x256xf32>
    %278 = vector.broadcast %276 : vector<1x256xf32> to vector<32x256xf32>
    %279 = arith.mulf %277, %278 : vector<32x256xf32>
    %280 = arith.addf %274, %279 : vector<32x256xf32>
    %c224 = arith.constant 224 : index
    %c0_30 = arith.constant 0 : index
    %281 = vector.load %arg2[%c224, %c0_30] : memref<384x4xf32, #tpu.memory_space<vmem>>, vector<32x4xf32>
    %282 = vector.extract_strided_slice %281 {offsets = [0, 0], sizes = [32, 1], strides = [1, 1]} : vector<32x4xf32> to vector<32x1xf32>
    %283 = vector.extract_strided_slice %1 {offsets = [0, 0], sizes = [1, 256], strides = [1, 1]} : vector<4x256xf32> to vector<1x256xf32>
    %284 = vector.broadcast %282 : vector<32x1xf32> to vector<32x256xf32>
    %285 = vector.broadcast %283 : vector<1x256xf32> to vector<32x256xf32>
    %286 = arith.mulf %284, %285 : vector<32x256xf32>
    %287 = vector.extract_strided_slice %281 {offsets = [0, 1], sizes = [32, 1], strides = [1, 1]} : vector<32x4xf32> to vector<32x1xf32>
    %288 = vector.extract_strided_slice %1 {offsets = [1, 0], sizes = [1, 256], strides = [1, 1]} : vector<4x256xf32> to vector<1x256xf32>
    %289 = vector.broadcast %287 : vector<32x1xf32> to vector<32x256xf32>
    %290 = vector.broadcast %288 : vector<1x256xf32> to vector<32x256xf32>
    %291 = arith.mulf %289, %290 : vector<32x256xf32>
    %292 = arith.addf %286, %291 : vector<32x256xf32>
    %293 = vector.extract_strided_slice %281 {offsets = [0, 2], sizes = [32, 1], strides = [1, 1]} : vector<32x4xf32> to vector<32x1xf32>
    %294 = vector.extract_strided_slice %1 {offsets = [2, 0], sizes = [1, 256], strides = [1, 1]} : vector<4x256xf32> to vector<1x256xf32>
    %295 = vector.broadcast %293 : vector<32x1xf32> to vector<32x256xf32>
    %296 = vector.broadcast %294 : vector<1x256xf32> to vector<32x256xf32>
    %297 = arith.mulf %295, %296 : vector<32x256xf32>
    %298 = arith.addf %292, %297 : vector<32x256xf32>
    %299 = vector.extract_strided_slice %281 {offsets = [0, 3], sizes = [32, 1], strides = [1, 1]} : vector<32x4xf32> to vector<32x1xf32>
    %300 = vector.extract_strided_slice %1 {offsets = [3, 0], sizes = [1, 256], strides = [1, 1]} : vector<4x256xf32> to vector<1x256xf32>
    %301 = vector.broadcast %299 : vector<32x1xf32> to vector<32x256xf32>
    %302 = vector.broadcast %300 : vector<1x256xf32> to vector<32x256xf32>
    %303 = arith.mulf %301, %302 : vector<32x256xf32>
    %304 = arith.addf %298, %303 : vector<32x256xf32>
    %c352 = arith.constant 352 : index
    %c0_31 = arith.constant 0 : index
    %305 = vector.load %arg2[%c352, %c0_31] : memref<384x4xf32, #tpu.memory_space<vmem>>, vector<32x4xf32>
    %306 = vector.extract_strided_slice %305 {offsets = [0, 0], sizes = [32, 1], strides = [1, 1]} : vector<32x4xf32> to vector<32x1xf32>
    %307 = vector.extract_strided_slice %1 {offsets = [0, 0], sizes = [1, 256], strides = [1, 1]} : vector<4x256xf32> to vector<1x256xf32>
    %308 = vector.broadcast %306 : vector<32x1xf32> to vector<32x256xf32>
    %309 = vector.broadcast %307 : vector<1x256xf32> to vector<32x256xf32>
    %310 = arith.mulf %308, %309 : vector<32x256xf32>
    %311 = vector.extract_strided_slice %305 {offsets = [0, 1], sizes = [32, 1], strides = [1, 1]} : vector<32x4xf32> to vector<32x1xf32>
    %312 = vector.extract_strided_slice %1 {offsets = [1, 0], sizes = [1, 256], strides = [1, 1]} : vector<4x256xf32> to vector<1x256xf32>
    %313 = vector.broadcast %311 : vector<32x1xf32> to vector<32x256xf32>
    %314 = vector.broadcast %312 : vector<1x256xf32> to vector<32x256xf32>
    %315 = arith.mulf %313, %314 : vector<32x256xf32>
    %316 = arith.addf %310, %315 : vector<32x256xf32>
    %317 = vector.extract_strided_slice %305 {offsets = [0, 2], sizes = [32, 1], strides = [1, 1]} : vector<32x4xf32> to vector<32x1xf32>
    %318 = vector.extract_strided_slice %1 {offsets = [2, 0], sizes = [1, 256], strides = [1, 1]} : vector<4x256xf32> to vector<1x256xf32>
    %319 = vector.broadcast %317 : vector<32x1xf32> to vector<32x256xf32>
    %320 = vector.broadcast %318 : vector<1x256xf32> to vector<32x256xf32>
    %321 = arith.mulf %319, %320 : vector<32x256xf32>
    %322 = arith.addf %316, %321 : vector<32x256xf32>
    %323 = vector.extract_strided_slice %305 {offsets = [0, 3], sizes = [32, 1], strides = [1, 1]} : vector<32x4xf32> to vector<32x1xf32>
    %324 = vector.extract_strided_slice %1 {offsets = [3, 0], sizes = [1, 256], strides = [1, 1]} : vector<4x256xf32> to vector<1x256xf32>
    %325 = vector.broadcast %323 : vector<32x1xf32> to vector<32x256xf32>
    %326 = vector.broadcast %324 : vector<1x256xf32> to vector<32x256xf32>
    %327 = arith.mulf %325, %326 : vector<32x256xf32>
    %328 = arith.addf %322, %327 : vector<32x256xf32>
    %cst_32 = arith.constant dense<0xFF800000> : vector<32xf32>
    %329 = vector.multi_reduction <maximumf>, %304, %cst_32 [1] : vector<32x256xf32> to vector<32xf32>
    %330 = vector.shape_cast %329 : vector<32xf32> to vector<32x1xf32>
    %331 = vector.broadcast %330 : vector<32x1xf32> to vector<32x256xf32>
    %332 = arith.subf %304, %331 : vector<32x256xf32>
    %333 = math.exp %332 : vector<32x256xf32>
    %cst_33 = arith.constant dense<0.000000e+00> : vector<32xf32>
    %334 = vector.multi_reduction <add>, %333, %cst_33 [1] : vector<32x256xf32> to vector<32xf32>
    %335 = vector.shape_cast %334 : vector<32xf32> to vector<32x1xf32>
    %336 = tpu.reciprocal %335 {approx = true} : vector<32x1xf32> -> vector<32x1xf32>
    %cst_34 = arith.constant dense<0.000000e+00> : vector<32x32xf32>
    %337 = tpu.matmul %333, %328, %cst_34 {dimension_numbers = #tpu.dot_dimension_numbers<[1], [1], [0], [0], [0, 0, 1, 0], [], []>} : vector<32x256xf32>, vector<32x256xf32>, vector<32x32xf32> -> vector<32x32xf32>
    %338 = vector.broadcast %336 : vector<32x1xf32> to vector<32x32xf32>
    %339 = arith.mulf %337, %338 : vector<32x32xf32>
    %cst_35 = arith.constant dense<0.000000e+00> : vector<32x256xf32>
    %340 = tpu.matmul %339, %280, %cst_35 {dimension_numbers = #tpu.dot_dimension_numbers<[0], [0], [1], [1], [0, 1, 1, 1], [], []>} : vector<32x32xf32>, vector<32x256xf32>, vector<32x256xf32> -> vector<32x256xf32>
    %c96_36 = arith.constant 96 : index
    %c0_37 = arith.constant 0 : index
    %341 = vector.load %arg7[%c96_36, %c0_37] : memref<128x256xf32, #tpu.memory_space<vmem>>, vector<32x256xf32>
    tpu.vector_store %arg7[%c96_36, %c0_37], %340 {strides = array<i32>} : memref<128x256xf32, #tpu.memory_space<vmem>>, vector<32x256xf32>,
    %c0_38 = arith.constant 0 : index
    %c0_39 = arith.constant 0 : index
    %342 = vector.load %arg3[%c0_38, %c0_39] : memref<4x128xf32, #tpu.memory_space<vmem>>, vector<4x128xf32>
    %c0_40 = arith.constant 0 : index
    %c0_41 = arith.constant 0 : index
    %343 = vector.load %arg7[%c0_40, %c0_41] : memref<128x256xf32, #tpu.memory_space<vmem>>, vector<128x256xf32>
    %cst_42 = arith.constant dense<0.000000e+00> : vector<4x256xf32>
    %344 = tpu.matmul %342, %343, %cst_42 {dimension_numbers = #tpu.dot_dimension_numbers<[1], [0], [0], [1], [0, 0, 1, 1], [], []>} : vector<4x128xf32>, vector<128x256xf32>, vector<4x256xf32> -> vector<4x256xf32>
    %c0_43 = arith.constant 0 : index
    %c0_44 = arith.constant 0 : index
    %345 = vector.load %arg4[%c0_43, %c0_44] : memref<4x1xf32, #tpu.memory_space<vmem>>, vector<4x1xf32>
    %346 = vector.broadcast %345 : vector<4x1xf32> to vector<4x256xf32>
    %347 = arith.addf %344, %346 : vector<4x256xf32>
    %c0_45 = arith.constant 0 : index
    %c0_46 = arith.constant 0 : index
    %348 = memref.load %arg5[%c0_45, %c0_46] : memref<1x1xf32, #tpu.memory_space<smem>>
    %349 = vector.broadcast %348 : f32 to vector<4x256xf32>
    %350 = arith.mulf %347, %349 : vector<4x256xf32>
    %c0_47 = arith.constant 0 : index
    %c0_48 = arith.constant 0 : index
    %c0_49 = arith.constant 0 : index
    %351 = vector.load %arg6[%c0_47, %c0_48, %c0_49] : memref<1x4x256xf32, #tpu.memory_space<vmem>>, vector<1x4x256xf32>
    %352 = vector.shape_cast %351 : vector<1x4x256xf32> to vector<4x256xf32>
    %353 = vector.shape_cast %350 : vector<4x256xf32> to vector<1x4x256xf32>
    tpu.vector_store %arg6[%c0_47, %c0_48, %c0_49], %353 {strides = array<i32>} : memref<1x4x256xf32, #tpu.memory_space<vmem>>, vector<1x4x256xf32>,
    return
  }
  func.func @transform_0(%arg0: i32) -> (i32, i32, i32) {
    %c0_i32 = arith.constant 0 : i32
    %c0_i32_0 = arith.constant 0 : i32
    %c0_i32_1 = arith.constant 0 : i32
    return %arg0, %c0_i32, %c0_i32_0 : i32, i32, i32
  }
  func.func @transform_1(%arg0: i32) -> (i32, i32) {
    %c0_i32 = arith.constant 0 : i32
    %c0_i32_0 = arith.constant 0 : i32
    %c0_i32_1 = arith.constant 0 : i32
    return %c0_i32, %c0_i32_0 : i32, i32
  }
  func.func @transform_2(%arg0: i32) -> (i32, i32) {
    %c0_i32 = arith.constant 0 : i32
    %c0_i32_0 = arith.constant 0 : i32
    %c0_i32_1 = arith.constant 0 : i32
    return %c0_i32, %c0_i32_0 : i32, i32
  }
  func.func @transform_3(%arg0: i32) -> (i32, i32) {
    %c0_i32 = arith.constant 0 : i32
    %c0_i32_0 = arith.constant 0 : i32
    %c0_i32_1 = arith.constant 0 : i32
    return %c0_i32, %c0_i32_0 : i32, i32
  }
  func.func @transform_4(%arg0: i32) -> (i32, i32) {
    %c0_i32 = arith.constant 0 : i32
    %c0_i32_0 = arith.constant 0 : i32
    %c0_i32_1 = arith.constant 0 : i32
    return %c0_i32, %c0_i32_0 : i32, i32
  }
  func.func @transform_5(%arg0: i32) -> (i32, i32, i32) {
    %c0_i32 = arith.constant 0 : i32
    %c0_i32_0 = arith.constant 0 : i32
    %c0_i32_1 = arith.constant 0 : i32
    return %arg0, %c0_i32, %c0_i32_0 : i32, i32, i32
  }
}

</mosaic_0001>

<bundles_post_ra>
// kernel: tpu_custom_call.1
= control target key start
LH: loop header
LB: loop body
LE: loop exit
PB: predicated region body
PF: predicated region fallthrough
CT: control target
= control target key end

     0   :  { %s5430_s0 = inlined_call_operand.vmem [shape: f32[2,4,256], index: 0, kind: input, shape index: {}]   ;;  %s5431_s1 = inlined_call_operand.vmem [shape: f32[384,4], index: 1, kind: input, shape index: {}]   ;;  %s5432_s2 = inlined_call_operand.vmem [shape: f32[4,128], index: 2, kind: input, shape index: {}]   ;;  %s5433_s3 = inlined_call_operand.vmem [shape: f32[4,1], index: 3, kind: input, shape index: {}]   ;;  %s5434_s4 = inlined_call_operand.<no memory space> [shape: f32[1,1], index: 4, kind: input, shape index: {}]   ;;  %s5435_s5 = inlined_call_operand.hbm [shape: f32[2,4,256], index: 5, kind: output, shape index: {}]  }
   0x1   :  { %10 = sst [smem:[#allocation3]] %s5434_s4 }
   0x2   :  { %11 = vsyncpa [#allocation5], 0 }
   0x3   :  { %13 = vsyncpa [#allocation5 + $0x1], 0  ;;  %s3606_s20 = smov 0   ;;  %s3608_s21 = smov 0  }
   0x4   :  { %s3610_s22 = smov 0   ;;  %s3612_s23 = smov 0  }
   0x5 LB: > { %s3627_s4 = sadd.s32 4294967295, %s3565_s23   ;;  %s3156_s24 = sadd.s32 4294967294, %s3565_s23   ;;  %s3565_s23 = sphi %s3612_s23, %s5638_s23   ;;  %s3561_s22 = sphi %s3610_s22, %s5637_s22   ;;  %s3557_s21 = sphi %s3608_s21, %s5636_s21   ;;  %s3553_s20 = sphi %s3606_s20, %s5635_s20  }
   0x6   : > { %s3631_s25 = sadd.s32 1, %s3565_s23   ;;  %s136_s26 = sadd.s32 1, %s3561_s22 }
   0x7   : > { %s133_s27 = ssub.s32 %s3565_s23, %s3631_s25  ;;  %p146_p0 = scmp.ne.s32.totalorder %s3561_s22, %s3557_s21 }
   0x8   : > { %p134_p1 = scmp.eq.s32.totalorder %s133_s27, 0  ;;  %p147_p2 = scmp.eq.s32.totalorder %s3627_s4, 1 }
   0x9   : > { %p152_p3 = scmp.ne.s32.totalorder %s3557_s21, %s3553_s20  ;;  %p153_p4 = scmp.eq.s32.totalorder %s3156_s24, 1 }
   0xa   : > { %s3642_s28 = scalar_select %p134_p1, %s3561_s22, %s136_s26  }
   0xb   : > { %p3644_p5 = por %p147_p2, %p146_p0  ;;  %p3648_p6 = por %p153_p4, %p152_p3 }
   0xc   : > { %p3159_p7 = scmp.ge.s32.totalorder %s3565_s23, 1  ;;  %p191_p8 = scmp.lt.s32.totalorder %s3565_s23, 3 }
   0xe   : > { %p192_p9 = pnand %p3159_p7, %p191_p8 }
  0x10   : > { %195 = sbr.rel (%p192_p9) target bundleno = 2141 (0x85d), region = 40 }
  0x17   : > { %v426_v0 = vld [vmem:[%s5431_s1 + $0x80] sm:$0xff]  ;;  %v5442_v1 = vmov 3   ;;  %v5436_v2 = vmov 2   ;;  %v3662_v3 = vld [vmem:[%s5431_s1 + $0x98] sm:$0xff]  ;;  %v427_v4 = vld [vmem:[%s5431_s1 + $0x88] sm:$0xff]  ;;  %v5440_v5 = vmov 0   ;;  %v250_v14 = vlaneseq }
  0x18   : > { %3329 = vset.pattern.permute.xlu0 %v5442_v1  ;;  %3326 = vset.pattern.permute.xlu1 %v5436_v2  ;;  %v5438_v6 = vmov 1   ;;  %v3677_v7 = vld [vmem:[%s5431_s1 + $0x108] sm:$0xff]  ;;  %v428_v8 = vld [vmem:[%s5431_s1 + $0x90] sm:$0xff]  ;;  %v3687_v9 = vld [vmem:[%s5431_s1 + $0x118] sm:$0xff]  ;;  %p219_p10 = scmp.lt.s32.totalorder %s3627_s4, 1  ;;  %vm855_vm0 = vcmask 261120  }
  0x19   : > { %523 = vperm.xlu0 %3329, %v426_v0   ;;  %491 = vperm.xlu1 %3326, %v426_v0   ;;  %v3698_v10 = vld [vmem:[%s5431_s1 + $0x100] sm:$0xff]  ;;  %v3707_v11 = vld [vmem:[%s5431_s1 + $0x110] sm:$0xff]  ;;  %v251_v17 = vshrl.u32 %v250_v14, 7  ;;  %s216_s10 = sand.u32 1, %s3557_s21   ;;  %s3185_s12 = sshll.u32 %s3627_s4, 7 }
  0x1a   : > { %s220_s27 = scalar_select %p219_p10, %s3627_s4, 1 }
  0x1b   : > { %v294_v18 = vsub.s32 1, %v251_v17  ;;  %v298_v19 = vsub.s32 5, %v251_v17  ;;  %v252_v20 = vsub.s32 0, %v251_v17  ;;  %v256_v21 = vsub.s32 4, %v251_v17  ;;  %s3160_s11 = sshll.u32 %s216_s10, 3  ;;  %s5388_s17 = scalar_lea.hbm %s5435_s5, %s3185_s12 }
  0x1c   : > { %s3184_s6 = sshll.u32 %s220_s27, 3  ;;  %v344_v25 = vsub.s32 2, %v251_v17  ;;  %v348_v26 = vsub.s32 6, %v251_v17  ;;  %v394_v32 = vsub.s32 3, %v251_v17  ;;  %v398_v33 = vsub.s32 7, %v251_v17  ;;  %s218_s13 = scalar_lea.vmem [#allocation4], %s3160_s11 }
  0x1d   : > { %3335 = vset.pattern.permute.xlu0 %v5436_v2  ;;  %3327 = vset.pattern.permute.xlu1 %v5440_v5  ;;  %s223_s9 = scalar_lea.vmem %s5430_s0, %s3184_s6  ;;  %s3097_s14 = sshll.u32 %s218_s13, 4  ;;  %s5390_s14 = int_to_ptr.vmem [resolvable:$true] %s3097_s14 }
  0x1e   : > { %503 = vperm.xlu0 %3335, %v3662_v3   ;;  %437 = vperm.xlu1 %3327, %v427_v4   ;;  %v224_v24 = vld [vmem:[%s223_s9] sm:$0xff]  ;;  %s3073_s9 = sld [smem:[#allocation3]]  ;;  %s3083_s18 = scalar_lea.sflag [#allocation5], %s216_s10 }
  0x1f   : > { %v295_v27 = vrot.slane %v224_v24, %v294_v18  ;;  %v299_v28 = vrot.slane %v224_v24, %v298_v19  ;;  %v253_v29 = vrot.slane %v224_v24, %v252_v20  ;;  %v257_v30 = vrot.slane %v224_v24, %v256_v21  ;;  %s3503_s19 = scalar_lea.vmem %s5390_s14, 128  ;;  %s3572_s4 = smov [#allocation4]  }
  0x20   : > { %v345_v35 = vrot.slane %v224_v24, %v344_v25  ;;  %v349_v36 = vrot.slane %v224_v24, %v348_v26  ;;  %v395_v42 = vrot.slane %v224_v24, %v394_v32  ;;  %v399_v43 = vrot.slane %v224_v24, %v398_v33  ;;  %p3504_p11 = scmp.ne.s32.totalorder %s5390_s14, %s3503_s19  ;;  %s3507_s24 = sshll.u32 %s3572_s4, 4  ;;  %s3508_s24 = int_to_ptr.vmem [resolvable:$false] %s3507_s24 }
  0x21   : > { %v3726_v37 = vrot.slane %v295_v27, %v294_v18  ;;  %v3728_v38 = vrot.slane %v299_v28, %v294_v18  ;;  %v3730_v39 = vrot.slane %v253_v29, %v252_v20  ;;  %v3732_v40 = vrot.slane %v257_v30, %v252_v20  ;;  %s3509_s26 = scalar_lea.vmem %s3508_s24, 256  ;;  %p3510_p0 = scmp.lt.s32.totalorder %s5390_s14, %s3508_s24 }
  0x22   : > { %3336 = vset.pattern.permute.xlu0 %v5440_v5  ;;  %3328 = vset.pattern.permute.xlu1 %v5438_v6  ;;  %v3736_v44 = vrot.slane %v345_v35, %v344_v25  ;;  %v3738_v45 = vrot.slane %v349_v36, %v344_v25  ;;  %v3748_v54 = vrot.slane %v395_v42, %v394_v32  ;;  %p3505_p12 = pnand %p3504_p11, %p3644_p5  ;;  %p3511_p1 = scmp.lt.s32.totalorder %s3509_s26, %s3503_s19 }
  0x23   : > { %432 = vperm.xlu0 %3336, %v426_v0   ;;  %463 = vperm.xlu1 %3328, %v427_v4   ;;  %5502 = vst [vmem:[#allocation7_spill] sm:$0xff] %v3730_v39  ;;  %v3750_v55 = vrot.slane %v399_v43, %v394_v32 }
  0x24   : > { %p3506_p13 = pneg %p3505_p12  ;;  %p3512_p2 = por %p3511_p1, %p3510_p0 }
  0x26   : > { %p3513_p3 = pnand %p3512_p2, %p3506_p13 }
  0x27   : > { %447 = vperm.xlu0 %3336, %v3662_v3   ;;  %3330 = vset.pattern.permute.xlu1 %v5436_v2 }
  0x28   : > { %495 = vperm.xlu1 %3330, %v427_v4  }
  0x2b   : > { %565 = vperm.xlu0 %3336, %v3677_v7  }
  0x2c   : > { %3331 = vset.pattern.permute.xlu1 %v5440_v5 }
  0x2d   : > { %442 = vperm.xlu1 %3331, %v428_v8  }
  0x2f   : > { %575 = vperm.xlu0 %3336, %v3687_v9  }
  0x31   : > { %3332 = vset.pattern.permute.xlu1 %v5442_v1 }
  0x32   : > { %527 = vperm.xlu1 %3332, %v427_v4  }
  0x33   : > { %3340 = vset.pattern.permute.xlu0 %v5438_v6 }
  0x34   : > { %459 = vperm.xlu0 %3340, %v426_v0  }
  0x36   : > { %3333 = vset.pattern.permute.xlu1 %v5436_v2 }
  0x37   : > { %499 = vperm.xlu1 %3333, %v428_v8  }
  0x38   : > { %467 = vperm.xlu0 %3340, %v428_v8  }
  0x3b   : > { %3334 = vset.pattern.permute.xlu1 %v5442_v1 }
  0x3c   : > { %531 = vperm.xlu1 %3334, %v428_v8  }
  0x40   : > { %535 = vperm.xlu1 %3334, %v3662_v3  }
  0x44   : > { %3337 = vset.pattern.permute.xlu1 %v5440_v5 }
  0x45   : > { %560 = vperm.xlu1 %3337, %v3698_v10  }
  0x49   : > { %3338 = vset.pattern.permute.xlu1 %v5436_v2 }
  0x4a   : > { %623 = vperm.xlu1 %3338, %v3677_v7  }
  0x4e   : > { %3339 = vset.pattern.permute.xlu1 %v5440_v5 }
  0x4f   : > { %570 = vperm.xlu1 %3339, %v3707_v11  }
  0x53   : > { %3341 = vset.pattern.permute.xlu1 %v5436_v2 }
  0x54   : > { %627 = vperm.xlu1 %3341, %v3707_v11  }
  0x58   : > { %631 = vperm.xlu1 %3341, %v3687_v9  }
  0x5c   : > { %3342 = vset.pattern.permute.xlu1 %v5438_v6 }
  0x98   : > { %v3716_v12 = vpop.permute.xlu0 %523  ;;  %v492_v13 = vpop.permute.xlu1 %491 }
  0x99   : > { %v506_v18 = vmul.f32 %v492_v13, %v3736_v44  ;;  %v507_v19 = vmul.f32 %v492_v13, %v3738_v45  ;;  %v539_v25 = vmul.f32 %v3716_v12, %v3750_v55 }
  0x9d   : > { %v3719_v15 = vpop.permute.xlu0 %503  ;;  %v438_v16 = vpop.permute.xlu1 %437 }
  0x9e   : > { %v452_v49 = vmul.f32 %v438_v16, %v3730_v39  ;;  %v453_v50 = vmul.f32 %v438_v16, %v3732_v40 }
  0xa2   : > { %v433_v22 = vpop.permute.xlu0 %432  ;;  %v464_v23 = vpop.permute.xlu1 %463 }
  0xa3   : > { %v476_v46 = vmul.f32 %v464_v23, %v3726_v37  ;;  %v477_v47 = vmul.f32 %v464_v23, %v3728_v38  ;;  %v450_v63 = vmul.f32 %v433_v22, %v3730_v39  ;;  %v451_v0 = vmul.f32 %v433_v22, %v3732_v40 }
  0xa4   : > { %v538_v22 = vmul.f32 %v3716_v12, %v3748_v54 }
  0xa5   : > { %v484_v56 = vadd.f32 %v476_v46, %v452_v49  ;;  %v485_v57 = vadd.f32 %v477_v47, %v453_v50 }
  0xa6   : > { %v3724_v31 = vpop.permute.xlu0 %447 }
  0xa7   : > { %v496_v34 = vpop.permute.xlu1 %495 }
  0xa8   : > { %v508_v51 = vmul.f32 %v496_v34, %v3736_v44  ;;  %v509_v52 = vmul.f32 %v496_v34, %v3738_v45 }
  0xaa   : > { %v3734_v41 = vpop.permute.xlu0 %565  ;;  %v516_v61 = vadd.f32 %v508_v51, %v484_v56  ;;  %v517_v62 = vadd.f32 %v509_v52, %v485_v57  ;;  %v3792_v57 = vld [vmem:[%s5431_s1 + $0xa0] sm:$0xff] }
  0xac   : > { %v443_v48 = vpop.permute.xlu1 %442 }
  0xad   : > { %v454_v26 = vmul.f32 %v443_v48, %v3730_v39  ;;  %v455_v27 = vmul.f32 %v443_v48, %v3732_v40 }
  0xae   : > { %v3746_v53 = vpop.permute.xlu0 %575 }
  0xb1   : > { %v528_v58 = vpop.permute.xlu1 %527 }
  0xb2   : > { %v540_v59 = vmul.f32 %v528_v58, %v3748_v54  ;;  %v541_v60 = vmul.f32 %v528_v58, %v3750_v55  ;;  %v3809_v58 = vld [vmem:[%s5431_s1 + $0xb0] sm:$0xff] }
  0xb3   : > { %v460_v4 = vpop.permute.xlu0 %459 }
  0xb4   : > { %v474_v8 = vmul.f32 %v460_v4, %v3726_v37  ;;  %v475_v14 = vmul.f32 %v460_v4, %v3728_v38  ;;  %v3758_v16 = vadd.f32 %v540_v59, %v516_v61  ;;  %v3760_v17 = vadd.f32 %v541_v60, %v517_v62  ;;  %v3820_v59 = vld [vmem:[%s5431_s1 + $0xb8] sm:$0xff]  ;;  %v3833_v60 = vld [vmem:[%s5431_s1 + $0xc0] sm:$0xff]  ;;  %v3842_v61 = vld [vmem:[%s5431_s1 + $0xc8] sm:$0xff] }
  0xb6   : > { %v482_v20 = vadd.f32 %v474_v8, %v450_v63  ;;  %v483_v21 = vadd.f32 %v475_v14, %v451_v0  ;;  %v500_v23 = vpop.permute.xlu1 %499  ;;  %v685_v24 = vmax.f32 %v3758_v16, %v3760_v17 }
  0xb7   : > { %v468_v28 = vpop.permute.xlu0 %467  ;;  %v510_v33 = vmul.f32 %v500_v23, %v3736_v44  ;;  %v511_v12 = vmul.f32 %v500_v23, %v3738_v45 }
  0xb8   : > { %v478_v29 = vmul.f32 %v468_v28, %v3726_v37  ;;  %v479_v13 = vmul.f32 %v468_v28, %v3728_v38  ;;  %686 = vmax.xlane.f32.xlu0 %v685_v24  ;;  %v514_v30 = vadd.f32 %v506_v18, %v482_v20  ;;  %v515_v32 = vadd.f32 %v507_v19, %v483_v21 }
  0xb9   : > { %v456_v28 = vmul.f32 %v3724_v31, %v3730_v39 }
  0xba   : > { %v486_v34 = vadd.f32 %v478_v29, %v454_v26  ;;  %v487_v35 = vadd.f32 %v479_v13, %v455_v27  ;;  %v3775_v36 = vadd.f32 %v538_v22, %v514_v30  ;;  %v3777_v42 = vadd.f32 %v539_v25, %v515_v32 }
  0xbb   : > { %v532_v43 = vpop.permute.xlu1 %531  ;;  %v457_v13 = vmul.f32 %v3724_v31, %v3732_v40 }
  0xbc   : > { %v542_v46 = vmul.f32 %v532_v43, %v3748_v54  ;;  %v543_v47 = vmul.f32 %v532_v43, %v3750_v55  ;;  %v682_v48 = vmax.f32 %v3775_v36, %v3777_v42  ;;  %v518_v49 = vadd.f32 %v510_v33, %v486_v34 }
  0xbd   : > { %v519_v50 = vadd.f32 %v511_v12, %v487_v35  ;;  %v512_v33 = vmul.f32 %v3719_v15, %v3736_v44  ;;  %v513_v34 = vmul.f32 %v3719_v15, %v3738_v45 }
  0xbe   : > { %683 = vmax.xlane.f32.xlu1 %v682_v48  ;;  %v550_v51 = vadd.f32 %v542_v46, %v518_v49 }
  0xbf   : > { %v551_v52 = vadd.f32 %v543_v47, %v519_v50  ;;  %v536_v62 = vpop.permute.xlu1 %535 }
  0xc0   : > { %v545_v12 = vmul.f32 %v536_v62, %v3750_v55 }
  0xc1   : > { %v688_v56 = vmax.f32 %v550_v51, %v551_v52 }
  0xc3   : > { %689 = vmax.xlane.f32.xlu1 %v688_v56 }
  0xc4   : > { %v3848_v63 = vpop.permute.xlu1 %560 }
  0xc9   : > { %v3851_v0 = vpop.permute.xlu1 %623 }
  0xce   : > { %v3853_v4 = vpop.permute.xlu1 %570 }
  0xd3   : > { %v3855_v8 = vpop.permute.xlu1 %627 }
  0xd4   : > { %471 = vperm.xlu1 %3342, %v3662_v3   ;;  %v3802_v3 = vld [vmem:[%s5431_s1 + $0xa8] sm:$0xff] }
  0xd7   : > { %v3857_v14 = vpop.permute.xlu1 %631 }
  0xd8   : > { %587 = vperm.xlu1 %3342, %v3698_v10  }
  0xdc   : > { %591 = vperm.xlu1 %3342, %v3677_v7  }
  0xe0   : > { %595 = vperm.xlu1 %3342, %v3707_v11  }
  0xe4   : > { %599 = vperm.xlu1 %3342, %v3687_v9  }
  0xe8   : > { %1126 = vperm.xlu1 %3342, %v3792_v57  }
  0xec   : > { %3343 = vset.pattern.permute.xlu1 %v5436_v2 }
  0xed   : > { %1158 = vperm.xlu1 %3343, %v3792_v57  }
  0xf1   : > { %3345 = vset.pattern.permute.xlu1 %v5442_v1 }
  0xf2   : > { %1190 = vperm.xlu1 %3345, %v3792_v57  }
  0xf6   : > { %3346 = vset.pattern.permute.xlu1 %v5436_v2 }
  0xf7   : > { %1162 = vperm.xlu1 %3346, %v3802_v3  }
  0xfb   : > { %3347 = vset.pattern.permute.xlu1 %v5438_v6 }
  0xfc   : > { %1134 = vperm.xlu1 %3347, %v3809_v58  }
 0x100   : > { %3348 = vset.pattern.permute.xlu1 %v5442_v1 }
 0x101   : > { %1194 = vperm.xlu1 %3348, %v3802_v3  }
 0x105   : > { %3349 = vset.pattern.permute.xlu1 %v5436_v2 }
 0x106   : > { %1166 = vperm.xlu1 %3349, %v3809_v58  }
 0x10a   : > { %3350 = vset.pattern.permute.xlu1 %v5438_v6 }
 0x10b   : > { %1138 = vperm.xlu1 %3350, %v3820_v59  }
 0x10f   : > { %3351 = vset.pattern.permute.xlu1 %v5442_v1 }
 0x110   : > { %1198 = vperm.xlu1 %3351, %v3809_v58  }
 0x114   : > { %3352 = vset.pattern.permute.xlu1 %v5436_v2 }
 0x115   : > { %1170 = vperm.xlu1 %3352, %v3820_v59  }
 0x119   : > { %3353 = vset.pattern.permute.xlu1 %v5442_v1 }
 0x11a   : > { %1202 = vperm.xlu1 %3353, %v3820_v59  }
 0x11e   : > { %3354 = vset.pattern.permute.xlu1 %v5438_v6 }
 0x11f   : > { %1792 = vperm.xlu1 %3354, %v3833_v60  }
 0x123   : > { %3355 = vset.pattern.permute.xlu1 %v5436_v2 }
 0x124   : > { %1824 = vperm.xlu1 %3355, %v3833_v60  }
 0x128   : > { %3356 = vset.pattern.permute.xlu1 %v5438_v6 }
 0x129   : > { %1796 = vperm.xlu1 %3356, %v3842_v61  }
 0x12d   : > { %3357 = vset.pattern.permute.xlu1 %v5442_v1 }
 0x12e   : > { %1860 = vperm.xlu1 %3357, %v3842_v61  }
 0x132   : > { %3358 = vset.pattern.permute.xlu1 %v5440_v5 }
 0x14b   : > { %v684_v18 = vpop.xlane.xlu1 %683 }
 0x14c   : > { %v694_v19 = vsub.f32 %v3775_v36, %v684_v18  ;;  %v695_v20 = vsub.f32 %v3777_v42, %v684_v18  ;;  %v544_v42 = vmul.f32 %v536_v62, %v3748_v54  ;;  %v3889_v62 = vld [vmem:[%s5431_s1 + $0xd0] sm:$0xff]  ;;  %v687_v18 = vpop.xlane.xlu0 %686 }
 0x14e   : > { %v702_v21 = vmul.f32 1.442695, %v694_v19  ;;  %v704_v23 = vmul.f32 1.442695, %v695_v20  ;;  %v696_v19 = vsub.f32 %v3758_v16, %v687_v18  ;;  %v697_v20 = vsub.f32 %v3760_v17, %v687_v18  ;;  %v3916_v16 = vld [vmem:[%s5431_s1 + $0xd8] sm:$0xff] }
 0x150   : > { %3407 = vpow2.f32 %v702_v21  ;;  %v690_v24 = vpop.xlane.xlu1 %689  ;;  %v706_v21 = vmul.f32 1.442695, %v696_v19  ;;  %v578_v19 = vmul.f32 %v3848_v63, %v3730_v39 }
 0x151   : > { %3409 = vpow2.f32 %v704_v23  ;;  %v698_v22 = vsub.f32 %v550_v51, %v690_v24  ;;  %v699_v25 = vsub.f32 %v551_v52, %v690_v24  ;;  %v708_v23 = vmul.f32 1.442695, %v697_v20 }
 0x152   : > { %v579_v20 = vmul.f32 %v3848_v63, %v3732_v40  ;;  %v3991_v63 = vld [vmem:[%s5431_s1 + $0xf8] sm:$0xff] }
 0x153   : > { %v710_v26 = vmul.f32 1.442695, %v698_v22  ;;  %v712_v27 = vmul.f32 1.442695, %v699_v25 }
 0x154   : > { %v472_v29 = vpop.permute.xlu1 %471 }
 0x155   : > { %3411 = vpow2.f32 %v710_v26  ;;  %v480_v30 = vmul.f32 %v472_v29, %v3726_v37  ;;  %v481_v32 = vmul.f32 %v472_v29, %v3728_v38  ;;  %v3903_v26 = vld [vmem:[%s5431_s1 + $0xe8] sm:$0xff] }
 0x156   : > { %3413 = vpow2.f32 %v712_v27 }
 0x157   : > { %v488_v35 = vadd.f32 %v480_v30, %v456_v28  ;;  %v489_v36 = vadd.f32 %v481_v32, %v457_v13  ;;  %3415 = vpow2.f32 %v706_v21 }
 0x158   : > { %3417 = vpow2.f32 %v708_v23  ;;  %v588_v13 = vpop.permute.xlu1 %587 }
 0x159   : > { %v520_v43 = vadd.f32 %v512_v33, %v488_v35  ;;  %v521_v31 = vadd.f32 %v513_v34, %v489_v36 }
 0x15a   : > { %v3873_v46 = vpop.eup %3407 }
 0x15b   : > { %v3410_v47 = vpop.eup %3409  ;;  %v552_v48 = vadd.f32 %v544_v42, %v520_v43  ;;  %v553_v49 = vadd.f32 %v545_v12, %v521_v31 }
 0x15c   : > { %798 = vmatprep.mubr.f32.mxu0 %v3410_v47  ;;  %v718_v50 = vadd.f32 %v3410_v47, %v3873_v46  ;;  %v592_v30 = vpop.permute.xlu1 %591 }
 0x15d   : > { %v691_v51 = vmax.f32 %v552_v48, %v553_v49  ;;  %v604_v31 = vmul.f32 %v592_v30, %v3726_v37  ;;  %v605_v47 = vmul.f32 %v592_v30, %v3728_v38 }
 0x15e   : > { %719 = vadd.xlane.f32.xlu1 %v718_v50  ;;  %v602_v50 = vmul.f32 %v588_v13, %v3726_v37 }
 0x15f   : > { %v3876_v52 = vpop.eup %3411  ;;  %692 = vmax.xlane.f32.xlu0 %v691_v51  ;;  %v603_v51 = vmul.f32 %v588_v13, %v3728_v38 }
 0x160   : > { %v3878_v15 = vpop.eup %3413  ;;  %v596_v33 = vpop.permute.xlu1 %595 }
 0x161   : > { %v724_v56 = vadd.f32 %v3878_v15, %v3876_v52  ;;  %v3894_v24 = vpop.eup %3415  ;;  %v607_v13 = vmul.f32 %v596_v33, %v3728_v38 }
 0x162   : > { %v3896_v22 = vpop.eup %3417 }
 0x163   : > { %725 = vadd.xlane.f32.xlu1 %v724_v56  ;;  %v721_v25 = vadd.f32 %v3896_v22, %v3894_v24  ;;  %v3972_v56 = vld [vmem:[%s5431_s1 + $0xf0] sm:$0xff] }
 0x164   : > { %v600_v35 = vpop.permute.xlu1 %599 }
 0x175   : > { %1130 = vperm.xlu0 %3340, %v3802_v3  }
 0x179   : > { %3344 = vset.pattern.permute.xlu0 %v5436_v2 }
 0x17a   : > { %619 = vperm.xlu0 %3344, %v3698_v10  }
 0x17e   : > { %1828 = vperm.xlu0 %3344, %v3842_v61  }
 0x182   : > { %1832 = vperm.xlu0 %3344, %v3889_v62  }
 0x1a1   : > { %722 = vadd.xlane.f32.xlu0 %v721_v25 }
 0x1b7   : > { %2494 = vperm.xlu0 %3344, %v3903_v26  }
 0x1bb   : > { %3362 = vset.pattern.permute.xlu0 %v5442_v1 }
 0x1bc   : > { %651 = vperm.xlu0 %3362, %v3698_v10  }
 0x1c0   : > { %655 = vperm.xlu0 %3362, %v3677_v7  }
 0x1c4   : > { %659 = vperm.xlu0 %3362, %v3707_v11  }
 0x1c8   : > { %663 = vperm.xlu0 %3362, %v3687_v9  }
 0x1cc   : > { %1856 = vperm.xlu0 %3362, %v3833_v60  }
 0x1d0   : > { %1864 = vperm.xlu0 %3362, %v3889_v62  }
 0x1d4   : > { %1868 = vperm.xlu0 %3362, %v3916_v16  }
 0x1d8   : > { %2526 = vperm.xlu0 %3362, %v3903_v26  }
 0x1dc   : > { %3368 = vset.pattern.permute.xlu0 %v5440_v5 }
 0x1ec   : > { %v693_v7 = vpop.xlane.xlu0 %692 }
 0x1ed   : > { %v700_v10 = vsub.f32 %v552_v48, %v693_v7  ;;  %v701_v11 = vsub.f32 %v553_v49, %v693_v7  ;;  %v580_v48 = vmul.f32 %v3734_v41, %v3730_v39  ;;  %v581_v49 = vmul.f32 %v3734_v41, %v3732_v40 }
 0x1ef   : > { %v714_v17 = vmul.f32 1.442695, %v700_v10  ;;  %v716_v9 = vmul.f32 1.442695, %v701_v11  ;;  %v612_v21 = vadd.f32 %v604_v31, %v580_v48  ;;  %v613_v23 = vadd.f32 %v605_v47, %v581_v49 }
 0x1f0   : > { %v636_v10 = vmul.f32 %v3851_v0, %v3736_v44  ;;  %v637_v11 = vmul.f32 %v3851_v0, %v3738_v45  ;;  %v608_v31 = vmul.f32 %v600_v35, %v3726_v37  ;;  %v609_v47 = vmul.f32 %v600_v35, %v3728_v38 }
 0x1f1   : > { %3419 = vpow2.f32 %v714_v17  ;;  %v610_v17 = vadd.f32 %v602_v50, %v578_v19  ;;  %v582_v35 = vmul.f32 %v3853_v4, %v3730_v39 }
 0x1f2   : > { %3421 = vpow2.f32 %v716_v9  ;;  %v611_v9 = vadd.f32 %v603_v51, %v579_v20  ;;  %v645_v48 = vadd.f32 %v637_v11, %v613_v23  ;;  %v644_v49 = vadd.f32 %v636_v10, %v612_v21 }
 0x1f3   : > { %v583_v21 = vmul.f32 %v3853_v4, %v3732_v40  ;;  %v641_v4 = vmul.f32 %v3857_v14, %v3738_v45 }
 0x1f4   : > { %v3930_v32 = vpop.permute.xlu0 %1130 }
 0x1f9   : > { %v620_v34 = vpop.permute.xlu0 %619 }
 0x1fa   : > { %v634_v25 = vmul.f32 %v620_v34, %v3736_v44  ;;  %v635_v7 = vmul.f32 %v620_v34, %v3738_v45 }
 0x1fb   : > { %v3921_v27 = vpop.eup %3419 }
 0x1fc   : > { %v3923_v28 = vpop.eup %3421  ;;  %v643_v20 = vadd.f32 %v635_v7, %v611_v9 }
 0x1fd   : > { %v727_v29 = vadd.f32 %v3923_v28, %v3921_v27  ;;  %v3935_v36 = vpop.permute.xlu0 %1828 }
 0x1fe   : > { %5503 = vst [vmem:[#allocation8_spill] sm:$0xff] %v3935_v36  ;;  %v639_v36 = vmul.f32 %v3855_v8, %v3738_v45 }
 0x1ff   : > { %728 = vadd.xlane.f32.xlu1 %v727_v29  ;;  %v606_v29 = vmul.f32 %v596_v33, %v3726_v37  ;;  %v584_v33 = vmul.f32 %v3746_v53, %v3730_v39 }
 0x201   : > { %v614_v7 = vadd.f32 %v606_v29, %v582_v35  ;;  %v616_v9 = vadd.f32 %v608_v31, %v584_v33 }
 0x210   : > { %1099 = vperm.xlu1 %3358, %v3792_v57   ;;  %v3939_v57 = vpop.permute.xlu1 %1126 }
 0x214   : > { %1104 = vperm.xlu1 %3358, %v3802_v3   ;;  %v3944_v3 = vld [vmem:[%s5431_s1 + $0xe0] sm:$0xff] }
 0x218   : > { %1109 = vperm.xlu1 %3358, %v3809_v58   ;;  %v3947_v58 = vpop.permute.xlu1 %1158 }
 0x21c   : > { %1114 = vperm.xlu1 %3358, %v3820_v59   ;;  %v3949_v59 = vpop.permute.xlu0 %1832  ;;  %v3955_v12 = vpop.permute.xlu1 %1190 }
 0x21d   : > { %5504 = vst [vmem:[#allocation9_spill] sm:$0xff] %v3949_v59  ;;  %v5505_v59 = vmov 3  }
 0x220   : > { %1775 = vperm.xlu1 %3358, %v3889_v62   ;;  %v3974_v18 = vpop.permute.xlu1 %1162 }
 0x224   : > { %1780 = vperm.xlu1 %3358, %v3916_v16   ;;  %v3999_v50 = vpop.permute.xlu1 %1134 }
 0x228   : > { %3359 = vset.pattern.permute.xlu1 %v5436_v2  ;;  %v642_v2 = vadd.f32 %v634_v25, %v610_v17  ;;  %v615_v25 = vadd.f32 %v607_v13, %v583_v21  ;;  %v4022_v29 = vpop.permute.xlu1 %1194  ;;  %v4046_v21 = vld [vmem:[%s5431_s1 + $0x10] sm:$0xff] }
 0x229   : > { %1836 = vperm.xlu1 %3359, %v3916_v16  }
 0x22a   : > { %v647_v31 = vadd.f32 %v639_v36, %v615_v25 }
 0x22c   : > { %v4040_v36 = vpop.permute.xlu1 %1166 }
 0x22d   : > { %3360 = vset.pattern.permute.xlu1 %v5440_v5 }
 0x22e   : > { %2431 = vperm.xlu1 %3360, %v3944_v3   ;;  %v3952_v42 = vpop.xlane.xlu0 %722 }
 0x232   : > { %2436 = vperm.xlu1 %3360, %v3903_v26  }
 0x236   : > { %v3957_v43 = vpop.permute.xlu0 %2494  ;;  %3361 = vset.pattern.permute.xlu1 %v5442_v1 }
 0x237   : > { %2522 = vperm.xlu1 %3361, %v3944_v3  }
 0x23b   : > { %v652_v41 = vpop.permute.xlu0 %651  ;;  %3363 = vset.pattern.permute.xlu1 %v5440_v5 }
 0x23c   : > { %2441 = vperm.xlu1 %3363, %v3972_v56   ;;  %v666_v30 = vmul.f32 %v652_v41, %v3748_v54  ;;  %v667_v34 = vmul.f32 %v652_v41, %v3750_v55  ;;  %v585_v41 = vmul.f32 %v3746_v53, %v3732_v40  ;;  %v638_v53 = vmul.f32 %v3855_v8, %v3736_v44  ;;  %v4029_v8 = vld [vmem:[%s5431_s1] sm:$0xff] }
 0x23e   : > { %v675_v23 = vadd.f32 %v667_v34, %v643_v20  ;;  %v674_v11 = vadd.f32 %v666_v30, %v642_v2  ;;  %v617_v6 = vadd.f32 %v609_v47, %v585_v41  ;;  %v640_v2 = vmul.f32 %v3857_v14, %v3736_v44 }
 0x23f   : > { %v656_v0 = vpop.permute.xlu0 %655  ;;  %v646_v34 = vadd.f32 %v638_v53, %v614_v7  ;;  %v1141_v53 = vmul.f32 %v3939_v57, %v3726_v37 }
 0x240   : > { %v668_v51 = vmul.f32 %v656_v0, %v3748_v54  ;;  %v669_v19 = vmul.f32 %v656_v0, %v3750_v55  ;;  %2446 = vperm.xlu1 %3363, %v3991_v63  }
 0x242   : > { %v677_v10 = vadd.f32 %v669_v19, %v645_v48  ;;  %v676_v0 = vadd.f32 %v668_v51, %v644_v49  ;;  %v648_v48 = vadd.f32 %v640_v2, %v616_v9  ;;  %v649_v49 = vadd.f32 %v641_v4, %v617_v6 }
 0x243   : > { %v660_v17 = vpop.permute.xlu0 %659  ;;  %v5506_v19 = vmov 0   ;;  %v1142_v2 = vmul.f32 %v3939_v57, %v3728_v38  ;;  %v1143_v57 = vmul.f32 %v3930_v32, %v3726_v37 }
 0x244   : > { %v3186_v5 = vpack.c.bf16 %v677_v10, %v675_v23  ;;  %v3188_v1 = vpack.c.bf16 %v676_v0, %v674_v11  ;;  %3364 = vset.pattern.permute.xlu1 %v5505_v59  ;;  %v670_v13 = vmul.f32 %v660_v17, %v3748_v54  ;;  %v671_v30 = vmul.f32 %v660_v17, %v3750_v55  ;;  %v4048_v23 = vpop.permute.xlu1 %1138  ;;  %v4054_v10 = vld [vmem:[%s5431_s1 + $0x18] sm:$0xff] }
 0x245   : > { %2530 = vperm.xlu1 %3364, %v3972_v56  }
 0x246   : > { %3187 = vmatprep.subr.bf16.mxu0 %v3186_v5  ;;  %v678_v20 = vadd.f32 %v670_v13, %v646_v34  ;;  %v679_v33 = vadd.f32 %v671_v30, %v647_v31  ;;  %v1173_v30 = vmul.f32 %v3947_v58, %v3736_v44  ;;  %v1174_v34 = vmul.f32 %v3947_v58, %v3738_v45 }
 0x247   : > { %v664_v47 = vpop.permute.xlu0 %663  ;;  %3189 = vmatpush1.bf16.xpose.msra.mxu0 %v3188_v1  ;;  %v4038_v1 = vld [vmem:[%s5431_s1 + $0x8] sm:$0xff] }
 0x248   : > { %v672_v14 = vmul.f32 %v664_v47, %v3748_v54  ;;  %v673_v51 = vmul.f32 %v664_v47, %v3750_v55  ;;  %v4059_v11 = vpop.permute.xlu1 %1198 }
 0x249   : > { %3365 = vset.pattern.permute.xlu1 %v5506_v19 }
 0x24a   : > { %v680_v5 = vadd.f32 %v672_v14, %v648_v48  ;;  %v681_v41 = vadd.f32 %v673_v51, %v649_v49  ;;  %231 = vperm.xlu1 %3365, %v4029_v8   ;;  %v1205_v48 = vmul.f32 %v3955_v12, %v3748_v54  ;;  %v1206_v49 = vmul.f32 %v3955_v12, %v3750_v55 }
 0x24b   : > { %v1144_v14 = vmul.f32 %v3930_v32, %v3728_v38  ;;  %v1207_v32 = vmul.f32 %v4022_v29, %v3748_v54 }
 0x24c   : > { %v3190_v6 = vpack.c.bf16 %v681_v41, %v679_v33  ;;  %v3192_v35 = vpack.c.bf16 %v680_v5, %v678_v20  ;;  %v4065_v0 = vpop.permute.xlu1 %1170  ;;  %v1175_v41 = vmul.f32 %v3974_v18, %v3736_v44 }
 0x24e   : > { %3191 = vmatprep.subr.bf16.mxu0 %v3190_v6  ;;  %236 = vperm.xlu1 %3365, %v4038_v1   ;;  %v1176_v6 = vmul.f32 %v3974_v18, %v3738_v45 }
 0x24f   : > { %3193 = vmatpush1.bf16.xpose.msra.mxu0 %v3192_v35 }
 0x252   : > { %241 = vperm.xlu1 %3365, %v4046_v21  }
 0x256   : > { %799 = vmatmul.mubr.f32.vlgmr.msra.gmra.mrb[0].mxu0 %v3873_v46  ;;  %246 = vperm.xlu1 %3365, %v4054_v10   ;;  %v4073_v46 = vld [vmem:[%s5431_s1 + $0x128] sm:$0xff] }
 0x257   : > { %803 = vmatprep.mubr.f32.mxu0 %v3896_v22 }
 0x25a   : > { %804 = vmatmul.mubr.f32.gmra.mrb[2].mxu0 %v3894_v24  ;;  %3366 = vset.pattern.permute.xlu1 %v5505_v59 }
 0x25b   : > { %808 = vmatprep.mubr.f32.mxu0 %v3878_v15  ;;  %377 = vperm.xlu1 %3366, %v4029_v8   ;;  %v4077_v15 = vpop.permute.xlu1 %1202 }
 0x25e   : > { %809 = vmatmul.mubr.f32.gmra.mrb[4].mxu0 %v3876_v52  ;;  %v4083_v52 = vld [vmem:[%s5431_s1 + $0x120] sm:$0xff] }
 0x25f   : > { %813 = vmatprep.mubr.f32.mxu0 %v3923_v28  ;;  %389 = vperm.xlu1 %3366, %v4054_v10   ;;  %v4087_v24 = vpop.permute.xlu1 %1792 }
 0x262   : > { %814 = vmatmul.mubr.f32.gmra.mrb[6].mxu0 %v3921_v27 }
 0x263   : > { %3367 = vset.pattern.permute.xlu1 %v5506_v19  ;;  %v4090_v22 = vpop.permute.xlu1 %1824 }
 0x264   : > { %1232 = vperm.xlu1 %3367, %v4073_v46  }
 0x267   : > { %v4092_v27 = vpop.permute.xlu1 %1796 }
 0x268   : > { %3369 = vset.pattern.permute.xlu1 %v5505_v59 }
 0x269   : > { %1318 = vperm.xlu1 %3369, %v4083_v52  }
 0x26b   : > { %v4094_v28 = vpop.permute.xlu1 %1860 }
 0x26d   : > { %1322 = vperm.xlu1 %3369, %v4073_v46  }
 0x26f   : > { %v4096_v7 = vpop.xlane.xlu1 %719 }
 0x270   : > { %3423 = vrcp.f32 %v4096_v7 }
 0x271   : > { %3425 = vrcp.f32 %v3952_v42 }
 0x273   : > { %v4098_v25 = vpop.xlane.xlu1 %725 }
 0x274   : > { %3427 = vrcp.f32 %v4098_v25 }
 0x28c   : > { %v4100_v17 = vpop.xlane.xlu1 %728 }
 0x28d   : > { %3429 = vrcp.f32 %v4100_v17 }
 0x290   : > { %v1100_v9 = vpop.permute.xlu1 %1099 }
 0x291   : > { %v1117_v4 = vmul.f32 %v1100_v9, %v3730_v39  ;;  %v1118_v13 = vmul.f32 %v1100_v9, %v3732_v40 }
 0x293   : > { %v1149_v31 = vadd.f32 %v1141_v53, %v1117_v4  ;;  %v1150_v47 = vadd.f32 %v1142_v2, %v1118_v13  ;;  %v1208_v2 = vmul.f32 %v4022_v29, %v3750_v55  ;;  %v4148_v29 = vld [vmem:[%s5431_s1 + $0x130] sm:$0xff] }
 0x294   : > { %v1105_v51 = vpop.permute.xlu1 %1104 }
 0x295   : > { %v1119_v20 = vmul.f32 %v1105_v51, %v3730_v39  ;;  %v1120_v33 = vmul.f32 %v1105_v51, %v3732_v40  ;;  %v1181_v58 = vadd.f32 %v1173_v30, %v1149_v31  ;;  %v1182_v5 = vadd.f32 %v1174_v34, %v1150_v47 }
 0x296   : > { %v5508_v47 = vmov 1  }
 0x297   : > { %v1151_v12 = vadd.f32 %v1143_v57, %v1119_v20  ;;  %v1152_v35 = vadd.f32 %v1144_v14, %v1120_v33  ;;  %v4126_v9 = vadd.f32 %v1205_v48, %v1181_v58  ;;  %v4128_v53 = vadd.f32 %v1206_v49, %v1182_v5 }
 0x298   : > { %v1147_v57 = vmul.f32 %v4048_v23, %v3726_v37  ;;  %v1148_v14 = vmul.f32 %v4048_v23, %v3728_v38  ;;  %v1211_v58 = vmul.f32 %v4077_v15, %v3748_v54  ;;  %v1212_v5 = vmul.f32 %v4077_v15, %v3750_v55  ;;  %v3424_v15 = vpop.eup %3423 }
 0x299   : > { %v1183_v4 = vadd.f32 %v1175_v41, %v1151_v12  ;;  %v1184_v13 = vadd.f32 %v1176_v6, %v1152_v35  ;;  %v1349_v30 = vmax.f32 %v4126_v9, %v4128_v53  ;;  %v4178_v12 = vpop.permute.xlu0 %1856 }
 0x29b   : > { %v4136_v34 = vadd.f32 %v1207_v32, %v1183_v4  ;;  %v4138_v18 = vadd.f32 %v1208_v2, %v1184_v13  ;;  %1350 = vmax.xlane.f32.xlu0 %v1349_v30  ;;  %v3426_v30 = vpop.eup %3425 }
 0x29c   : > { %v3428_v7 = vpop.eup %3427 }
 0x29d   : > { %5507 = vst [vmem:[#allocation10_spill] sm:$0xff] %v4138_v18  ;;  %v1352_v31 = vmax.f32 %v4136_v34, %v4138_v18  ;;  %v4180_v35 = vpop.permute.xlu0 %1864 }
 0x29f   : > { %1353 = vmax.xlane.f32.xlu1 %v1352_v31 }
 0x2b1   : > { %1765 = vperm.xlu0 %3368, %v3833_v60   ;;  %v4156_v60 = vpop.permute.xlu1 %1109 }
 0x2b5   : > { %1770 = vperm.xlu0 %3368, %v3842_v61   ;;  %v1115_v61 = vpop.permute.xlu1 %1114 }
 0x2b6   : > { %v1123_v48 = vmul.f32 %v1115_v61, %v3730_v39  ;;  %v1124_v49 = vmul.f32 %v1115_v61, %v3732_v40 }
 0x2b8   : > { %v1156_v51 = vadd.f32 %v1148_v14, %v1124_v49 }
 0x2b9   : > { %1227 = vperm.xlu0 %3368, %v4083_v52  }
 0x2bd   : > { %1237 = vperm.xlu0 %3368, %v4148_v29  }
 0x2c1   : > { %3370 = vset.pattern.permute.xlu0 %v5508_v47 }
 0x2c2   : > { %1800 = vperm.xlu0 %3370, %v3889_v62   ;;  %v1155_v62 = vadd.f32 %v1147_v57, %v1123_v48 }
 0x2c6   : > { %1804 = vperm.xlu0 %3370, %v3916_v16   ;;  %v1179_v16 = vmul.f32 %v4065_v0, %v3736_v44 }
 0x2c8   : > { %v1187_v20 = vadd.f32 %v1179_v16, %v1155_v62  ;;  %v3430_v16 = vpop.eup %3429 }
 0x2ca   : > { %2458 = vperm.xlu0 %3370, %v3944_v3   ;;  %v4172_v41 = vadd.f32 %v1211_v58, %v1187_v20 }
 0x2ce   : > { %2462 = vperm.xlu0 %3370, %v3903_v26   ;;  %v1180_v26 = vmul.f32 %v4065_v0, %v3738_v45  ;;  %v1869_v0 = vpop.permute.xlu0 %1868 }
 0x2d0   : > { %v1188_v33 = vadd.f32 %v1180_v26, %v1156_v51  ;;  %v4192_v26 = vpop.permute.xlu1 %1775 }
 0x2d2   : > { %v4174_v6 = vadd.f32 %v1212_v5, %v1188_v33  ;;  %v2527_v32 = vpop.permute.xlu0 %2526 }
 0x2d4   : > { %v1358_v23 = vmax.f32 %v4172_v41, %v4174_v6  ;;  %v1781_v58 = vpop.permute.xlu1 %1780 }
 0x2ed   : > { %1359 = vmax.xlane.f32.xlu0 %v1358_v23  ;;  %v1837_v23 = vpop.permute.xlu1 %1836 }
 0x328   : > { %v4186_v31 = vpop.xlane.xlu0 %1350 }
 0x329   : > { %v800_v2 = vpop.f32.mrb[0].mxu0 }
 0x32a   : > { %v819_v4 = vmul.f32 %v3424_v15, %v800_v2  ;;  %v802_v13 = vpop.f32.mrb[1].mxu0 }
 0x32b   : > { %v1790_v13 = vmul.f32 %v1781_v58, %v3732_v40 }
 0x32c   : > { %823 = vxpose.xlu1.b32.start [1/4] (short) (narrow) %v819_v4, 32  ;;  %v1789_v4 = vmul.f32 %v1781_v58, %v3730_v39 }
 0x32d   : > { %v805_v61 = vpop.f32.mrb[2].mxu0 }
 0x32e   : > { %v820_v48 = vmul.f32 %v3426_v30, %v805_v61  ;;  %v807_v49 = vpop.f32.mrb[3].mxu0  ;;  %v4202_v30 = vpop.permute.xlu1 %2431 }
 0x32f   : > { %v1845_v49 = vmul.f32 %v1837_v23, %v3736_v44 }
 0x330   : > { %824 = vxpose.xlu1.b32.cont [2/4] (short) (narrow) %v820_v48, 32  ;;  %v4188_v42 = vpop.permute.xlu0 %1765 }
 0x331   : > { %v810_v57 = vpop.f32.mrb[4].mxu0 }
 0x332   : > { %v821_v25 = vmul.f32 %v3428_v7, %v810_v57  ;;  %v812_v14 = vpop.f32.mrb[5].mxu0  ;;  %v1846_v7 = vmul.f32 %v1837_v23, %v3738_v45  ;;  %v2437_v58 = vpop.permute.xlu1 %2436 }
 0x333   : > { %v2452_v23 = vmul.f32 %v2437_v58, %v3732_v40 }
 0x334   : > { %825 = vxpose.xlu1.b32.cont [3/4] (short) (narrow) %v821_v25, 32  ;;  %v4190_v62 = vpop.permute.xlu0 %1770 }
 0x335   : > { %v815_v51 = vpop.f32.mrb[6].mxu0 }
 0x336   : > { %v817_v17 = vpop.f32.mrb[7].mxu0  ;;  %v822_v20 = vmul.f32 %v3430_v16, %v815_v51  ;;  %v1877_v51 = vmul.f32 %v1869_v0, %v3748_v54  ;;  %v1878_v16 = vmul.f32 %v1869_v0, %v3750_v55  ;;  %v2507_v0 = vmul.f32 %v3957_v43, %v3736_v44 }
 0x338   : > { %v4194_v33 = vpop.permute.xlu0 %1227  ;;  %826 = vxpose.xlu1.b32.end [4/4] (short) (narrow) %v822_v20, 32 }
 0x339   : > { %5509 = vst [vmem:[#allocation11_spill] sm:$0xff] %v4194_v33 }
 0x33c   : > { %v4196_v5 = vpop.permute.xlu0 %1237 }
 0x33d   : > { %5510 = vst [vmem:[#allocation12_spill] sm:$0xff] %v4196_v5 }
 0x341   : > { %v4198_v15 = vpop.permute.xlu0 %1800 }
 0x345   : > { %v1805_v2 = vpop.permute.xlu0 %1804 }
 0x346   : > { %v1813_v61 = vmul.f32 %v1805_v2, %v3726_v37  ;;  %v1814_v48 = vmul.f32 %v1805_v2, %v3728_v38  ;;  %v2451_v2 = vmul.f32 %v2437_v58, %v3730_v39  ;;  %v1121_v58 = vmul.f32 %v4156_v60, %v3730_v39 }
 0x348   : > { %v1821_v57 = vadd.f32 %v1813_v61, %v1789_v4  ;;  %v1822_v25 = vadd.f32 %v1814_v48, %v1790_v13  ;;  %v2508_v48 = vmul.f32 %v3957_v43, %v3738_v45 }
 0x349   : > { %v4208_v14 = vpop.permute.xlu0 %2458 }
 0x34a   : > { %v1853_v17 = vadd.f32 %v1845_v49, %v1821_v57  ;;  %v1854_v20 = vadd.f32 %v1846_v7, %v1822_v25  ;;  %v2539_v57 = vmul.f32 %v2527_v32, %v3748_v54  ;;  %v2540_v25 = vmul.f32 %v2527_v32, %v3750_v55 }
 0x34b   : > { %v5511_v32 = vmov 2  }
 0x34c   : > { %v4212_v5 = vadd.f32 %v1877_v51, %v1853_v17  ;;  %v4214_v33 = vadd.f32 %v1878_v16, %v1854_v20 }
 0x34d   : > { %v2463_v18 = vpop.permute.xlu0 %2462 }
 0x34e   : > { %v2475_v4 = vmul.f32 %v2463_v18, %v3726_v37  ;;  %v2476_v13 = vmul.f32 %v2463_v18, %v3728_v38  ;;  %v2024_v61 = vmax.f32 %v4212_v5, %v4214_v33  ;;  %v4231_v18 = vld [vmem:[%s5431_s1 + $0x138] sm:$0xff] }
 0x350   : > { %v2483_v49 = vadd.f32 %v2475_v4, %v2451_v2  ;;  %v2484_v7 = vadd.f32 %v2476_v13, %v2452_v23  ;;  %2025 = vmax.xlane.f32.xlu0 %v2024_v61  ;;  %v1122_v2 = vmul.f32 %v4156_v60, %v3732_v40  ;;  %v1145_v23 = vmul.f32 %v3999_v50, %v3726_v37 }
 0x351   : > { %v1146_v4 = vmul.f32 %v3999_v50, %v3728_v38  ;;  %v1178_v60 = vmul.f32 %v4040_v36, %v3738_v45  ;;  %v1808_v50 = vmul.f32 %v4087_v24, %v3728_v38 }
 0x352   : > { %v2515_v51 = vadd.f32 %v2507_v0, %v2483_v49  ;;  %v2516_v16 = vadd.f32 %v2508_v48, %v2484_v7  ;;  %v1153_v13 = vadd.f32 %v1145_v23, %v1121_v58  ;;  %v1783_v0 = vmul.f32 %v4188_v42, %v3730_v39 }
 0x353   : > { %v1154_v61 = vadd.f32 %v1146_v4, %v1122_v2  ;;  %v1784_v48 = vmul.f32 %v4188_v42, %v3732_v40  ;;  %v1177_v49 = vmul.f32 %v4040_v36, %v3736_v44  ;;  %v1807_v7 = vmul.f32 %v4087_v24, %v3726_v37 }
 0x354   : > { %v4233_v17 = vadd.f32 %v2539_v57, %v2515_v51  ;;  %v4235_v20 = vadd.f32 %v2540_v25, %v2516_v16  ;;  %v1785_v42 = vmul.f32 %v4190_v62, %v3730_v39  ;;  %v1209_v36 = vmul.f32 %v4059_v11, %v3748_v54 }
 0x355   : > { %v1185_v57 = vadd.f32 %v1177_v49, %v1153_v13  ;;  %v1186_v25 = vadd.f32 %v1178_v60, %v1154_v61  ;;  %v1815_v51 = vadd.f32 %v1807_v7, %v1783_v0  ;;  %v1816_v16 = vadd.f32 %v1808_v50, %v1784_v48  ;;  %v5513_v49 = vld [vmem:[#allocation8_spill] sm:$0xff] }
 0x356   : > { %3371 = vset.pattern.permute.xlu1 %v5506_v19  ;;  %v2684_v43 = vmax.f32 %v4233_v17, %v4235_v20  ;;  %v1210_v58 = vmul.f32 %v4059_v11, %v3750_v55  ;;  %v1839_v24 = vmul.f32 %v4090_v22, %v3736_v44  ;;  %v1840_v2 = vmul.f32 %v4090_v22, %v3738_v45 }
 0x357   : > { %1242 = vperm.xlu1 %3371, %v4231_v18   ;;  %v1809_v23 = vmul.f32 %v4092_v27, %v3726_v37  ;;  %v4280_v4 = vadd.f32 %v1209_v36, %v1185_v57  ;;  %v1841_v60 = vmul.f32 %v5513_v49, %v3736_v44  ;;  %v1842_v22 = vmul.f32 %v5513_v49, %v3738_v45 }
 0x358   : > { %2685 = vmax.xlane.f32.xlu0 %v2684_v43  ;;  %v1786_v43 = vmul.f32 %v4190_v62, %v3732_v40  ;;  %v1810_v62 = vmul.f32 %v4092_v27, %v3728_v38  ;;  %v4282_v13 = vadd.f32 %v1210_v58, %v1186_v25  ;;  %v1847_v61 = vadd.f32 %v1839_v24, %v1815_v51 }
 0x359   : > { %v1848_v11 = vadd.f32 %v1840_v2, %v1816_v16  ;;  %v1817_v0 = vadd.f32 %v1809_v23, %v1785_v42  ;;  %v1871_v7 = vmul.f32 %v4178_v12, %v3748_v54  ;;  %v1872_v27 = vmul.f32 %v4178_v12, %v3750_v55  ;;  %v4307_v12 = vld [vmem:[%s5431_s1 + $0x150] sm:$0xff] }
 0x35a   : > { %5512 = vst [vmem:[#allocation13_spill] sm:$0xff] %v4282_v13  ;;  %v1818_v48 = vadd.f32 %v1810_v62, %v1786_v43  ;;  %v1355_v50 = vmax.f32 %v4280_v4, %v4282_v13  ;;  %v1873_v42 = vmul.f32 %v4094_v28, %v3748_v54  ;;  %v1874_v43 = vmul.f32 %v4094_v28, %v3750_v55  ;;  %v4319_v28 = vld [vmem:[%s5431_s1 + $0x158] sm:$0xff]  ;;  %v4327_v23 = vld [vmem:[%s5431_s1 + $0x170] sm:$0xff] }
 0x35b   : > { %3372 = vset.pattern.permute.xlu1 %v5511_v32  ;;  %v1849_v57 = vadd.f32 %v1841_v60, %v1817_v0  ;;  %v4295_v51 = vadd.f32 %v1871_v7, %v1847_v61  ;;  %v4297_v16 = vadd.f32 %v1872_v27, %v1848_v11  ;;  %v4333_v62 = vld [vmem:[%s5431_s1 + $0x178] sm:$0xff]  ;;  %v4342_v61 = vpop.permute.xlu1 %2522  ;;  %v4394_v60 = vld [vmem:[%s5431_s1 + $0x160] sm:$0xff]  ;;  %v1876_v13 = vmul.f32 %v4180_v35, %v3750_v55 }
 0x35c   : > { %v1850_v25 = vadd.f32 %v1842_v22, %v1818_v48  ;;  %v4400_v22 = vld [vmem:[%s5431_s1 + $0x168] sm:$0xff] }
 0x35d   : > { %5514 = vst [vmem:[#allocation8_spill] sm:$0xff] %v4295_v51  ;;  %5515 = vst [vmem:[#allocation14_spill] sm:$0xff] %v4297_v16  ;;  %v2015_v36 = vmax.f32 %v4295_v51, %v4297_v16  ;;  %v4311_v58 = vadd.f32 %v1873_v42, %v1849_v57  ;;  %v1812_v57 = vmul.f32 %v4198_v15, %v3728_v38 }
 0x35e   : > { %v4313_v24 = vadd.f32 %v1874_v43, %v1850_v25  ;;  %v1787_v25 = vmul.f32 %v4192_v26, %v3730_v39  ;;  %v1788_v42 = vmul.f32 %v4192_v26, %v3732_v40  ;;  %v1875_v26 = vmul.f32 %v4180_v35, %v3748_v54 }
 0x35f   : > { %v4347_v11 = vpop.permute.xlu1 %2441 }
 0x360   : > { %v2018_v2 = vmax.f32 %v4311_v58, %v4313_v24 }
 0x36e   : > { %2470 = vperm.xlu0 %3370, %v3991_v63  }
 0x372   : > { %277 = vperm.xlu0 %3370, %v4029_v8  }
 0x376   : > { %285 = vperm.xlu0 %3370, %v4046_v21  }
 0x37a   : > { %1258 = vperm.xlu0 %3370, %v4073_v46  }
 0x37b   : > { %1356 = vmax.xlane.f32.xlu1 %v1355_v50  ;;  %v1811_v50 = vmul.f32 %v4198_v15, %v3726_v37 }
 0x37e   : > { %1928 = vperm.xlu0 %3370, %v4307_v12  }
 0x37f   : > { %2016 = vmax.xlane.f32.xlu1 %v2015_v36  ;;  %v1819_v36 = vadd.f32 %v1811_v50, %v1787_v25 }
 0x382   : > { %1932 = vperm.xlu0 %3370, %v4319_v28  }
 0x383   : > { %2019 = vmax.xlane.f32.xlu1 %v2018_v2  ;;  %v1820_v2 = vadd.f32 %v1812_v57, %v1788_v42 }
 0x386   : > { %2594 = vperm.xlu0 %3370, %v4327_v23  }
 0x38a   : > { %2598 = vperm.xlu0 %3370, %v4333_v62  }
 0x38e   : > { %3376 = vset.pattern.permute.xlu0 %v5511_v32 }
 0x38f   : > { %331 = vperm.xlu0 %3376, %v4038_v1  }
 0x393   : > { %1298 = vperm.xlu0 %3376, %v4231_v18  }
 0x394   : > { %2490 = vperm.xlu1 %3372, %v3944_v3   ;;  %v4353_v3 = vpop.permute.xlu1 %2446 }
 0x397   : > { %1960 = vperm.xlu0 %3376, %v4307_v12  }
 0x398   : > { %2498 = vperm.xlu1 %3372, %v3972_v56   ;;  %v4357_v0 = vpop.permute.xlu1 %2530 }
 0x39b   : > { %2626 = vperm.xlu0 %3376, %v4327_v23  }
 0x39c   : > { %2502 = vperm.xlu1 %3372, %v3991_v63  }
 0x39f   : > { %2630 = vperm.xlu0 %3376, %v4333_v62  }
 0x3a0   : > { %327 = vperm.xlu1 %3372, %v4029_v8   ;;  %v4363_v8 = vpop.permute.xlu1 %231 }
 0x3a3   : > { %3377 = vset.pattern.permute.xlu0 %v5505_v59  ;;  %v5516_v59 = vld [vmem:[#allocation9_spill] sm:$0xff] }
 0x3a4   : > { %2534 = vperm.xlu0 %3377, %v3991_v63   ;;  %335 = vperm.xlu1 %3372, %v4046_v21   ;;  %v4370_v63 = vld [vmem:[%s5431_s1 + $0x140] sm:$0xff]  ;;  %v4372_v48 = vpop.permute.xlu1 %236  ;;  %v1844_v16 = vmul.f32 %v5516_v59, %v3738_v45 }
 0x3a6   : > { %v1852_v51 = vadd.f32 %v1844_v16, %v1820_v2 }
 0x3a8   : > { %381 = vperm.xlu0 %3377, %v4038_v1   ;;  %339 = vperm.xlu1 %3372, %v4054_v10   ;;  %v4434_v25 = vadd.f32 %v1876_v13, %v1852_v51 }
 0x3aa   : > { %5518 = vst [vmem:[#allocation15_spill] sm:$0xff] %v4434_v25 }
 0x3ac   : > { %385 = vperm.xlu0 %3377, %v4046_v21   ;;  %1286 = vperm.xlu1 %3372, %v4083_v52   ;;  %v4379_v21 = vld [vmem:[%s5431_s1 + $0x148] sm:$0xff] }
 0x3b0   : > { %1326 = vperm.xlu0 %3377, %v4148_v29   ;;  %1290 = vperm.xlu1 %3372, %v4073_v46   ;;  %v4383_v46 = vpop.permute.xlu1 %241 }
 0x3b4   : > { %1330 = vperm.xlu0 %3377, %v4231_v18   ;;  %1294 = vperm.xlu1 %3372, %v4148_v29   ;;  %v4387_v49 = vpop.permute.xlu1 %246 }
 0x3b8   : > { %1984 = vperm.xlu0 %3377, %v4370_v63   ;;  %1952 = vperm.xlu1 %3372, %v4370_v63   ;;  %v4402_v7 = vpop.permute.xlu1 %377 }
 0x3bc   : > { %1988 = vperm.xlu0 %3377, %v4379_v21   ;;  %1956 = vperm.xlu1 %3372, %v4379_v21   ;;  %v4405_v27 = vpop.permute.xlu1 %389 }
 0x3c0   : > { %1992 = vperm.xlu0 %3377, %v4307_v12   ;;  %1964 = vperm.xlu1 %3372, %v4319_v28   ;;  %v4417_v43 = vpop.permute.xlu1 %1232 }
 0x3c4   : > { %1996 = vperm.xlu0 %3377, %v4319_v28   ;;  %3373 = vset.pattern.permute.xlu1 %v5508_v47  ;;  %v1843_v47 = vmul.f32 %v5516_v59, %v3736_v44  ;;  %v4429_v50 = vpop.permute.xlu1 %1318  ;;  %v1360_v59 = vpop.xlane.xlu0 %1359 }
 0x3c6   : > { %v1851_v15 = vadd.f32 %v1843_v47, %v1819_v36 }
 0x3c8   : > { %2650 = vperm.xlu0 %3377, %v4394_v60   ;;  %v4432_v57 = vadd.f32 %v1875_v26, %v1851_v15  ;;  %v4437_v42 = vpop.permute.xlu1 %1322 }
 0x3ca   : > { %5517 = vst [vmem:[#allocation9_spill] sm:$0xff] %v4432_v57  ;;  %v2021_v47 = vmax.f32 %v4432_v57, %v4434_v25 }
 0x3cc   : > { %2654 = vperm.xlu0 %3377, %v4400_v22   ;;  %v4444_v35 = vpop.xlane.xlu1 %1353 }
 0x3d0   : > { %2658 = vperm.xlu0 %3377, %v4327_v23   ;;  %v4448_v36 = vpop.trf.xlu1 }
 0x3d1   : > { %5519 = vst [vmem:[#allocation16_spill] sm:$0xff] %v4448_v36 }
 0x3d4   : > { %2662 = vperm.xlu0 %3377, %v4333_v62   ;;  %v4452_v2 = vpop.trf.xlu1 }
 0x3d5   : > { %5521 = vst [vmem:[#allocation18_spill] sm:$0xff] %v4452_v2 }
 0x3d8   : > { %3378 = vset.pattern.permute.xlu0 %v5506_v19  ;;  %v4457_v26 = vpop.trf.xlu1 }
 0x3d9   : > { %1898 = vperm.xlu0 %3378, %v4379_v21   ;;  %5523 = vst [vmem:[#allocation20_spill] sm:$0xff] %v4457_v26 }
 0x3dc   : > { %v4465_v36 = vpop.trf.xlu1 }
 0x3dd   : > { %1903 = vperm.xlu0 %3378, %v4307_v12   ;;  %v4441_v16 = vpop.xlane.xlu0 %2025  ;;  %5525 = vst [vmem:[#allocation22_spill] sm:$0xff] %v4465_v36 }
 0x3e0   : > { %v4470_v2 = vpop.permute.xlu1 %1242 }
 0x3e1   : > { %2564 = vperm.xlu0 %3378, %v4400_v22   ;;  %5527 = vst [vmem:[#allocation24_spill] sm:$0xff] %v4470_v2  ;;  %v1368_v2 = vsub.f32 %v4174_v6, %v1360_v59 }
 0x3e4   : > { %2022 = vmax.xlane.f32.xlu1 %v2021_v47 }
 0x3e5   : > { %2569 = vperm.xlu0 %3378, %v4327_v23   ;;  %v4446_v12 = vpop.xlane.xlu0 %2685 }
 0x3ed   : > { %v2471_v13 = vpop.permute.xlu0 %2470 }
 0x3ee   : > { %v2479_v6 = vmul.f32 %v2471_v13, %v3726_v37 }
 0x3f1   : > { %v4450_v51 = vpop.permute.xlu0 %277 }
 0x3f2   : > { %5520 = vst [vmem:[#allocation17_spill] sm:$0xff] %v4450_v51 }
 0x3f5   : > { %v4454_v15 = vpop.permute.xlu0 %285  ;;  %2466 = vperm.xlu1 %3373, %v3972_v56  }
 0x3f6   : > { %5522 = vst [vmem:[#allocation19_spill] sm:$0xff] %v4454_v15  ;;  %v2033_v15 = vsub.f32 %v4212_v5, %v4441_v16  ;;  %v2455_v5 = vmul.f32 %v4353_v3, %v3730_v39 }
 0x3f9   : > { %v4459_v47 = vpop.permute.xlu0 %1258  ;;  %281 = vperm.xlu1 %3373, %v4038_v1  }
 0x3fa   : > { %5524 = vst [vmem:[#allocation21_spill] sm:$0xff] %v4459_v47 }
 0x3fd   : > { %v4462_v23 = vpop.permute.xlu0 %1928  ;;  %289 = vperm.xlu1 %3373, %v4054_v10   ;;  %v5460_v10 = vmov 0.0  }
 0x3fe   : > { %932 = vmatprep.mubr.f32.mxu1 %v5460_v10  ;;  %1598 = vmatprep.mubr.f32.mxu0 %v5460_v10 }
 0x401   : > { %v4467_v25 = vpop.permute.xlu0 %1932  ;;  %1254 = vperm.xlu1 %3373, %v4083_v52  }
 0x402   : > { %5526 = vst [vmem:[#allocation23_spill] sm:$0xff] %v4467_v25 }
 0x405   : > { %v4472_v57 = vpop.permute.xlu0 %2594  ;;  %1262 = vperm.xlu1 %3373, %v4148_v29  }
 0x408   : > { %v4475_v56 = vpop.xlane.xlu1 %1356 }
 0x409   : > { %1266 = vperm.xlu1 %3373, %v4231_v18   ;;  %v4478_v1 = vpop.permute.xlu0 %2598  ;;  %v1367_v18 = vsub.f32 %v4172_v41, %v1360_v59  ;;  %v2480_v59 = vmul.f32 %v2471_v13, %v3728_v38 }
 0x40a   : > { %5528 = vst [vmem:[#allocation25_spill] sm:$0xff] %v4478_v1 }
 0x40b   : > { %v1381_v10 = vmul.f32 1.442695, %v1367_v18  ;;  %v2695_v18 = vsub.f32 %v4233_v17, %v4446_v12 }
 0x40c   : > { %v4480_v26 = vpop.xlane.xlu1 %2016 }
 0x40d   : > { %5529 = vst [vmem:[#allocation26_spill] sm:$0xff] %v4480_v26  ;;  %1920 = vperm.xlu1 %3373, %v4370_v63   ;;  %3431 = vpow2.f32 %v1381_v10 }
 0x40e   : > { %v4484_v52 = vpop.permute.xlu0 %331 }
 0x40f   : > { %5530 = vst [vmem:[#allocation27_spill] sm:$0xff] %v4484_v52 }
 0x410   : > { %v2020_v25 = vpop.xlane.xlu1 %2019 }
 0x411   : > { %1924 = vperm.xlu1 %3373, %v4379_v21   ;;  %v2029_v52 = vsub.f32 %v4311_v58, %v2020_v25  ;;  %v2030_v47 = vsub.f32 %v4313_v24, %v2020_v25  ;;  %v2034_v24 = vsub.f32 %v4214_v33, %v4441_v16  ;;  %v2696_v16 = vsub.f32 %v4235_v20, %v4446_v12 }
 0x412   : > { %v4488_v29 = vpop.permute.xlu0 %1298 }
 0x413   : > { %5531 = vst [vmem:[#allocation28_spill] sm:$0xff] %v4488_v29  ;;  %v1383_v29 = vmul.f32 1.442695, %v1368_v2  ;;  %v2041_v25 = vmul.f32 1.442695, %v2030_v47  ;;  %v2456_v2 = vmul.f32 %v4353_v3, %v3732_v40 }
 0x414   : > { %v4490_v36 = vpop.permute.xlu1 %2490  ;;  %v2049_v33 = vmul.f32 1.442695, %v2034_v24 }
 0x415   : > { %2586 = vperm.xlu1 %3373, %v4394_v60   ;;  %3433 = vpow2.f32 %v1383_v29  ;;  %v2488_v29 = vadd.f32 %v2480_v59, %v2456_v2 }
 0x416   : > { %v4494_v1 = vpop.permute.xlu0 %1960 }
 0x417   : > { %v4534_v20 = vpop.eup %3431 }
 0x418   : > { %v4497_v26 = vpop.permute.xlu1 %2498  ;;  %5536 = vst [vmem:[#allocation33_spill] sm:$0xff] %v4534_v20 }
 0x419   : > { %5532 = vst [vmem:[#allocation29_spill] sm:$0xff] %v4497_v26  ;;  %2590 = vperm.xlu1 %3373, %v4400_v22   ;;  %v2039_v26 = vmul.f32 1.442695, %v2029_v52  ;;  %v2047_v52 = vmul.f32 1.442695, %v2033_v15 }
 0x41a   : > { %v4501_v21 = vpop.permute.xlu0 %2626 }
 0x41b   : > { %3435 = vpow2.f32 %v2039_v26 }
 0x41c   : > { %v2503_v41 = vpop.permute.xlu1 %2502  ;;  %3437 = vpow2.f32 %v2041_v25 }
 0x41d   : > { %3374 = vset.pattern.permute.xlu1 %v5511_v32  ;;  %v2511_v10 = vmul.f32 %v2503_v41, %v3736_v44  ;;  %v2512_v13 = vmul.f32 %v2503_v41, %v3738_v45  ;;  %v2487_v32 = vadd.f32 %v2479_v6, %v2455_v5  ;;  %3439 = vpow2.f32 %v2047_v52 }
 0x41e   : > { %2618 = vperm.xlu1 %3374, %v4394_v60   ;;  %v4510_v58 = vpop.permute.xlu0 %2630  ;;  %v2705_v41 = vmul.f32 1.442695, %v2695_v18  ;;  %3441 = vpow2.f32 %v2049_v33  ;;  %v2473_v33 = vmul.f32 %v4208_v14, %v3726_v37 }
 0x41f   : > { %5533 = vst [vmem:[#allocation30_spill] sm:$0xff] %v4510_v58  ;;  %v2519_v3 = vadd.f32 %v2511_v10, %v2487_v32  ;;  %v2520_v58 = vadd.f32 %v2512_v13, %v2488_v29  ;;  %v4538_v12 = vpop.eup %3433 }
 0x420   : > { %5537 = vst [vmem:[#allocation34_spill] sm:$0xff] %v4538_v12  ;;  %3443 = vpow2.f32 %v2705_v41  ;;  %v2505_v41 = vmul.f32 %v4490_v36, %v3736_v44 }
 0x422   : > { %2622 = vperm.xlu1 %3374, %v4400_v22   ;;  %v2707_v22 = vmul.f32 1.442695, %v2696_v16  ;;  %v2474_v16 = vmul.f32 %v4208_v14, %v3728_v38 }
 0x423   : > { %v2535_v47 = vpop.permute.xlu0 %2534 }
 0x424   : > { %v2543_v51 = vmul.f32 %v2535_v47, %v3748_v54  ;;  %v2544_v15 = vmul.f32 %v2535_v47, %v3750_v55  ;;  %3445 = vpow2.f32 %v2707_v22  ;;  %v2449_v47 = vmul.f32 %v4202_v30, %v3730_v39 }
 0x425   : > { %v4542_v59 = vpop.eup %3435  ;;  %v2506_v22 = vmul.f32 %v4490_v36, %v3738_v45 }
 0x426   : > { %v4527_v17 = vadd.f32 %v2543_v51, %v2519_v3  ;;  %v4529_v6 = vadd.f32 %v2544_v15, %v2520_v58  ;;  %3375 = vset.pattern.permute.xlu1 %v5506_v19  ;;  %5538 = vst [vmem:[#allocation35_spill] sm:$0xff] %v4542_v59  ;;  %v1394_v58 = vadd.f32 %v4538_v12, %v4534_v20  ;;  %v4546_v24 = vpop.eup %3437  ;;  %v5576_v20 = vld [vmem:[#allocation26_spill] sm:$0xff]  ;;  %v5577_v12 = vld [vmem:[#allocation8_spill] sm:$0xff] }
 0x427   : > { %v4532_v26 = vpop.permute.xlu0 %381  ;;  %5539 = vst [vmem:[#allocation36_spill] sm:$0xff] %v4546_v24  ;;  %v4550_v5 = vpop.eup %3439  ;;  %v2054_v2 = vadd.f32 %v4546_v24, %v4542_v59  ;;  %v2450_v15 = vmul.f32 %v4202_v30, %v3732_v40  ;;  %v2537_v30 = vmul.f32 %v4342_v61, %v3748_v54 }
 0x428   : > { %5534 = vst [vmem:[#allocation31_spill] sm:$0xff] %v4527_v17  ;;  %5535 = vst [vmem:[#allocation32_spill] sm:$0xff] %v4529_v6  ;;  %v2690_v32 = vmax.f32 %v4527_v17, %v4529_v6  ;;  %v4554_v10 = vpop.eup %3441 }
 0x429   : > { %5540 = vst [vmem:[#allocation37_spill] sm:$0xff] %v4550_v5  ;;  %5541 = vst [vmem:[#allocation38_spill] sm:$0xff] %v4554_v10  ;;  %v2060_v18 = vadd.f32 %v4554_v10, %v4550_v5  ;;  %v2482_v14 = vadd.f32 %v2474_v16, %v2450_v15  ;;  %v4582_v5 = vpop.permute.xlu1 %327  ;;  %v2538_v10 = vmul.f32 %v4342_v61, %v3750_v55 }
 0x42a   : > { %2691 = vmax.xlane.f32.xlu0 %v2690_v32  ;;  %v4558_v52 = vpop.eup %3443  ;;  %v361_v6 = vmul.f32 %v3738_v45, %v4582_v5 }
 0x42b   : > { %v4540_v51 = vpop.permute.xlu0 %385  ;;  %5543 = vst [vmem:[#allocation40_spill] sm:$0xff] %v4558_v52  ;;  %v2514_v19 = vadd.f32 %v2506_v22, %v2482_v14  ;;  %v1361_v14 = vsub.f32 %v4126_v9, %v4186_v31  ;;  %v1972_v9 = vmul.f32 %v4494_v1, %v3738_v45 }
 0x42d   : > { %v4590_v24 = vadd.f32 %v2538_v10, %v2514_v19 }
 0x42e   : > { %1395 = vadd.xlane.f32.xlu0 %v1394_v58  ;;  %v4562_v29 = vpop.eup %3445  ;;  %v2481_v58 = vadd.f32 %v2473_v33, %v2449_v47  ;;  %v4592_v33 = vpop.permute.xlu1 %335 }
 0x42f   : > { %v4548_v25 = vpop.permute.xlu0 %1326  ;;  %5544 = vst [vmem:[#allocation41_spill] sm:$0xff] %v4562_v29  ;;  %v2720_v32 = vadd.f32 %v4562_v29, %v4558_v52  ;;  %5548 = vst [vmem:[#allocation45_spill] sm:$0xff] %v4590_v24  ;;  %v1940_v52 = vmul.f32 %v4462_v23, %v3728_v38 }
 0x432   : > { %2055 = vadd.xlane.f32.xlu0 %v2054_v2 }
 0x433   : > { %v4556_v13 = vpop.permute.xlu0 %1330 }
 0x434   : > { %5542 = vst [vmem:[#allocation39_spill] sm:$0xff] %v4556_v13 }
 0x436   : > { %2061 = vadd.xlane.f32.xlu0 %v2060_v18  ;;  %v2513_v18 = vadd.f32 %v2505_v41, %v2481_v58  ;;  %v4600_v41 = vpop.permute.xlu1 %339 }
 0x437   : > { %v4570_v3 = vpop.permute.xlu0 %1984 }
 0x438   : > { %5545 = vst [vmem:[#allocation42_spill] sm:$0xff] %v4570_v3  ;;  %v4588_v36 = vadd.f32 %v2537_v30, %v2513_v18  ;;  %v1362_v30 = vsub.f32 %v4128_v53, %v4186_v31 }
 0x43a   : > { %2721 = vadd.xlane.f32.xlu0 %v2720_v32  ;;  %5547 = vst [vmem:[#allocation44_spill] sm:$0xff] %v4588_v36  ;;  %v2681_v47 = vmax.f32 %v4588_v36, %v4590_v24  ;;  %v4604_v61 = vpop.permute.xlu1 %1286 }
 0x43b   : > { %v4580_v2 = vpop.permute.xlu0 %1988 }
 0x43c   : > { %5546 = vst [vmem:[#allocation43_spill] sm:$0xff] %v4580_v2 }
 0x43e   : > { %v4608_v19 = vpop.permute.xlu1 %1290 }
 0x43f   : > { %v1993_v59 = vpop.permute.xlu0 %1992 }
 0x440   : > { %v2003_v53 = vmul.f32 %v1993_v59, %v3748_v54  ;;  %v2004_v31 = vmul.f32 %v1993_v59, %v3750_v55  ;;  %v2605_v59 = vmul.f32 %v4472_v57, %v3726_v37 }
 0x442   : > { %v4615_v18 = vpop.permute.xlu1 %1294 }
 0x443   : > { %v4594_v16 = vpop.permute.xlu0 %1996  ;;  %5554 = vst [vmem:[#allocation51_spill] sm:$0xff] %v4615_v18 }
 0x444   : > { %5549 = vst [vmem:[#allocation46_spill] sm:$0xff] %v4594_v16 }
 0x446   : > { %2682 = vmax.xlane.f32.xlu1 %v2681_v47  ;;  %v1939_v47 = vmul.f32 %v4462_v23, %v3726_v37  ;;  %v1371_v23 = vmul.f32 1.442695, %v1362_v30  ;;  %v4635_v36 = vpop.permute.xlu1 %1952 }
 0x447   : > { %v4598_v15 = vpop.permute.xlu0 %2650  ;;  %5556 = vst [vmem:[#allocation53_spill] sm:$0xff] %v4635_v36 }
 0x448   : > { %5550 = vst [vmem:[#allocation47_spill] sm:$0xff] %v4598_v15  ;;  %v1369_v15 = vmul.f32 1.442695, %v1361_v14 }
 0x44a   : > { %3447 = vpow2.f32 %v1369_v15  ;;  %v1363_v15 = vsub.f32 %v4136_v34, %v4444_v35  ;;  %v4670_v34 = vmul.f32 %v4357_v0, %v3748_v54 }
 0x44b   : > { %v4602_v22 = vpop.permute.xlu0 %2654  ;;  %3449 = vpow2.f32 %v1371_v23  ;;  %v268_v23 = vmul.f32 %v3730_v39, %v4363_v8 }
 0x44c   : > { %5551 = vst [vmem:[#allocation48_spill] sm:$0xff] %v4602_v22 }
 0x44f   : > { %v2659_v32 = vpop.permute.xlu0 %2658 }
 0x450   : > { %v2669_v14 = vmul.f32 %v2659_v32, %v3748_v54 }
 0x453   : > { %v4606_v58 = vpop.permute.xlu0 %2662 }
 0x454   : > { %5552 = vst [vmem:[#allocation49_spill] sm:$0xff] %v4606_v58 }
 0x457   : > { %1893 = vperm.xlu1 %3375, %v4370_v63   ;;  %v1971_v63 = vmul.f32 %v4494_v1, %v3736_v44 }
 0x458   : > { %v4611_v10 = vpop.permute.xlu0 %1898 }
 0x459   : > { %5553 = vst [vmem:[#allocation50_spill] sm:$0xff] %v4611_v10  ;;  %v360_v10 = vmul.f32 %v3736_v44, %v4582_v5 }
 0x45b   : > { %1908 = vperm.xlu1 %3375, %v4319_v28  }
 0x45c   : > { %v1904_v29 = vpop.permute.xlu0 %1903 }
 0x45d   : > { %v1915_v58 = vmul.f32 %v1904_v29, %v3730_v39  ;;  %v1916_v28 = vmul.f32 %v1904_v29, %v3732_v40 }
 0x45f   : > { %v1947_v22 = vadd.f32 %v1939_v47, %v1915_v58  ;;  %v1948_v16 = vadd.f32 %v1940_v52, %v1916_v28  ;;  %2559 = vperm.xlu1 %3375, %v4394_v60   ;;  %v2606_v60 = vmul.f32 %v4472_v57, %v3728_v38  ;;  %v2637_v58 = vmul.f32 %v4501_v21, %v3736_v44 }
 0x460   : > { %v4633_v24 = vpop.permute.xlu0 %2564  ;;  %v2670_v57 = vmul.f32 %v2659_v32, %v3750_v55  ;;  %v4666_v28 = vmul.f32 %v4347_v11, %v3732_v40  ;;  %v4674_v32 = vmul.f32 %v4357_v0, %v3750_v55  ;;  %v272_v0 = vmul.f32 %v3730_v39, %v4383_v46 }
 0x461   : > { %5555 = vst [vmem:[#allocation52_spill] sm:$0xff] %v4633_v24  ;;  %v1979_v2 = vadd.f32 %v1971_v63, %v1947_v22  ;;  %v1980_v1 = vadd.f32 %v1972_v9, %v1948_v16  ;;  %v2638_v16 = vmul.f32 %v4501_v21, %v3738_v45  ;;  %v4654_v22 = vpop.permute.xlu1 %1956  ;;  %v4660_v63 = vmul.f32 %v4347_v11, %v3730_v39  ;;  %v5560_v21 = vld [vmem:[#allocation10_spill] sm:$0xff] }
 0x462   : > { %5559 = vst [vmem:[#allocation56_spill] sm:$0xff] %v4654_v22  ;;  %v1364_v9 = vsub.f32 %v5560_v21, %v4444_v35  ;;  %v269_v35 = vmul.f32 %v3732_v40, %v4363_v8  ;;  %v4682_v11 = vmul.f32 %v3730_v39, %v4372_v48  ;;  %v4698_v8 = vmul.f32 %v3730_v39, %v4387_v49 }
 0x463   : > { %v4637_v3 = vadd.f32 %v2003_v53, %v1979_v2  ;;  %2574 = vperm.xlu1 %3375, %v4333_v62   ;;  %v4640_v29 = vadd.f32 %v2004_v31, %v1980_v1  ;;  %v4686_v1 = vmul.f32 %v3732_v40, %v4372_v48  ;;  %v4704_v48 = vmul.f32 %v3732_v40, %v4387_v49 }
 0x464   : > { %v2570_v52 = vpop.permute.xlu0 %2569  ;;  %v4724_v49 = vmul.f32 %v3750_v55, %v4405_v27  ;;  %v4736_v21 = vmul.f32 %v4429_v50, %v3750_v55 }
 0x465   : > { %5557 = vst [vmem:[#allocation54_spill] sm:$0xff] %v4637_v3  ;;  %5558 = vst [vmem:[#allocation55_spill] sm:$0xff] %v4640_v29  ;;  %v2581_v2 = vmul.f32 %v2570_v52, %v3730_v39  ;;  %v2582_v62 = vmul.f32 %v2570_v52, %v3732_v40  ;;  %v5572_v29 = vld [vmem:[#allocation12_spill] sm:$0xff] }
 0x466   : > { %v4770_v24 = vmul.f32 %v5572_v29, %v3730_v39 }
 0x467   : > { %v2613_v30 = vadd.f32 %v2605_v59, %v2581_v2  ;;  %v2614_v47 = vadd.f32 %v2606_v60, %v2582_v62  ;;  %v1373_v59 = vmul.f32 1.442695, %v1363_v15  ;;  %v4700_v2 = vpop.eup %3447  ;;  %v4708_v62 = vmul.f32 %v3748_v54, %v4402_v7 }
 0x468   : > { %5563 = vst [vmem:[#allocation58_spill] sm:$0xff] %v4700_v2  ;;  %v4712_v15 = vmul.f32 %v3750_v55, %v4402_v7  ;;  %v4732_v7 = vmul.f32 %v4429_v50, %v3748_v54  ;;  %v5569_v50 = vld [vmem:[#allocation13_spill] sm:$0xff] }
 0x469   : > { %v2645_v53 = vadd.f32 %v2637_v58, %v2613_v30  ;;  %v2646_v31 = vadd.f32 %v2638_v16, %v2614_v47  ;;  %v273_v58 = vmul.f32 %v3732_v40, %v4383_v46  ;;  %v1375_v16 = vmul.f32 1.442695, %v1364_v9  ;;  %5573 = vst [vmem:[#allocation13_spill] sm:$0xff] %v4770_v24  ;;  %v5579_v24 = vld [vmem:[#allocation24_spill] sm:$0xff] }
 0x46a   : > { %v4716_v46 = vmul.f32 %v3748_v54, %v4405_v27  ;;  %v1247_v30 = vmul.f32 %v4417_v43, %v3730_v39  ;;  %v1248_v47 = vmul.f32 %v4417_v43, %v3732_v40  ;;  %5566 = vst [vmem:[#allocation61_spill] sm:$0xff] %v4732_v7  ;;  %v4740_v9 = vmul.f32 %v4437_v42, %v3748_v54  ;;  %v5568_v43 = vld [vmem:[#allocation11_spill] sm:$0xff] }
 0x46b   : > { %v4688_v60 = vadd.f32 %v2669_v14, %v2645_v53  ;;  %v4690_v52 = vadd.f32 %v2670_v57, %v2646_v31  ;;  %v4718_v14 = vpop.permute.xlu1 %1964  ;;  %v4720_v57 = vpop.eup %3449  ;;  %3451 = vpow2.f32 %v1373_v59  ;;  %v1365_v27 = vsub.f32 %v4280_v4, %v4475_v56  ;;  %v5570_v59 = vld [vmem:[#allocation17_spill] sm:$0xff] }
 0x46c   : > { %5564 = vst [vmem:[#allocation59_spill] sm:$0xff] %v4718_v14  ;;  %5565 = vst [vmem:[#allocation60_spill] sm:$0xff] %v4720_v57  ;;  %v4746_v53 = vmul.f32 %v4437_v42, %v3750_v55  ;;  %3453 = vpow2.f32 %v1375_v16  ;;  %v4750_v31 = vmul.f32 %v5568_v43, %v3730_v39  ;;  %v310_v3 = vmul.f32 %v3726_v37, %v5570_v59  ;;  %v5575_v14 = vld [vmem:[#allocation21_spill] sm:$0xff] }
 0x46d   : > { %5561 = vst [vmem:[#allocation10_spill] sm:$0xff] %v4688_v60  ;;  %5562 = vst [vmem:[#allocation57_spill] sm:$0xff] %v4690_v52  ;;  %v1366_v52 = vsub.f32 %v5569_v50, %v4475_v56  ;;  %v4756_v60 = vmul.f32 %v5568_v43, %v3732_v40  ;;  %v311_v4 = vmul.f32 %v3728_v38, %v5570_v59  ;;  %v5574_v43 = vld [vmem:[#allocation19_spill] sm:$0xff]  ;;  %v1377_v36 = vmul.f32 1.442695, %v1365_v27 }
 0x46e   : > { %5567 = vst [vmem:[#allocation62_spill] sm:$0xff] %v4740_v9  ;;  %v4766_v16 = vadd.f32 %v4720_v57, %v4700_v2  ;;  %v4774_v56 = vmul.f32 %v5572_v29, %v3732_v40  ;;  %v314_v50 = vmul.f32 %v3726_v37, %v5574_v43  ;;  %v315_v59 = vmul.f32 %v3728_v38, %v5574_v43  ;;  %v5578_v57 = vld [vmem:[#allocation14_spill] sm:$0xff] }
 0x46f   : > { %v1271_v22 = vmul.f32 %v5575_v14, %v3726_v37  ;;  %v1272_v29 = vmul.f32 %v5575_v14, %v3728_v38  ;;  %v1379_v17 = vmul.f32 1.442695, %v1366_v52  ;;  %v2027_v2 = vsub.f32 %v5577_v12, %v5576_v20 }
 0x470   : > { %5571 = vst [vmem:[#allocation11_spill] sm:$0xff] %v4766_v16  ;;  %v2028_v43 = vsub.f32 %v5578_v57, %v5576_v20  ;;  %v4794_v9 = vmul.f32 %v5579_v24, %v3730_v39  ;;  %v4798_v27 = vmul.f32 %v5579_v24, %v3732_v40  ;;  %v318_v7 = vadd.f32 %v310_v3, %v268_v23 }
 0x471   : > { %v4762_v42 = vpop.xlane.xlu1 %2022  ;;  %v319_v5 = vadd.f32 %v311_v4, %v269_v35  ;;  %v322_v16 = vadd.f32 %v314_v50, %v272_v0  ;;  %v323_v14 = vadd.f32 %v315_v59, %v273_v58  ;;  %v4802_v18 = vadd.f32 %v1271_v22, %v1247_v30  ;;  %v5582_v30 = vld [vmem:[#allocation29_spill] sm:$0xff] }
 0x472   : > { %5580 = vst [vmem:[#allocation17_spill] sm:$0xff] %v4794_v9  ;;  %3455 = vpow2.f32 %v1377_v36  ;;  %v368_v57 = vadd.f32 %v360_v10, %v318_v7  ;;  %v1280_v39 = vadd.f32 %v1272_v29, %v1248_v47  ;;  %v4804_v9 = vmul.f32 1.442695, %v2027_v2 }
 0x473   : > { %v369_v20 = vadd.f32 %v361_v6, %v319_v5  ;;  %3457 = vpow2.f32 %v1379_v17  ;;  %v4806_v24 = vmul.f32 1.442695, %v2028_v43  ;;  %v364_v23 = vmul.f32 %v3736_v44, %v4592_v33  ;;  %v5581_v17 = vld [vmem:[#allocation27_spill] sm:$0xff] }
 0x474   : > { %v365_v35 = vmul.f32 %v3738_v45, %v4592_v33  ;;  %v362_v22 = vmul.f32 %v3736_v44, %v5581_v17  ;;  %v363_v0 = vmul.f32 %v3738_v45, %v5581_v17  ;;  %v2509_v33 = vmul.f32 %v5582_v30, %v3736_v44 }
 0x475   : > { %v2467_v13 = vpop.permute.xlu1 %2466  ;;  %v4808_v3 = vpop.eup %3451  ;;  %v418_v47 = vadd.f32 %v4708_v62, %v368_v57  ;;  %v412_v7 = vmul.f32 %v3748_v54, %v4532_v26  ;;  %v413_v4 = vmul.f32 %v3750_v55, %v4532_v26  ;;  %v372_v29 = vadd.f32 %v364_v23, %v322_v16 }
 0x476   : > { %v2477_v52 = vmul.f32 %v2467_v13, %v3726_v37  ;;  %v2478_v12 = vmul.f32 %v2467_v13, %v3728_v38  ;;  %v4816_v10 = vpop.eup %3453  ;;  %v373_v43 = vadd.f32 %v365_v35, %v323_v14  ;;  %v366_v57 = vmul.f32 %v3736_v44, %v4600_v41 }
 0x477   : > { %v367_v26 = vmul.f32 %v3738_v45, %v4600_v41  ;;  %v1304_v41 = vmul.f32 %v4608_v19, %v3738_v45  ;;  %3459 = vpow2.f32 %v4804_v9 }
 0x478   : > { %v2485_v13 = vadd.f32 %v2477_v52, %v4660_v63  ;;  %v2486_v36 = vadd.f32 %v2478_v12, %v4666_v28  ;;  %v2510_v63 = vmul.f32 %v5582_v30, %v3738_v45  ;;  %v419_v28 = vadd.f32 %v4712_v15, %v369_v20 }
 0x479   : > { %v282_v6 = vpop.permute.xlu1 %281  ;;  %3461 = vpow2.f32 %v4806_v24 }
 0x47a   : > { %v312_v58 = vmul.f32 %v3726_v37, %v282_v6  ;;  %v313_v2 = vmul.f32 %v3728_v38, %v282_v6  ;;  %v2517_v5 = vadd.f32 %v2509_v33, %v2485_v13  ;;  %v2518_v52 = vadd.f32 %v2510_v63, %v2486_v36  ;;  %v5583_v33 = vld [vmem:[#allocation9_spill] sm:$0xff] }
 0x47b   : > { %v1302_v36 = vmul.f32 %v4604_v61, %v3738_v45  ;;  %v2031_v63 = vsub.f32 %v5583_v33, %v4762_v42  ;;  %v5592_v33 = vmov 0.0  }
 0x47c   : > { %v320_v50 = vadd.f32 %v312_v58, %v4682_v11  ;;  %v321_v59 = vadd.f32 %v313_v2, %v4686_v1  ;;  %v414_v11 = vmul.f32 %v3748_v54, %v4540_v51  ;;  %v415_v1 = vmul.f32 %v3750_v55, %v4540_v51  ;;  %v4848_v13 = vpop.eup %3455 }
 0x47d   : > { %v290_v12 = vpop.permute.xlu1 %289  ;;  %v4858_v51 = vadd.f32 %v4674_v32, %v2518_v52 }
 0x47e   : > { %v316_v6 = vmul.f32 %v3726_v37, %v290_v12  ;;  %v317_v15 = vmul.f32 %v3728_v38, %v290_v12  ;;  %v371_v62 = vadd.f32 %v363_v0, %v321_v59  ;;  %v370_v20 = vadd.f32 %v362_v22, %v320_v50 }
 0x47f   : > { %v4855_v22 = vadd.f32 %v4670_v34, %v2517_v5  ;;  %v422_v30 = vadd.f32 %v414_v11, %v372_v29  ;;  %v5584_v34 = vld [vmem:[#allocation15_spill] sm:$0xff]  ;;  %v423_v52 = vadd.f32 %v415_v1, %v373_v43  ;;  %v1312_v12 = vadd.f32 %v1304_v41, %v1280_v39 }
 0x480   : > { %v324_v16 = vadd.f32 %v316_v6, %v4698_v8  ;;  %v325_v14 = vadd.f32 %v317_v15, %v4704_v48  ;;  %v421_v23 = vadd.f32 %v413_v4, %v371_v62  ;;  %v420_v35 = vadd.f32 %v412_v7, %v370_v20  ;;  %v4860_v8 = vpop.eup %3457  ;;  %v5586_v11 = vld [vmem:[#allocation51_spill] sm:$0xff] }
 0x481   : > { %v1255_v17 = vpop.permute.xlu1 %1254  ;;  %v2032_v50 = vsub.f32 %v5584_v34, %v4762_v42  ;;  %v2687_v15 = vmax.f32 %v4855_v22, %v4858_v51  ;;  %v1301_v42 = vmul.f32 %v4604_v61, %v3736_v44  ;;  %v2043_v39 = vmul.f32 1.442695, %v2031_v63  ;;  %v5585_v61 = vld [vmem:[#allocation28_spill] sm:$0xff] }
 0x482   : > { %v374_v48 = vadd.f32 %v366_v57, %v324_v16  ;;  %v375_v0 = vadd.f32 %v367_v26, %v325_v14  ;;  %v1269_v58 = vmul.f32 %v1255_v17, %v3726_v37  ;;  %v1270_v2 = vmul.f32 %v1255_v17, %v3728_v38  ;;  %v5587_v14 = vld [vmem:[#allocation11_spill] sm:$0xff]  ;;  %v5589_v17 = vld [vmem:[#allocation17_spill] sm:$0xff] }
 0x483   : > { %v3194_v7 = vpack.c.bf16 %v421_v23, %v419_v28  ;;  %v3196_v4 = vpack.c.bf16 %v420_v35, %v418_v47  ;;  %v2045_v47 = vmul.f32 1.442695, %v2032_v50  ;;  %v1308_v62 = vmul.f32 %v5585_v61, %v3738_v45  ;;  %v4909_v50 = vpop.eup %3459 }
 0x484   : > { %v1278_v32 = vadd.f32 %v1270_v2, %v4756_v60  ;;  %v425_v59 = vadd.f32 %v4724_v49, %v375_v0  ;;  %v424_v5 = vadd.f32 %v4716_v46, %v374_v48  ;;  %v1277_v6 = vadd.f32 %v1269_v58, %v4750_v31  ;;  %v5590_v0 = vld [vmem:[#allocation16_spill] sm:$0xff]  ;;  %v5591_v58 = vld [vmem:[#allocation61_spill] sm:$0xff] }
 0x485   : > { %3195 = vmatprep.subr.bf16.mxu1 %v3194_v7  ;;  %v1263_v29 = vpop.permute.xlu1 %1262  ;;  %v1303_v46 = vmul.f32 %v4608_v19, %v3736_v44  ;;  %v1344_v19 = vadd.f32 %v4746_v53, %v1312_v12  ;;  %v1338_v26 = vmul.f32 %v4548_v25, %v3750_v55  ;;  %v1306_v24 = vmul.f32 %v5586_v11, %v3738_v45  ;;  %v5588_v53 = vld [vmem:[#allocation39_spill] sm:$0xff]  ;;  %v5593_v7 = vld [vmem:[#allocation62_spill] sm:$0xff] }
 0x486   : > { %v1310_v28 = vadd.f32 %v1302_v36, %v1278_v32  ;;  %3197 = vmatpush1.bf16.msra.mxu1 %v3196_v4  ;;  %v1274_v60 = vmul.f32 %v1263_v29, %v3728_v38  ;;  %v3198_v49 = vpack.c.bf16 %v425_v59, %v423_v52  ;;  %v3200_v31 = vpack.c.bf16 %v424_v5, %v422_v30 }
 0x487   : > { %2688 = vmax.xlane.f32.xlu1 %v2687_v15  ;;  %v1309_v20 = vadd.f32 %v1301_v42, %v1277_v6  ;;  %v1311_v1 = vadd.f32 %v1303_v46, %v4802_v18  ;;  %3463 = vpow2.f32 %v2043_v39  ;;  %v1273_v16 = vmul.f32 %v1263_v29, %v3726_v37  ;;  %v5595_v29 = vld [vmem:[#allocation18_spill] sm:$0xff]  ;;  %v3462_v42 = vpop.eup %3461 }
 0x488   : > { %v1282_v43 = vadd.f32 %v1274_v60, %v4774_v56  ;;  %v1342_v9 = vadd.f32 %v4736_v21, %v1310_v28  ;;  %3199 = vmatprep.subr.bf16.mxu1 %v3198_v49  ;;  %v1340_v35 = vmul.f32 %v5588_v53, %v3750_v55  ;;  %3465 = vpow2.f32 %v2045_v47  ;;  %v5596_v49 = vld [vmem:[#allocation20_spill] sm:$0xff] }
 0x489   : > { %v1267_v57 = vpop.permute.xlu1 %1266  ;;  %v1388_v18 = vadd.f32 %v4816_v10, %v4808_v3  ;;  %v1341_v2 = vadd.f32 %v5591_v58, %v1309_v20  ;;  %v1307_v63 = vmul.f32 %v5585_v61, %v3736_v44  ;;  %v1343_v4 = vadd.f32 %v5593_v7, %v1311_v1  ;;  %v5597_v61 = vld [vmem:[#allocation22_spill] sm:$0xff]  ;;  %v5598_v20 = vld [vmem:[#allocation60_spill] sm:$0xff] }
 0x48a   : > { %3201 = vmatpush1.bf16.msra.mxu1 %v3200_v31  ;;  %v1275_v56 = vmul.f32 %v1267_v57, %v3726_v37  ;;  %v1276_v21 = vmul.f32 %v1267_v57, %v3728_v38  ;;  %v3202_v23 = vpack.c.bf16 %v1344_v19, %v1342_v9  ;;  %v1314_v36 = vadd.f32 %v1306_v24, %v1282_v43  ;;  %v5599_v57 = vld [vmem:[#allocation58_spill] sm:$0xff] }
 0x48b   : > { %1386 = vadd.xlane.f32.xlu1 %v5587_v14  ;;  %v1391_v32 = vadd.f32 %v4860_v8, %v4848_v13  ;;  %v1339_v52 = vmul.f32 %v5588_v53, %v3748_v54  ;;  %v1305_v12 = vmul.f32 %v5586_v11, %v3736_v44  ;;  %v3204_v15 = vpack.c.bf16 %v1343_v4, %v1341_v2  ;;  %v5600_v19 = vld [vmem:[#allocation34_spill] sm:$0xff] }
 0x48c   : > { %v1284_v41 = vadd.f32 %v1276_v21, %v4798_v27  ;;  %v1283_v48 = vadd.f32 %v1275_v56, %v5589_v17  ;;  %3203 = vmatprep.subr.bf16.mxu1 %v3202_v23  ;;  %v5594_v27 = vld [vmem:[#allocation13_spill] sm:$0xff]  ;;  %v1346_v59 = vadd.f32 %v1338_v26, %v1314_v36  ;;  %v1337_v60 = vmul.f32 %v4548_v25, %v3748_v54  ;;  %v5602_v21 = vld [vmem:[#allocation31_spill] sm:$0xff]  ;;  %v5607_v4 = vld [vmem:[#allocation30_spill] sm:$0xff] }
 0x48d   : > { %3163 = vmatmul.mubr.msk.f32.vlgmr.msra.gmra.mrb[0].mxu1 %vm855_vm0, %v5590_v0  ;;  %v1281_v34 = vadd.f32 %v1273_v16, %v5594_v27  ;;  %v2051_v31 = vadd.f32 %v3462_v42, %v4909_v50  ;;  %v5601_v26 = vld [vmem:[#allocation33_spill] sm:$0xff]  ;;  %v1921_v11 = vpop.permute.xlu1 %1920  ;;  %v5603_v16 = vld [vmem:[#allocation32_spill] sm:$0xff]  ;;  %v5604_v17 = vld [vmem:[#allocation23_spill] sm:$0xff]  ;;  %v4969_v27 = vmul.f32 %v5607_v4, %v3736_v44 }
 0x48e   : > { %v1316_v30 = vadd.f32 %v1308_v62, %v1284_v41  ;;  %938 = vmatprep.mubr.f32.mxu1 %v5592_v33  ;;  %v1315_v6 = vadd.f32 %v1307_v63, %v1283_v48  ;;  %v1941_v48 = vmul.f32 %v5604_v17, %v3726_v37  ;;  %v1942_v0 = vmul.f32 %v5604_v17, %v3728_v38 }
 0x48f   : > { %1389 = vadd.xlane.f32.xlu1 %v1388_v18  ;;  %v1313_v46 = vadd.f32 %v1305_v12, %v1281_v34  ;;  %v5605_v18 = vld [vmem:[#allocation50_spill] sm:$0xff]  ;;  %v5610_v12 = vld [vmem:[#allocation7_spill] sm:$0xff] }
 0x490   : > { %v1348_v5 = vadd.f32 %v1340_v35, %v1316_v30  ;;  %v1347_v47 = vadd.f32 %v1339_v52, %v1315_v6  ;;  %v1914_v58 = vmul.f32 %v5605_v18, %v3732_v40  ;;  %v5606_v30 = vld [vmem:[#allocation25_spill] sm:$0xff]  ;;  %v5608_v34 = vld [vmem:[#allocation42_spill] sm:$0xff]  ;;  %v1913_v6 = vmul.f32 %v5605_v18, %v5610_v12 }
 0x491   : > { %3164 = vmatmul.mubr.msk.f32.gmra.mrb[2].mxu1 %vm855_vm0, %v5595_v29  ;;  %v4922_v39 = vpop.eup %3463  ;;  %v1345_v9 = vadd.f32 %v1337_v60, %v1313_v46  ;;  %v1925_v24 = vpop.permute.xlu1 %1924  ;;  %v4961_v63 = vmul.f32 %v5606_v30, %v3726_v37  ;;  %v4965_v7 = vmul.f32 %v5606_v30, %v3728_v38  ;;  %v5612_v46 = vld [vmem:[#allocation44_spill] sm:$0xff] }
 0x492   : > { %944 = vmatprep.mubr.f32.mxu1 %v5592_v33  ;;  %v3206_v28 = vpack.c.bf16 %v1348_v5, %v1346_v59  ;;  %v4927_v43 = vpop.eup %3465  ;;  %v1938_v2 = vmul.f32 %v1925_v24, %v3728_v38  ;;  %v2000_v59 = vmul.f32 %v5608_v34, %v3750_v55  ;;  %v5609_v5 = vld [vmem:[#allocation53_spill] sm:$0xff]  ;;  %v1937_v29 = vmul.f32 %v1925_v24, %v3726_v37 }
 0x493   : > { %3205 = vmatpush1.bf16.xpose.msra.mxu1 %v3204_v15  ;;  %1392 = vadd.xlane.f32.xlu1 %v1391_v32  ;;  %v3208_v25 = vpack.c.bf16 %v1347_v47, %v1345_v9  ;;  %v2057_v62 = vadd.f32 %v4927_v43, %v4922_v39  ;;  %v1999_v32 = vmul.f32 %v5608_v34, %v3748_v54 }
 0x494   : > { %3207 = vmatprep.subr.bf16.mxu1 %v3206_v28  ;;  %v1967_v52 = vmul.f32 %v5609_v5, %v3736_v44  ;;  %v5611_v28 = vld [vmem:[#allocation43_spill] sm:$0xff] }
 0x495   : > { %3165 = vmatmul.mubr.msk.f32.gmra.mrb[4].mxu1 %vm855_vm0, %v5596_v49  ;;  %v2001_v60 = vmul.f32 %v5611_v28, %v3748_v54  ;;  %v2002_v9 = vmul.f32 %v5611_v28, %v3750_v55 }
 0x496   : > { %950 = vmatprep.mubr.f32.mxu1 %v5592_v33 }
 0x497   : > { %2052 = vadd.xlane.f32.xlu1 %v2051_v31  ;;  %v5613_v31 = vld [vmem:[#allocation45_spill] sm:$0xff] }
 0x499   : > { %3166 = vmatmul.mubr.msk.f32.gmra.mrb[6].mxu1 %vm855_vm0, %v5597_v61  ;;  %v5614_v61 = vld [vmem:[#allocation56_spill] sm:$0xff] }
 0x49a   : > { %1465 = vmatprep.mubr.f32.mxu1 %v5598_v20  ;;  %v1946_v20 = vadd.f32 %v1938_v2, %v1914_v58  ;;  %v5617_v58 = vld [vmem:[#allocation52_spill] sm:$0xff] }
 0x49b   : > { %3209 = vmatpush1.bf16.xpose.msra.mxu1 %v3208_v25  ;;  %2058 = vadd.xlane.f32.xlu1 %v2057_v62  ;;  %v1969_v25 = vmul.f32 %v5614_v61, %v3736_v44  ;;  %v1970_v62 = vmul.f32 %v5614_v61, %v3738_v45  ;;  %v2579_v2 = vmul.f32 %v5617_v58, %v5610_v12 }
 0x49d   : > { %v1978_v30 = vadd.f32 %v1970_v62, %v1946_v20 }
 0x4a2   : > { %1466 = vmatmul.mubr.f32.vlgmr.msra.gmra.mrb[8].mxu1 %v5599_v57  ;;  %v5615_v57 = vld [vmem:[#allocation59_spill] sm:$0xff] }
 0x4a3   : > { %1470 = vmatprep.mubr.f32.mxu1 %v4816_v10 }
 0x4a6   : > { %1471 = vmatmul.mubr.f32.gmra.mrb[10].mxu1 %v4808_v3  ;;  %v2587_v3 = vpop.permute.xlu1 %2586 }
 0x4a7   : > { %1475 = vmatprep.mubr.f32.mxu1 %v4860_v8 }
 0x4aa   : > { %1476 = vmatmul.mubr.f32.gmra.mrb[12].mxu1 %v4848_v13  ;;  %v2591_v8 = vpop.permute.xlu1 %2590 }
 0x4ab   : > { %1480 = vmatprep.mubr.f32.mxu1 %v5600_v19  ;;  %v1973_v19 = vmul.f32 %v5615_v57, %v3736_v44  ;;  %v2603_v34 = vmul.f32 %v2591_v8, %v3726_v37 }
 0x4ae   : > { %1481 = vmatmul.mubr.f32.gmra.mrb[14].mxu1 %v5601_v26  ;;  %v4950_v36 = vpop.permute.xlu1 %2618  ;;  %v1974_v26 = vmul.f32 %v5615_v57, %v3738_v45 }
 0x4af   : > { %2131 = vmatprep.mubr.f32.mxu1 %v3462_v42  ;;  %v1968_v42 = vmul.f32 %v5609_v5, %v3738_v45  ;;  %v5618_v5 = vld [vmem:[#allocation48_spill] sm:$0xff] }
 0x4b2   : > { %v2623_v41 = vpop.permute.xlu1 %2622 }
 0x4b7   : > { %v2692_v56 = vpop.xlane.xlu0 %2691 }
 0x4b8   : > { %v2699_v1 = vsub.f32 %v5602_v21, %v2692_v56  ;;  %v2700_v14 = vsub.f32 %v5603_v16, %v2692_v56  ;;  %v5616_v21 = vld [vmem:[#allocation46_spill] sm:$0xff] }
 0x4b9   : > { %v2006_v16 = vmul.f32 %v5616_v21, %v3750_v55 }
 0x4ba   : > { %v2713_v23 = vmul.f32 1.442695, %v2699_v1  ;;  %v2715_v10 = vmul.f32 1.442695, %v2700_v14  ;;  %v2005_v1 = vmul.f32 %v5616_v21, %v3748_v54  ;;  %v1935_v14 = vmul.f32 %v1921_v11, %v3726_v37 }
 0x4bb   : > { %v2636_v21 = vmul.f32 %v2623_v41, %v3738_v45 }
 0x4bc   : > { %3467 = vpow2.f32 %v2713_v23  ;;  %v1945_v23 = vadd.f32 %v1937_v29, %v1913_v6  ;;  %v2580_v6 = vmul.f32 %v5617_v58, %v3732_v40 }
 0x4bd   : > { %3469 = vpow2.f32 %v2715_v10 }
 0x4be   : > { %v1977_v28 = vadd.f32 %v1969_v25, %v1945_v23  ;;  %v5021_v25 = vld [vmem:[%s5431_s1 + $0x28] sm:$0xff] }
 0x4c6   : > { %v4944_v53 = vpop.eup %3467 }
 0x4c7   : > { %v4946_v13 = vpop.eup %3469 }
 0x4c8   : > { %v2726_v35 = vadd.f32 %v4946_v13, %v4944_v53 }
 0x4ca   : > { %2727 = vadd.xlane.f32.xlu0 %v2726_v35  ;;  %v1936_v35 = vmul.f32 %v1921_v11, %v3728_v38 }
 0x4d3   : > { %v2683_v15 = vpop.xlane.xlu1 %2682 }
 0x4d4   : > { %v2693_v49 = vsub.f32 %v5612_v46, %v2683_v15  ;;  %v2694_v47 = vsub.f32 %v5613_v31, %v2683_v15  ;;  %v2667_v15 = vmul.f32 %v5618_v5, %v3748_v54  ;;  %v2601_v46 = vmul.f32 %v2587_v3, %v3726_v37 }
 0x4d5   : > { %v2635_v31 = vmul.f32 %v2623_v41, %v3736_v44 }
 0x4d6   : > { %v2701_v24 = vmul.f32 1.442695, %v2693_v49  ;;  %v2703_v56 = vmul.f32 1.442695, %v2694_v47  ;;  %v2604_v49 = vmul.f32 %v2591_v8, %v3728_v38  ;;  %v2010_v8 = vadd.f32 %v2002_v9, %v1978_v30 }
 0x4d7   : > { %v1894_v10 = vpop.permute.xlu1 %1893 }
 0x4d8   : > { %3471 = vpow2.f32 %v2701_v24  ;;  %v1911_v17 = vmul.f32 %v1894_v10, %v5610_v12  ;;  %v1912_v18 = vmul.f32 %v1894_v10, %v3732_v40  ;;  %v2602_v24 = vmul.f32 %v2587_v3, %v3728_v38 }
 0x4d9   : > { %3473 = vpow2.f32 %v2703_v56  ;;  %v2611_v56 = vadd.f32 %v2603_v34, %v2579_v2  ;;  %v2009_v3 = vadd.f32 %v2001_v60, %v1977_v28 }
 0x4da   : > { %v1943_v29 = vadd.f32 %v1935_v14, %v1911_v17  ;;  %v1944_v11 = vadd.f32 %v1936_v35, %v1912_v18  ;;  %v2633_v35 = vmul.f32 %v4950_v36, %v3736_v44 }
 0x4db   : > { %v1909_v47 = vpop.permute.xlu1 %1908  ;;  %v2643_v17 = vadd.f32 %v2635_v31, %v2611_v56 }
 0x4dc   : > { %v1975_v61 = vadd.f32 %v1967_v52, %v1943_v29  ;;  %v1976_v62 = vadd.f32 %v1968_v42, %v1944_v11  ;;  %v1917_v20 = vmul.f32 %v1909_v47, %v5610_v12  ;;  %v1918_v57 = vmul.f32 %v1909_v47, %v3732_v40  ;;  %v5619_v11 = vld [vmem:[#allocation47_spill] sm:$0xff] }
 0x4dd   : > { %v2612_v42 = vadd.f32 %v2604_v49, %v2580_v6  ;;  %v2665_v28 = vmul.f32 %v5619_v11, %v3748_v54  ;;  %v2668_v49 = vmul.f32 %v5618_v5, %v3750_v55  ;;  %v2675_v31 = vadd.f32 %v2667_v15, %v2643_v17  ;;  %v5620_v5 = vld [vmem:[#allocation55_spill] sm:$0xff] }
 0x4de   : > { %v1949_v14 = vadd.f32 %v1941_v48, %v1917_v20  ;;  %v1950_v23 = vadd.f32 %v1942_v0, %v1918_v57  ;;  %v2008_v10 = vadd.f32 %v2000_v59, %v1976_v62  ;;  %v2007_v52 = vadd.f32 %v1999_v32, %v1975_v61  ;;  %v5033_v32 = vld [vmem:[%s5431_s1 + $0x40] sm:$0xff]  ;;  %v5050_v20 = vld [vmem:[%s5431_s1 + $0x50] sm:$0xff]  ;;  %v5621_v57 = vld [vmem:[#allocation54_spill] sm:$0xff] }
 0x4df   : > { %v2560_v18 = vpop.permute.xlu1 %2559  ;;  %v2634_v48 = vmul.f32 %v4950_v36, %v3738_v45  ;;  %v2644_v0 = vadd.f32 %v2636_v21, %v2612_v42  ;;  %v2666_v36 = vmul.f32 %v5619_v11, %v3750_v55  ;;  %v5631_v11 = vld [vmem:[#allocation41_spill] sm:$0xff] }
 0x4e0   : > { %v1981_v58 = vadd.f32 %v1973_v19, %v1949_v14  ;;  %v1982_v2 = vadd.f32 %v1974_v26, %v1950_v23  ;;  %976 = vperm.xlu0 %3378, %v5021_v25   ;;  %v2577_v41 = vmul.f32 %v2560_v18, %v5610_v12  ;;  %v2578_v34 = vmul.f32 %v2560_v18, %v3732_v40 }
 0x4e1   : > { %v3218_v59 = vpack.c.bf16 %v2010_v8, %v2008_v10  ;;  %v3220_v9 = vpack.c.bf16 %v2009_v3, %v2007_v52  ;;  %v2676_v56 = vadd.f32 %v2668_v49, %v2644_v0  ;;  %v2640_v23 = vmul.f32 %v5607_v4, %v3738_v45  ;;  %v5622_v52 = vld [vmem:[#allocation49_spill] sm:$0xff]  ;;  %v5077_v0 = vld [vmem:[%s5431_s1 + $0x68] sm:$0xff] }
 0x4e2   : > { %v5035_v60 = vpop.eup %3471  ;;  %v2609_v19 = vadd.f32 %v2601_v46, %v2577_v41  ;;  %v2610_v26 = vadd.f32 %v2602_v24, %v2578_v34  ;;  %v2014_v30 = vadd.f32 %v2006_v16, %v1982_v2  ;;  %v2013_v6 = vadd.f32 %v2005_v1, %v1981_v58  ;;  %v5623_v2 = vld [vmem:[#allocation10_spill] sm:$0xff] }
 0x4e3   : > { %v3474_v29 = vpop.eup %3473  ;;  %3219 = vmatprep.subr.bf16.mxu1 %v3218_v59  ;;  %v2575_v47 = vpop.permute.xlu1 %2574  ;;  %v2671_v42 = vmul.f32 %v5622_v52, %v3748_v54  ;;  %v5624_v34 = vmov 2   ;;  %v5626_v59 = vld [vmem:[#allocation36_spill] sm:$0xff] }
 0x4e4   : > { %v2641_v61 = vadd.f32 %v2633_v35, %v2609_v19  ;;  %v2642_v62 = vadd.f32 %v2634_v48, %v2610_v26  ;;  %1637 = vperm.xlu0 %3378, %v5033_v32   ;;  %3221 = vmatpush1.bf16.xpose.msra.mxu1 %v3220_v9  ;;  %v2583_v1 = vmul.f32 %v2575_v47, %v5610_v12  ;;  %v5627_v9 = vld [vmem:[#allocation35_spill] sm:$0xff]  ;;  %v5086_v19 = vld [vmem:[%s5431_s1 + $0x48] sm:$0xff]  ;;  %v5628_v26 = vmov 1  }
 0x4e5   : > { %v2584_v16 = vmul.f32 %v2575_v47, %v3732_v40  ;;  %v2717_v46 = vadd.f32 %v3474_v29, %v5035_v60  ;;  %v3222_v15 = vpack.c.bf16 %v2014_v30, %v5620_v5  ;;  %v3224_v24 = vpack.c.bf16 %v2013_v6, %v5621_v57  ;;  %v5629_v30 = vld [vmem:[#allocation38_spill] sm:$0xff]  ;;  %v5630_v6 = vld [vmem:[#allocation37_spill] sm:$0xff] }
 0x4e6   : > { %v2673_v21 = vadd.f32 %v2665_v28, %v2641_v61  ;;  %v2615_v8 = vadd.f32 %v4961_v63, %v2583_v1  ;;  %v2674_v14 = vadd.f32 %v2666_v36, %v2642_v62  ;;  %v2672_v63 = vmul.f32 %v5622_v52, %v3750_v55  ;;  %v5632_v28 = vld [vmem:[#allocation40_spill] sm:$0xff]  ;;  %v965_v36 = vld [vmem:[%s5431_s1 + $0x20] sm:$0xff] }
 0x4e7   : > { %v2616_v10 = vadd.f32 %v4965_v7, %v2584_v16  ;;  %2718 = vadd.xlane.f32.xlu1 %v2717_v46  ;;  %3223 = vmatprep.subr.bf16.mxu1 %v3222_v15  ;;  %v5067_v7 = vld [vmem:[%s5431_s1 + $0x38] sm:$0xff] }
 0x4e8   : > { %v2647_v35 = vadd.f32 %v4969_v27, %v2615_v8  ;;  %1647 = vperm.xlu0 %3378, %v5050_v20   ;;  %v3234_v17 = vpack.c.bf16 %v2676_v56, %v2674_v14  ;;  %v3236_v18 = vpack.c.bf16 %v2675_v31, %v2673_v21  ;;  %v5625_v27 = vld [vmem:[#allocation57_spill] sm:$0xff] }
 0x4e9   : > { %v2648_v3 = vadd.f32 %v2640_v23, %v2616_v10 }
 0x4ea   : > { %v2679_v58 = vadd.f32 %v2671_v42, %v2647_v35  ;;  %v1396_v42 = vpop.xlane.xlu0 %1395 }
 0x4eb   : > { %v2680_v4 = vadd.f32 %v2672_v63, %v2648_v3 }
 0x4ec   : > { %3225 = vmatpush1.bf16.xpose.msra.mxu1 %v3224_v24  ;;  %v3240_v41 = vpack.c.bf16 %v2679_v58, %v5623_v2  ;;  %3389 = vset.pattern.permute.xlu0 %v5624_v34 }
 0x4ed   : > { %3235 = vmatprep.subr.bf16.mxu1 %v3234_v17  ;;  %v3238_v48 = vpack.c.bf16 %v2680_v4, %v5625_v27  ;;  %1042 = vperm.xlu0 %3389, %v5067_v7  }
 0x4f1   : > { %1704 = vperm.xlu0 %3389, %v5050_v20  }
 0x4f3   : > { %2132 = vmatmul.mubr.f32.vlgmr.msra.gmra.mrb[16].mxu1 %v4909_v50  ;;  %v5095_v50 = vld [vmem:[%s5431_s1 + $0x58] sm:$0xff] }
 0x4f4   : > { %2136 = vmatprep.mubr.f32.mxu1 %v5626_v59  ;;  %3237 = vmatpush1.bf16.xpose.msra.mxu1 %v3236_v18 }
 0x4f5   : > { %3239 = vmatprep.subr.bf16.mxu1 %v3238_v48  ;;  %2366 = vperm.xlu0 %3389, %v5077_v0  }
 0x4f7   : > { %2137 = vmatmul.mubr.f32.gmra.mrb[18].mxu1 %v5627_v9 }
 0x4f8   : > { %2141 = vmatprep.mubr.f32.mxu1 %v4927_v43  ;;  %v5103_v43 = vld [vmem:[%s5431_s1 + $0x60] sm:$0xff] }
 0x4f9   : > { %3398 = vset.pattern.permute.xlu0 %v5628_v26 }
 0x4fa   : > { %1668 = vperm.xlu0 %3398, %v5086_v19  }
 0x4fb   : > { %2142 = vmatmul.mubr.f32.gmra.mrb[20].mxu1 %v4922_v39  ;;  %v5110_v39 = vld [vmem:[%s5431_s1 + $0x70] sm:$0xff] }
 0x4fc   : > { %2146 = vmatprep.mubr.f32.mxu1 %v5629_v30  ;;  %3241 = vmatpush1.bf16.xpose.msra.mxu1 %v3240_v41 }
 0x4fe   : > { %1676 = vperm.xlu0 %3398, %v5095_v50  }
 0x4ff   : > { %2147 = vmatmul.mubr.f32.gmra.mrb[22].mxu1 %v5630_v6 }
 0x500   : > { %2797 = vmatprep.mubr.f32.mxu1 %v3474_v29  ;;  %v5633_v29 = vmov 3  }
 0x502   : > { %2330 = vperm.xlu0 %3398, %v5103_v43  }
 0x503   : > { %2798 = vmatmul.mubr.f32.vlgmr.msra.gmra.mrb[24].mxu1 %v5035_v60 }
 0x504   : > { %2802 = vmatprep.mubr.f32.mxu1 %v5631_v11  ;;  %v2056_v11 = vpop.xlane.xlu0 %2055 }
 0x506   : > { %2338 = vperm.xlu0 %3398, %v5110_v39  }
 0x507   : > { %2803 = vmatmul.mubr.f32.gmra.mrb[26].mxu1 %v5632_v28 }
 0x508   : > { %v2062_v28 = vpop.xlane.xlu0 %2061 }
 0x50a   : > { %3400 = vset.pattern.permute.xlu0 %v5633_v29 }
 0x50b   : > { %1062 = vperm.xlu0 %3400, %v965_v36  }
 0x50f   : > { %1740 = vperm.xlu0 %3400, %v5095_v50  }
 0x513   : > { %2398 = vperm.xlu0 %3400, %v5077_v0  }
 0x514   : > { %v2689_v60 = vpop.xlane.xlu1 %2688 }
 0x515   : > { %v2697_v49 = vsub.f32 %v4855_v22, %v2689_v60  ;;  %v2698_v31 = vsub.f32 %v4858_v51, %v2689_v60  ;;  %v967_v22 = vld [vmem:[%s5431_s1 + $0x30] sm:$0xff]  ;;  %v5634_v51 = vmov 0  }
 0x517   : > { %v2709_v47 = vmul.f32 1.442695, %v2697_v49  ;;  %v2711_v61 = vmul.f32 1.442695, %v2698_v31  ;;  %2402 = vperm.xlu0 %3400, %v5110_v39  }
 0x518   : > { %v1387_v46 = vpop.xlane.xlu1 %1386 }
 0x519   : > { %3475 = vpow2.f32 %v2709_v47 }
 0x51a   : > { %3477 = vpow2.f32 %v2711_v61 }
 0x51b   : > { %3479 = vrcp.f32 %v1387_v46 }
 0x51c   : > { %v1390_v8 = vpop.xlane.xlu1 %1389 }
 0x51d   : > { %3481 = vrcp.f32 %v1390_v8 }
 0x520   : > { %v1393_v52 = vpop.xlane.xlu1 %1392 }
 0x521   : > { %3483 = vrcp.f32 %v1393_v52 }
 0x522   : > { %3485 = vrcp.f32 %v1396_v42 }
 0x523   : > { %v3476_v62 = vpop.eup %3475 }
 0x524   : > { %v3478_v1 = vpop.eup %3477 }
 0x525   : > { %2807 = vmatprep.mubr.f32.mxu1 %v3478_v1  ;;  %v2723_v16 = vadd.f32 %v3478_v1, %v3476_v62  ;;  %v3480_v35 = vpop.eup %3479 }
 0x526   : > { %2808 = vmatmul.mubr.f32.gmra.mrb[28].mxu1 %v3476_v62 }
 0x527   : > { %2812 = vmatprep.mubr.f32.mxu1 %v4946_v13  ;;  %2724 = vadd.xlane.f32.xlu1 %v2723_v16  ;;  %v3482_v3 = vpop.eup %3481 }
 0x52a   : > { %2813 = vmatmul.mubr.f32.gmra.mrb[30].mxu1 %v4944_v53 }
 0x52b   : > { %3066 = vmatprep.mubr.f32.mxu1 %v5592_v33  ;;  %v3484_v2 = vpop.eup %3483 }
 0x52c   : > { %v3486_v59 = vpop.eup %3485 }
 0x538   : > { %971 = vperm.xlu1 %3375, %v965_v36  }
 0x53c   : > { %3379 = vset.pattern.permute.xlu1 %v5628_v26 }
 0x53d   : > { %998 = vperm.xlu1 %3379, %v965_v36  }
 0x541   : > { %1002 = vperm.xlu1 %3379, %v5021_v25  }
 0x545   : > { %3380 = vset.pattern.permute.xlu1 %v5624_v34 }
 0x546   : > { %1030 = vperm.xlu1 %3380, %v965_v36   ;;  %v2722_v36 = vpop.xlane.xlu0 %2721 }
 0x54a   : > { %1034 = vperm.xlu1 %3380, %v5021_v25  }
 0x54e   : > { %3381 = vset.pattern.permute.xlu1 %v5634_v51 }
 0x54f   : > { %981 = vperm.xlu1 %3381, %v967_v22  }
 0x553   : > { %986 = vperm.xlu1 %3381, %v5067_v7  }
 0x557   : > { %3382 = vset.pattern.permute.xlu1 %v5628_v26  ;;  %v5159_v60 = vpop.xlane.xlu0 %2727 }
 0x558   : > { %1006 = vperm.xlu1 %3382, %v967_v22  }
 0x55c   : > { %1010 = vperm.xlu1 %3382, %v5067_v7  }
 0x55f   : > { %v5162_v49 = vpop.permute.xlu0 %976 }
 0x560   : > { %v934_v53 = vpop.f32.mrb[0].mxu1  ;;  %3383 = vset.pattern.permute.xlu1 %v5633_v29 }
 0x561   : > { %v936_v13 = vpop.f32.mrb[1].mxu1  ;;  %1066 = vperm.xlu1 %3383, %v5021_v25  }
 0x564   : > { %v940_v5 = vpop.f32.mrb[2].mxu1 }
 0x565   : > { %v3252_v15 = vpack.c.bf16 %v940_v5, %v934_v53  ;;  %v942_v57 = vpop.f32.mrb[3].mxu1  ;;  %3384 = vset.pattern.permute.xlu1 %v5624_v34 }
 0x566   : > { %v3250_v24 = vpack.c.bf16 %v942_v57, %v936_v13  ;;  %1038 = vperm.xlu1 %3384, %v967_v22  }
 0x568   : > { %v946_v56 = vpop.f32.mrb[4].mxu1  ;;  %3251 = vmatprep.subr.bf16.mxu1 %v3250_v24 }
 0x569   : > { %v948_v21 = vpop.f32.mrb[5].mxu1  ;;  %3253 = vmatpush1.bf16.msra.mxu1 %v3252_v15 }
 0x56a   : > { %3385 = vset.pattern.permute.xlu1 %v5633_v29 }
 0x56b   : > { %1070 = vperm.xlu1 %3385, %v967_v22  }
 0x56c   : > { %v952_v14 = vpop.f32.mrb[6].mxu1 }
 0x56d   : > { %v3256_v23 = vpack.c.bf16 %v952_v14, %v946_v56  ;;  %v954_v25 = vpop.f32.mrb[7].mxu1 }
 0x56e   : > { %v3254_v10 = vpack.c.bf16 %v954_v25, %v948_v21 }
 0x56f   : > { %1074 = vperm.xlu1 %3385, %v5067_v7  }
 0x570   : > { %3255 = vmatprep.subr.bf16.mxu1 %v3254_v10 }
 0x571   : > { %3257 = vmatpush1.bf16.msra.mxu1 %v3256_v23 }
 0x573   : > { %3386 = vset.pattern.permute.xlu1 %v5634_v51 }
 0x574   : > { %1642 = vperm.xlu1 %3386, %v5086_v19  }
 0x575   : > { %v1467_v17 = vpop.f32.mrb[8].mxu1 }
 0x576   : > { %v1486_v18 = vmul.f32 %v3480_v35, %v1467_v17  ;;  %v1469_v63 = vpop.f32.mrb[9].mxu1 }
 0x578   : > { %3387 = vset.pattern.permute.xlu1 %v5628_v26  ;;  %1490 = vxpose.xlu0.b32.start [1/4] (short) (narrow) %v1486_v18, 32 }
 0x579   : > { %v1472_v58 = vpop.f32.mrb[10].mxu1  ;;  %1664 = vperm.xlu1 %3387, %v5033_v32  }
 0x57a   : > { %v1487_v7 = vmul.f32 %v3482_v3, %v1472_v58  ;;  %v1474_v4 = vpop.f32.mrb[11].mxu1 }
 0x57c   : > { %1491 = vxpose.xlu0.b32.cont [2/4] (short) (narrow) %v1487_v7, 32 }
 0x57d   : > { %v1477_v41 = vpop.f32.mrb[12].mxu1  ;;  %3388 = vset.pattern.permute.xlu1 %v5624_v34 }
 0x57e   : > { %v1488_v27 = vmul.f32 %v3484_v2, %v1477_v41  ;;  %v1479_v48 = vpop.f32.mrb[13].mxu1  ;;  %1696 = vperm.xlu1 %3388, %v5033_v32  }
 0x580   : > { %1492 = vxpose.xlu0.b32.cont [3/4] (short) (narrow) %v1488_v27, 32 }
 0x581   : > { %v1482_v9 = vpop.f32.mrb[14].mxu1 }
 0x582   : > { %v1489_v30 = vmul.f32 %v3486_v59, %v1482_v9  ;;  %v1484_v6 = vpop.f32.mrb[15].mxu1  ;;  %1700 = vperm.xlu1 %3388, %v5086_v19  }
 0x584   : > { %1493 = vxpose.xlu0.b32.end [4/4] (short) (narrow) %v1489_v30, 32 }
 0x586   : > { %3390 = vset.pattern.permute.xlu1 %v5634_v51 }
 0x587   : > { %1652 = vperm.xlu1 %3390, %v5095_v50  }
 0x58b   : > { %3391 = vset.pattern.permute.xlu1 %v5628_v26 }
 0x58c   : > { %1672 = vperm.xlu1 %3391, %v5050_v20  }
 0x590   : > { %3392 = vset.pattern.permute.xlu1 %v5633_v29 }
 0x591   : > { %1728 = vperm.xlu1 %3392, %v5033_v32   ;;  %v5167_v32 = vpop.permute.xlu0 %1637 }
 0x595   : > { %1732 = vperm.xlu1 %3392, %v5086_v19   ;;  %v2053_v19 = vpop.xlane.xlu1 %2052  ;;  %v5170_v31 = vpop.permute.xlu0 %1647 }
 0x596   : > { %3487 = vrcp.f32 %v2053_v19 }
 0x597   : > { %3489 = vrcp.f32 %v2056_v11 }
 0x598   : > { %3491 = vrcp.f32 %v2062_v28 }
 0x599   : > { %3393 = vset.pattern.permute.xlu1 %v5624_v34  ;;  %v5176_v47 = vpop.permute.xlu0 %1042 }
 0x59a   : > { %1708 = vperm.xlu1 %3393, %v5095_v50   ;;  %v5172_v50 = vpop.xlane.xlu1 %2058 }
 0x59d   : > { %v5182_v62 = vpop.permute.xlu0 %1704 }
 0x59e   : > { %3394 = vset.pattern.permute.xlu1 %v5633_v29 }
 0x59f   : > { %1736 = vperm.xlu1 %3394, %v5050_v20   ;;  %v2719_v20 = vpop.xlane.xlu1 %2718 }
 0x5a0   : > { %v3488_v5 = vpop.eup %3487  ;;  %3493 = vrcp.f32 %v2719_v20 }
 0x5a1   : > { %v5189_v16 = vpop.permute.xlu0 %2366  ;;  %v3490_v21 = vpop.eup %3489  ;;  %3495 = vrcp.f32 %v2722_v36 }
 0x5a2   : > { %v3492_v42 = vpop.eup %3491 }
 0x5a3   : > { %3395 = vset.pattern.permute.xlu1 %v5634_v51 }
 0x5a4   : > { %2303 = vperm.xlu1 %3395, %v5103_v43  }
 0x5a5   : > { %v5192_v13 = vpop.permute.xlu0 %1668 }
 0x5a8   : > { %2308 = vperm.xlu1 %3395, %v5077_v0  }
 0x5a9   : > { %v5196_v57 = vpop.permute.xlu0 %1676 }
 0x5aa   : > { %v3494_v63 = vpop.eup %3493 }
 0x5ab   : > { %v3496_v27 = vpop.eup %3495 }
 0x5ac   : > { %3396 = vset.pattern.permute.xlu1 %v5628_v26 }
 0x5ad   : > { %2334 = vperm.xlu1 %3396, %v5077_v0   ;;  %v2300_v0 = vld [vmem:[%s5431_s1 + $0x78] sm:$0xff] }
 0x5b1   : > { %3397 = vset.pattern.permute.xlu1 %v5624_v34 }
 0x5b2   : > { %2362 = vperm.xlu1 %3397, %v5103_v43  }
 0x5b4   : > { %v5180_v61 = vpop.xlane.xlu1 %2724 }
 0x5b5   : > { %3497 = vrcp.f32 %v5180_v61 }
 0x5b6   : > { %3399 = vset.pattern.permute.xlu1 %v5634_v51  ;;  %3499 = vrcp.f32 %v5159_v60 }
 0x5b7   : > { %2313 = vperm.xlu1 %3399, %v5110_v39   ;;  %3501 = vrcp.f32 %v5172_v50 }
 0x5b8   : > { %v972_v1 = vpop.permute.xlu1 %971 }
 0x5b9   : > { %v990_v48 = vmul.f32 %v972_v1, %v3732_v40 }
 0x5bb   : > { %2318 = vperm.xlu1 %3399, %v2300_v0  }
 0x5bc   : > { %v999_v22 = vpop.permute.xlu1 %998 }
 0x5bd   : > { %v1013_v2 = vmul.f32 %v999_v22, %v3726_v37  ;;  %v1014_v41 = vmul.f32 %v999_v22, %v3728_v38  ;;  %v992_v22 = vmul.f32 %v5162_v49, %v3732_v40 }
 0x5bf   : > { %3401 = vset.pattern.permute.xlu1 %v5628_v26 }
 0x5c0   : > { %2342 = vperm.xlu1 %3401, %v2300_v0   ;;  %v1003_v53 = vpop.permute.xlu1 %1002 }
 0x5c1   : > { %v1015_v59 = vmul.f32 %v1003_v53, %v3726_v37  ;;  %v1016_v6 = vmul.f32 %v1003_v53, %v3728_v38 }
 0x5c4   : > { %3402 = vset.pattern.permute.xlu1 %v5633_v29 }
 0x5c5   : > { %2394 = vperm.xlu1 %3402, %v5103_v43   ;;  %v1031_v46 = vpop.permute.xlu1 %1030  ;;  %v5204_v43 = vpop.permute.xlu0 %2330 }
 0x5c6   : > { %v2133_v15 = vpop.f32.mrb[16].mxu1  ;;  %v1045_v11 = vmul.f32 %v1031_v46, %v3736_v44  ;;  %v1046_v28 = vmul.f32 %v1031_v46, %v3738_v45 }
 0x5c7   : > { %v5198_v24 = vmul.f32 %v3488_v5, %v2133_v15  ;;  %v2135_v56 = vpop.f32.mrb[17].mxu1  ;;  %v1022_v5 = vadd.f32 %v1014_v41, %v990_v48 }
 0x5c9   : > { %3403 = vset.pattern.permute.xlu1 %v5624_v34  ;;  %v1035_v26 = vpop.permute.xlu1 %1034  ;;  %v5213_v18 = vpop.permute.xlu0 %2338 }
 0x5ca   : > { %v2138_v8 = vpop.f32.mrb[18].mxu1  ;;  %2370 = vperm.xlu1 %3403, %v5110_v39   ;;  %v1047_v15 = vmul.f32 %v1035_v26, %v3736_v44  ;;  %v1048_v56 = vmul.f32 %v1035_v26, %v3738_v45 }
 0x5cb   : > { %v5202_v14 = vmul.f32 %v3490_v21, %v2138_v8  ;;  %v2140_v23 = vpop.f32.mrb[19].mxu1  ;;  %v1024_v8 = vadd.f32 %v1016_v6, %v992_v22 }
 0x5cd   : > { %v1063_v9 = vpop.permute.xlu0 %1062 }
 0x5ce   : > { %v5206_v25 = vpop.f32.mrb[20].mxu1  ;;  %2374 = vperm.xlu1 %3403, %v2300_v0   ;;  %v5208_v10 = vpop.permute.xlu1 %981  ;;  %v1077_v53 = vmul.f32 %v1063_v9, %v3748_v54  ;;  %v1078_v46 = vmul.f32 %v1063_v9, %v3750_v55 }
 0x5cf   : > { %v2145_v52 = vpop.f32.mrb[21].mxu1  ;;  %v993_v22 = vmul.f32 %v5208_v10, %v5610_v12 }
 0x5d0   : > { %v1054_v52 = vadd.f32 %v1046_v28, %v1022_v5  ;;  %v1051_v28 = vmul.f32 %v5176_v47, %v3736_v44 }
 0x5d2   : > { %v2148_v34 = vpop.f32.mrb[22].mxu1  ;;  %3404 = vset.pattern.permute.xlu1 %v5633_v29  ;;  %v987_v35 = vpop.permute.xlu1 %986  ;;  %v989_v29 = vmul.f32 %v972_v1, %v5610_v12 }
 0x5d3   : > { %v5211_v17 = vmul.f32 %v3492_v42, %v2148_v34  ;;  %v2150_v39 = vpop.f32.mrb[23].mxu1  ;;  %2406 = vperm.xlu1 %3404, %v2300_v0   ;;  %v991_v0 = vmul.f32 %v5162_v49, %v5610_v12  ;;  %v995_v9 = vmul.f32 %v987_v35, %v5610_v12 }
 0x5d4   : > { %v1021_v1 = vadd.f32 %v1013_v2, %v989_v29  ;;  %v1056_v39 = vadd.f32 %v1048_v56, %v1024_v8 }
 0x5d5   : > { %v1023_v21 = vadd.f32 %v1015_v59, %v991_v0  ;;  %v5235_v59 = vpop.permute.xlu0 %1740 }
 0x5d6   : > { %v2799_v3 = vpop.f32.mrb[24].mxu1  ;;  %v1053_v23 = vadd.f32 %v1045_v11, %v1021_v1 }
 0x5d7   : > { %v2818_v58 = vmul.f32 %v3494_v63, %v2799_v3  ;;  %v2801_v7 = vpop.f32.mrb[25].mxu1  ;;  %v1007_v4 = vpop.permute.xlu1 %1006  ;;  %v1055_v34 = vadd.f32 %v1047_v15, %v1023_v21 }
 0x5d8   : > { %v1085_v3 = vadd.f32 %v1077_v53, %v1053_v23  ;;  %v1017_v6 = vmul.f32 %v1007_v4, %v3726_v37  ;;  %v1018_v11 = vmul.f32 %v1007_v4, %v3728_v38 }
 0x5d9   : > { %2822 = vxpose.xlu0.b32.start [1/4] (short) (narrow) %v2818_v58, 32  ;;  %v1086_v58 = vadd.f32 %v1078_v46, %v1054_v52  ;;  %v5251_v4 = vpop.permute.xlu0 %2398 }
 0x5da   : > { %v2804_v30 = vpop.f32.mrb[26].mxu1  ;;  %v1025_v15 = vadd.f32 %v1017_v6, %v993_v22  ;;  %v1660_v22 = vmul.f32 %v5170_v31, %v3732_v40 }
 0x5db   : > { %v2819_v36 = vmul.f32 %v3496_v27, %v2804_v30  ;;  %v2806_v19 = vpop.f32.mrb[27].mxu1  ;;  %v1011_v20 = vpop.permute.xlu1 %1010  ;;  %v996_v30 = vmul.f32 %v987_v35, %v3732_v40  ;;  %v994_v35 = vmul.f32 %v5208_v10, %v3732_v40 }
 0x5dc   : > { %v1019_v29 = vmul.f32 %v1011_v20, %v3726_v37  ;;  %v1020_v48 = vmul.f32 %v1011_v20, %v3728_v38 }
 0x5dd   : > { %2823 = vxpose.xlu0.b32.cont [2/4] (short) (narrow) %v2819_v36, 32  ;;  %v1052_v36 = vmul.f32 %v5176_v47, %v3738_v45  ;;  %v1026_v56 = vadd.f32 %v1018_v11, %v994_v35 }
 0x5de   : > { %v1027_v19 = vadd.f32 %v1019_v29, %v995_v9  ;;  %v1028_v20 = vadd.f32 %v1020_v48, %v996_v30 }
 0x5e0   : > { %v1067_v42 = vpop.permute.xlu1 %1066  ;;  %v1059_v46 = vadd.f32 %v1051_v28, %v1027_v19  ;;  %v1060_v21 = vadd.f32 %v1052_v36, %v1028_v20 }
 0x5e1   : > { %v1079_v49 = vmul.f32 %v1067_v42, %v3748_v54  ;;  %v1080_v63 = vmul.f32 %v1067_v42, %v3750_v55 }
 0x5e3   : > { %v1087_v7 = vadd.f32 %v1079_v49, %v1055_v34  ;;  %v1088_v26 = vadd.f32 %v1080_v63, %v1056_v39 }
 0x5e5   : > { %v3212_v2 = vpack.c.bf16 %v1087_v7, %v1085_v3  ;;  %v1039_v41 = vpop.permute.xlu1 %1038  ;;  %v3210_v27 = vpack.c.bf16 %v1088_v26, %v1086_v58  ;;  %v5258_v3 = vpop.permute.xlu0 %2402 }
 0x5e6   : > { %v1049_v1 = vmul.f32 %v1039_v41, %v3736_v44  ;;  %v1050_v5 = vmul.f32 %v1039_v41, %v3738_v45  ;;  %v3498_v26 = vpop.eup %3497 }
 0x5e7   : > { %3211 = vmatprep.subr.bf16.mxu0 %v3210_v27  ;;  %v3500_v9 = vpop.eup %3499 }
 0x5e8   : > { %3213 = vmatpush1.bf16.msra.mxu0 %v3212_v2  ;;  %v1057_v23 = vadd.f32 %v1049_v1, %v1025_v15  ;;  %v1058_v52 = vadd.f32 %v1050_v5, %v1026_v56  ;;  %v3502_v36 = vpop.eup %3501  ;;  %v1716_v1 = vmul.f32 %v5182_v62, %v3738_v45  ;;  %v1656_v56 = vmul.f32 %v5167_v32, %v3732_v40 }
 0x5ea   : > { %v1071_v0 = vpop.permute.xlu1 %1070 }
 0x5eb   : > { %v1081_v53 = vmul.f32 %v1071_v0, %v3748_v54  ;;  %v1082_v47 = vmul.f32 %v1071_v0, %v3750_v55 }
 0x5ed   : > { %v1089_v34 = vadd.f32 %v1081_v53, %v1057_v23  ;;  %v1090_v39 = vadd.f32 %v1082_v47, %v1058_v52 }
 0x5ee   : > { %v1075_v8 = vpop.permute.xlu1 %1074 }
 0x5ef   : > { %v1083_v10 = vmul.f32 %v1075_v8, %v3748_v54  ;;  %v1084_v42 = vmul.f32 %v1075_v8, %v3750_v55 }
 0x5f1   : > { %v1091_v49 = vadd.f32 %v1083_v10, %v1059_v46  ;;  %v1092_v63 = vadd.f32 %v1084_v42, %v1060_v21  ;;  %v1681_v21 = vmul.f32 %v5192_v13, %v3726_v37 }
 0x5f3   : > { %v3216_v58 = vpack.c.bf16 %v1091_v49, %v1089_v34  ;;  %v1643_v7 = vpop.permute.xlu1 %1642  ;;  %v3214_v61 = vpack.c.bf16 %v1092_v63, %v1090_v39 }
 0x5f4   : > { %v1657_v8 = vmul.f32 %v1643_v7, %v5610_v12  ;;  %v1658_v23 = vmul.f32 %v1643_v7, %v3732_v40 }
 0x5f5   : > { %3215 = vmatprep.subr.bf16.mxu0 %v3214_v61 }
 0x5f6   : > { %3217 = vmatpush1.bf16.msra.mxu0 %v3216_v58  ;;  %v1689_v61 = vadd.f32 %v1681_v21, %v1657_v8  ;;  %v2345_v8 = vmul.f32 %v5204_v43, %v3726_v37 }
 0x5f8   : > { %v1665_v2 = vpop.permute.xlu1 %1664  ;;  %v1506_v41 = vpop.trf.xlu0 }
 0x5f9   : > { %v2809_v27 = vpop.f32.mrb[28].mxu1  ;;  %3167 = vmatmul.mubr.msk.f32.vlgmr.msra.gmra.mrb[8].mxu0 %vm855_vm0, %v1506_v41  ;;  %v1679_v53 = vmul.f32 %v1665_v2, %v3726_v37 }
 0x5fa   : > { %v2820_v29 = vmul.f32 %v3498_v26, %v2809_v27  ;;  %v2811_v48 = vpop.f32.mrb[29].mxu1  ;;  %1604 = vmatprep.mubr.f32.mxu0 %v5592_v33 }
 0x5fc   : > { %2156 = vxpose.xlu1.b32.start [1/4] (short) (narrow) %v5198_v24, 32  ;;  %2824 = vxpose.xlu0.b32.cont [3/4] (short) (narrow) %v2820_v29, 32  ;;  %v1507_v60 = vpop.trf.xlu0  ;;  %v2154_v24 = vmul.f32 %v3502_v36, %v5206_v25  ;;  %v1715_v25 = vmul.f32 %v5182_v62, %v3736_v44  ;;  %v1682_v62 = vmul.f32 %v5192_v13, %v3728_v38 }
 0x5fd   : > { %v2814_v30 = vpop.f32.mrb[30].mxu1  ;;  %v1697_v6 = vpop.permute.xlu1 %1696  ;;  %3168 = vmatmul.mubr.msk.f32.gmra.mrb[10].mxu0 %vm855_vm0, %v1507_v60 }
 0x5fe   : > { %v2821_v50 = vmul.f32 %v3500_v9, %v2814_v30  ;;  %v2816_v11 = vpop.f32.mrb[31].mxu1  ;;  %1610 = vmatprep.mubr.f32.mxu0 %v5592_v33  ;;  %v1711_v52 = vmul.f32 %v1697_v6, %v3736_v44  ;;  %v1690_v26 = vadd.f32 %v1682_v62, %v1658_v23  ;;  %v1685_v30 = vmul.f32 %v5196_v57, %v3726_v37 }
 0x600   : > { %2157 = vxpose.xlu1.b32.cont [2/4] (short) (narrow) %v5202_v14, 32  ;;  %2825 = vxpose.xlu0.b32.end [4/4] (short) (narrow) %v2821_v50, 32  ;;  %v1508_v28 = vpop.trf.xlu0  ;;  %v1659_v14 = vmul.f32 %v5170_v31, %v5610_v12  ;;  %v1680_v31 = vmul.f32 %v1665_v2, %v3728_v38 }
 0x601   : > { %v1701_v19 = vpop.permute.xlu1 %1700  ;;  %3169 = vmatmul.mubr.msk.f32.gmra.mrb[12].mxu0 %vm855_vm0, %v1508_v28 }
 0x602   : > { %1616 = vmatprep.mubr.f32.mxu0 %v5592_v33  ;;  %v1713_v39 = vmul.f32 %v1701_v19, %v3736_v44  ;;  %v1714_v49 = vmul.f32 %v1701_v19, %v3738_v45  ;;  %v1688_v58 = vadd.f32 %v1680_v31, %v1656_v56 }
 0x604   : > { %2158 = vxpose.xlu1.b32.cont [3/4] (short) (narrow) %v2154_v24, 32  ;;  %v1509_v20 = vpop.trf.xlu0  ;;  %v1721_v29 = vadd.f32 %v1713_v39, %v1689_v61  ;;  %v1722_v48 = vadd.f32 %v1714_v49, %v1690_v26  ;;  %v2379_v61 = vmul.f32 %v5189_v16, %v3736_v44  ;;  %v2380_v26 = vmul.f32 %v5189_v16, %v3738_v45 }
 0x605   : > { %3170 = vmatmul.mubr.msk.f32.gmra.mrb[14].mxu0 %vm855_vm0, %v1509_v20  ;;  %v2346_v16 = vmul.f32 %v5204_v43, %v3728_v38 }
 0x606   : > { %v1653_v0 = vpop.permute.xlu1 %1652  ;;  %2264 = vmatprep.mubr.f32.mxu0 %v5592_v33 }
 0x607   : > { %v1661_v50 = vmul.f32 %v1653_v0, %v5610_v12  ;;  %v1662_v11 = vmul.f32 %v1653_v0, %v3732_v40  ;;  %v1750_v0 = vmul.f32 %v5235_v59, %v3750_v55 }
 0x608   : > { %2159 = vxpose.xlu1.b32.end [4/4] (short) (narrow) %v5211_v17, 32  ;;  %v1655_v17 = vmul.f32 %v5167_v32, %v5610_v12  ;;  %v1712_v32 = vmul.f32 %v1697_v6, %v3738_v45  ;;  %v1686_v6 = vmul.f32 %v5196_v57, %v3728_v38  ;;  %v1749_v57 = vmul.f32 %v5235_v59, %v3748_v54 }
 0x60a   : > { %v1687_v63 = vadd.f32 %v1679_v53, %v1655_v17  ;;  %v1720_v41 = vadd.f32 %v1712_v32, %v1688_v58 }
 0x60b   : > { %v1673_v35 = vpop.permute.xlu1 %1672 }
 0x60c   : > { %v1683_v5 = vmul.f32 %v1673_v35, %v3726_v37  ;;  %v1684_v15 = vmul.f32 %v1673_v35, %v3728_v38  ;;  %v1719_v7 = vadd.f32 %v1711_v52, %v1687_v63 }
 0x60e   : > { %v1691_v47 = vadd.f32 %v1683_v5, %v1659_v14  ;;  %v1692_v46 = vadd.f32 %v1684_v15, %v1660_v22  ;;  %v1694_v5 = vadd.f32 %v1686_v6, %v1662_v11 }
 0x610   : > { %v1729_v10 = vpop.permute.xlu1 %1728  ;;  %v1723_v42 = vadd.f32 %v1715_v25, %v1691_v47  ;;  %v1724_v34 = vadd.f32 %v1716_v1, %v1692_v46  ;;  %v1693_v1 = vadd.f32 %v1685_v30, %v1661_v50 }
 0x611   : > { %v1743_v13 = vmul.f32 %v1729_v10, %v3748_v54  ;;  %v1744_v2 = vmul.f32 %v1729_v10, %v3750_v55 }
 0x613   : > { %v1751_v28 = vadd.f32 %v1743_v13, %v1719_v7  ;;  %v1752_v36 = vadd.f32 %v1744_v2, %v1720_v41  ;;  %v2411_v13 = vmul.f32 %v5251_v4, %v3748_v54 }
 0x614   : > { %v1733_v27 = vpop.permute.xlu1 %1732 }
 0x615   : > { %v1745_v60 = vmul.f32 %v1733_v27, %v3748_v54  ;;  %v1746_v9 = vmul.f32 %v1733_v27, %v3750_v55 }
 0x617   : > { %v1753_v19 = vadd.f32 %v1745_v60, %v1721_v29  ;;  %v1754_v24 = vadd.f32 %v1746_v9, %v1722_v48 }
 0x619   : > { %v3228_v20 = vpack.c.bf16 %v1753_v19, %v1751_v28  ;;  %v1709_v14 = vpop.permute.xlu1 %1708  ;;  %v3226_v22 = vpack.c.bf16 %v1754_v24, %v1752_v36 }
 0x61a   : > { %v1717_v35 = vmul.f32 %v1709_v14, %v3736_v44  ;;  %v1718_v25 = vmul.f32 %v1709_v14, %v3738_v45 }
 0x61b   : > { %3227 = vmatprep.subr.bf16.mxu0 %v3226_v22 }
 0x61c   : > { %3229 = vmatpush1.bf16.msra.mxu0 %v3228_v20  ;;  %v1725_v15 = vadd.f32 %v1717_v35, %v1693_v1  ;;  %v1726_v17 = vadd.f32 %v1718_v25, %v1694_v5 }
 0x61e   : > { %v1737_v56 = vpop.permute.xlu1 %1736  ;;  %v1757_v47 = vadd.f32 %v1749_v57, %v1725_v15  ;;  %v1758_v46 = vadd.f32 %v1750_v0, %v1726_v17  ;;  %v2350_v17 = vmul.f32 %v5213_v18, %v3728_v38 }
 0x61f   : > { %v1747_v53 = vmul.f32 %v1737_v56, %v3748_v54  ;;  %v1748_v31 = vmul.f32 %v1737_v56, %v3750_v55 }
 0x621   : > { %v1755_v21 = vadd.f32 %v1747_v53, %v1723_v42  ;;  %v1756_v62 = vadd.f32 %v1748_v31, %v1724_v34 }
 0x623   : > { %v3232_v23 = vpack.c.bf16 %v1757_v47, %v1755_v21  ;;  %v2304_v52 = vpop.permute.xlu1 %2303  ;;  %v3230_v32 = vpack.c.bf16 %v1758_v46, %v1756_v62 }
 0x624   : > { %v2321_v10 = vmul.f32 %v2304_v52, %v5610_v12  ;;  %v2322_v11 = vmul.f32 %v2304_v52, %v3732_v40 }
 0x625   : > { %3231 = vmatprep.subr.bf16.mxu0 %v3230_v32 }
 0x626   : > { %v2353_v59 = vadd.f32 %v2345_v8, %v2321_v10  ;;  %3233 = vmatpush1.bf16.msra.mxu0 %v3232_v23  ;;  %3405 = vset.pattern.permute.xlu1 %v5634_v51  ;;  %v2354_v36 = vadd.f32 %v2346_v16, %v2322_v11  ;;  %v2349_v23 = vmul.f32 %v5213_v18, %v3726_v37 }
 0x627   : > { %v2309_v39 = vpop.permute.xlu1 %2308 }
 0x628   : > { %v2323_v42 = vmul.f32 %v2309_v39, %v5610_v12  ;;  %v2324_v34 = vmul.f32 %v2309_v39, %v3732_v40 }
 0x629   : > { %3406 = vset.pattern.permute.xlu0 %v5634_v51  ;;  %v2412_v51 = vmul.f32 %v5251_v4, %v3750_v55 }
 0x62c   : > { %v2335_v49 = vpop.permute.xlu1 %2334 }
 0x62d   : > { %v2347_v63 = vmul.f32 %v2335_v49, %v3726_v37  ;;  %v2348_v58 = vmul.f32 %v2335_v49, %v3728_v38  ;;  %v2414_v49 = vmul.f32 %v5258_v3, %v3750_v55 }
 0x62f   : > { %v2355_v2 = vadd.f32 %v2347_v63, %v2323_v42  ;;  %v2356_v7 = vadd.f32 %v2348_v58, %v2324_v34 }
 0x631   : > { %v2387_v41 = vadd.f32 %v2379_v61, %v2355_v2  ;;  %v2388_v27 = vadd.f32 %v2380_v26, %v2356_v7  ;;  %v2363_v29 = vpop.permute.xlu1 %2362 }
 0x632   : > { %v2377_v48 = vmul.f32 %v2363_v29, %v3736_v44  ;;  %v2378_v4 = vmul.f32 %v2363_v29, %v3738_v45 }
 0x633   : > { %v2419_v60 = vadd.f32 %v2411_v13, %v2387_v41  ;;  %v2420_v9 = vadd.f32 %v2412_v51, %v2388_v27 }
 0x634   : > { %v2385_v30 = vadd.f32 %v2377_v48, %v2353_v59  ;;  %v2386_v24 = vadd.f32 %v2378_v4, %v2354_v36 }
 0x636   : > { %v2314_v6 = vpop.permute.xlu1 %2313 }
 0x637   : > { %v2326_v43 = vmul.f32 %v2314_v6, %v3732_v40  ;;  %v2325_v47 = vmul.f32 %v2314_v6, %v5610_v12 }
 0x639   : > { %v2358_v21 = vadd.f32 %v2350_v17, %v2326_v43 }
 0x63a   : > { %v2319_v50 = vpop.permute.xlu1 %2318 }
 0x63b   : > { %v2328_v56 = vmul.f32 %v2319_v50, %v3732_v40  ;;  %v2327_v52 = vmul.f32 %v2319_v50, %v5610_v12 }
 0x63f   : > { %v2343_v28 = vpop.permute.xlu1 %2342 }
 0x640   : > { %v2352_v0 = vmul.f32 %v2343_v28, %v3728_v38  ;;  %v2351_v46 = vmul.f32 %v2343_v28, %v3726_v37  ;;  %v2413_v37 = vmul.f32 %v5258_v3, %v3748_v54 }
 0x642   : > { %v2360_v62 = vadd.f32 %v2352_v0, %v2328_v56  ;;  %v2359_v59 = vadd.f32 %v2351_v46, %v2327_v52 }
 0x644   : > { %v2395_v19 = vpop.permute.xlu1 %2394 }
 0x645   : > { %v2409_v20 = vmul.f32 %v2395_v19, %v3748_v54  ;;  %v2410_v14 = vmul.f32 %v2395_v19, %v3750_v55 }
 0x647   : > { %v2417_v22 = vadd.f32 %v2409_v20, %v2385_v30  ;;  %v2418_v35 = vadd.f32 %v2410_v14, %v2386_v24 }
 0x649   : > { %v3244_v25 = vpack.c.bf16 %v2419_v60, %v2417_v22  ;;  %v3242_v1 = vpack.c.bf16 %v2420_v9, %v2418_v35  ;;  %v2371_v5 = vpop.permute.xlu1 %2370 }
 0x64a   : > { %v2382_v53 = vmul.f32 %v2371_v5, %v3738_v45  ;;  %v2381_v38 = vmul.f32 %v2371_v5, %v3736_v44 }
 0x64b   : > { %3243 = vmatprep.subr.bf16.mxu0 %v3242_v1 }
 0x64c   : > { %v2390_v32 = vadd.f32 %v2382_v53, %v2358_v21 }
 0x64d   : > { %v2375_v57 = vpop.permute.xlu1 %2374 }
 0x64e   : > { %v2384_v31 = vmul.f32 %v2375_v57, %v3738_v45  ;;  %v2383_v40 = vmul.f32 %v2375_v57, %v3736_v44  ;;  %v2357_v45 = vadd.f32 %v2349_v23, %v2325_v47  ;;  %v2422_v58 = vadd.f32 %v2414_v49, %v2390_v32  ;;  %v2963_v23 = vld [vmem:[%s5432_s2] sm:$0xf] }
 0x650   : > { %v2392_v10 = vadd.f32 %v2384_v31, %v2360_v62  ;;  %v2389_v34 = vadd.f32 %v2381_v38, %v2357_v45  ;;  %v2391_v63 = vadd.f32 %v2383_v40, %v2359_v59  ;;  %v3074_v40 = vstv %s3073_s9 }
 0x652   : > { %v2407_v15 = vpop.permute.xlu1 %2406  ;;  %v2421_v61 = vadd.f32 %v2413_v37, %v2389_v34 }
 0x653   : > { %v2416_v8 = vmul.f32 %v2407_v15, %v3750_v55  ;;  %v2415_v39 = vmul.f32 %v2407_v15, %v3748_v54 }
 0x655   : > { %v2424_v42 = vadd.f32 %v2416_v8, %v2392_v10  ;;  %v2423_v12 = vadd.f32 %v2415_v39, %v2391_v63 }
 0x657   : > { %v3246_v44 = vpack.c.bf16 %v2424_v42, %v2422_v58  ;;  %v3248_v26 = vpack.c.bf16 %v2423_v12, %v2421_v61 }
 0x674   : > { %v2838_v51 = vpop.trf.xlu0 }
 0x678   : > { %v2839_v3 = vpop.trf.xlu0 }
 0x67c   : > { %v2172_v18 = vpop.trf.xlu1  ;;  %v2840_v2 = vpop.trf.xlu0 }
 0x67d   : > { %3171 = vmatmul.mubr.msk.f32.vlgmr.msra.gmra.mrb[16].mxu0 %vm855_vm0, %v2172_v18 }
 0x67e   : > { %3245 = vmatpush1.bf16.msra.mxu0 %v3244_v25  ;;  %2270 = vmatprep.mubr.f32.mxu0 %v5592_v33 }
 0x67f   : > { %3247 = vmatprep.subr.bf16.mxu0 %v3246_v44 }
 0x680   : > { %v2173_v13 = vpop.trf.xlu1  ;;  %v2841_v7 = vpop.trf.xlu0 }
 0x681   : > { %3172 = vmatmul.mubr.msk.f32.gmra.mrb[18].mxu0 %vm855_vm0, %v2173_v13 }
 0x682   : > { %3249 = vmatpush1.bf16.msra.mxu0 %v3248_v26  ;;  %2276 = vmatprep.mubr.f32.mxu0 %v5592_v33 }
 0x684   : > { %v2174_v55 = vpop.trf.xlu1 }
 0x685   : > { %3173 = vmatmul.mubr.msk.f32.gmra.mrb[20].mxu0 %vm855_vm0, %v2174_v55 }
 0x686   : > { %2282 = vmatprep.mubr.f32.mxu0 %v5592_v33 }
 0x688   : > { %v2175_v54 = vpop.trf.xlu1 }
 0x689   : > { %3174 = vmatmul.mubr.msk.f32.gmra.mrb[22].mxu0 %vm855_vm0, %v2175_v54 }
 0x68a   : > { %2930 = vmatprep.mubr.f32.mxu0 %v5592_v33 }
 0x68d   : > { %3175 = vmatmul.mubr.msk.f32.vlgmr.msra.gmra.mrb[24].mxu0 %vm855_vm0, %v2838_v51 }
 0x68e   : > { %2936 = vmatprep.mubr.f32.mxu0 %v5592_v33 }
 0x691   : > { %3176 = vmatmul.mubr.msk.f32.gmra.mrb[26].mxu0 %vm855_vm0, %v2839_v3 }
 0x692   : > { %2942 = vmatprep.mubr.f32.mxu0 %v5592_v33 }
 0x695   : > { %3177 = vmatmul.mubr.msk.f32.gmra.mrb[28].mxu0 %vm855_vm0, %v2840_v2 }
 0x696   : > { %2948 = vmatprep.mubr.f32.mxu0 %v5592_v33  ;;  %v2996_v33 = vld [vmem:[%s5433_s3] sm:$0xf] }
 0x697   : > { %2999 = vperm.xlu1 %3405, %v2996_v33  }
 0x699   : > { %3178 = vmatmul.mubr.msk.f32.gmra.mrb[30].mxu0 %vm855_vm0, %v2841_v7 }
 0x6cc   : > { %v1600_v41 = vpop.f32.mrb[8].mxu0 }
 0x6cd   : > { %v1602_v27 = vpop.f32.mrb[9].mxu0 }
 0x6d0   : > { %v1606_v29 = vpop.f32.mrb[10].mxu0 }
 0x6d1   : > { %v3260_v48 = vpack.c.bf16 %v1606_v29, %v1600_v41  ;;  %v1608_v60 = vpop.f32.mrb[11].mxu0 }
 0x6d2   : > { %v3258_v9 = vpack.c.bf16 %v1608_v60, %v1602_v27 }
 0x6d4   : > { %3259 = vmatprep.subr.bf16.mxu1 %v3258_v9  ;;  %v1612_v30 = vpop.f32.mrb[12].mxu0 }
 0x6d5   : > { %3261 = vmatpush1.bf16.msra.mxu1 %v3260_v48  ;;  %v1614_v6 = vpop.f32.mrb[13].mxu0 }
 0x6d8   : > { %v1618_v50 = vpop.f32.mrb[14].mxu0 }
 0x6d9   : > { %v3264_v16 = vpack.c.bf16 %v1618_v50, %v1612_v30  ;;  %v1620_v11 = vpop.f32.mrb[15].mxu0 }
 0x6da   : > { %v3262_v28 = vpack.c.bf16 %v1620_v11, %v1614_v6 }
 0x6dc   : > { %3263 = vmatprep.subr.bf16.mxu1 %v3262_v28 }
 0x6dd   : > { %3265 = vmatpush1.bf16.msra.mxu1 %v3264_v16 }
 0x716   : > { %v3000_v52 = vpop.permute.xlu1 %2999 }
 0x750   : > { %v2266_v4 = vpop.f32.mrb[16].mxu0 }
 0x751   : > { %v2268_v36 = vpop.f32.mrb[17].mxu0 }
 0x754   : > { %v2272_v19 = vpop.f32.mrb[18].mxu0 }
 0x755   : > { %v3268_v24 = vpack.c.bf16 %v2272_v19, %v2266_v4  ;;  %v2274_v20 = vpop.f32.mrb[19].mxu0 }
 0x756   : > { %v3266_v14 = vpack.c.bf16 %v2274_v20, %v2268_v36 }
 0x758   : > { %v2278_v22 = vpop.f32.mrb[20].mxu0  ;;  %3267 = vmatprep.subr.bf16.mxu1 %v3266_v14 }
 0x759   : > { %v2280_v35 = vpop.f32.mrb[21].mxu0  ;;  %3269 = vmatpush1.bf16.msra.mxu1 %v3268_v24 }
 0x75c   : > { %v2284_v25 = vpop.f32.mrb[22].mxu0 }
 0x75d   : > { %v3272_v1 = vpack.c.bf16 %v2284_v25, %v2278_v22  ;;  %v2286_v5 = vpop.f32.mrb[23].mxu0 }
 0x75e   : > { %v3270_v57 = vpack.c.bf16 %v2286_v5, %v2280_v35 }
 0x760   : > { %v2932_v43 = vpop.f32.mrb[24].mxu0  ;;  %3271 = vmatprep.subr.bf16.mxu1 %v3270_v57 }
 0x761   : > { %v2934_v0 = vpop.f32.mrb[25].mxu0  ;;  %3273 = vmatpush1.bf16.msra.mxu1 %v3272_v1 }
 0x764   : > { %v2938_v15 = vpop.f32.mrb[26].mxu0 }
 0x765   : > { %v3276_v17 = vpack.c.bf16 %v2938_v15, %v2932_v43  ;;  %v2940_v56 = vpop.f32.mrb[27].mxu0 }
 0x766   : > { %v3274_v53 = vpack.c.bf16 %v2940_v56, %v2934_v0 }
 0x768   : > { %v2944_v31 = vpop.f32.mrb[28].mxu0  ;;  %3275 = vmatprep.subr.bf16.mxu1 %v3274_v53 }
 0x769   : > { %v2946_v47 = vpop.f32.mrb[29].mxu0  ;;  %3277 = vmatpush1.bf16.msra.mxu1 %v3276_v17 }
 0x76c   : > { %v2950_v46 = vpop.f32.mrb[30].mxu0 }
 0x76d   : > { %v3280_v21 = vpack.c.bf16 %v2950_v46, %v2944_v31  ;;  %v2952_v62 = vpop.f32.mrb[31].mxu0 }
 0x76e   : > { %v3278_v8 = vpack.c.bf16 %v2952_v62, %v2946_v47 }
 0x770   : > { %3279 = vmatprep.subr.bf16.mxu1 %v3278_v8 }
 0x771   : > { %3281 = vmatpush1.bf16.msra.mxu1 %v3280_v21 }
 0x774   : > { %3067 = vmatmul.mubr.f32.vlgmr.msra.gmra.mrb[32].mxu1 %v2963_v23 }
 0x847   : > { %v3068_v38 = vpop.f32.mrb[32].mxu1 }
 0x848   : > { %v3069_v32 = vadd.f32 %v3068_v38, %v3000_v52  ;;  %v3070_v10 = vpop.f32.mrb[33].mxu1 }
 0x849   : > { %v3071_v45 = vadd.f32 %v3070_v10, %v3000_v52 }
 0x84a   : > { %v3075_v59 = vmul.f32 %v3074_v40, %v3069_v32 }
 0x84b   : > { %v3076_v39 = vmul.f32 %v3074_v40, %v3071_v45 }
 0x84d   : > { %v3079_v49 = vcombine.low %v3075_v59, %v3076_v39 }
 0x84f   : > { %3081 = vst [vmem:[%s218_s13] sm:$0xff] %v3079_v49 }
 0x850   : > { %3516 = shalt.err (!%p3513_p3)
}
 0x851   : > { %s3517_s27 = scalar_lea.hbm %s5388_s17, 128  ;;  %s3521_s8 = scalar_lea.hbm %s5435_s5, 256 }
 0x852   : > { %p3518_p4 = scmp.ne.s32.totalorder %s5388_s17, %s3517_s27  ;;  %p3522_p9 = scmp.lt.u32.totalorder %s5388_s17, %s5435_s5 }
 0x853   : > { %p3523_p10 = scmp.lt.u32.totalorder %s3521_s8, %s3517_s27  ;;  %p3525_p12 = scmp.lt.u32.totalorder %s3517_s27, %s5388_s17 }
 0x854   : > { %p3519_p7 = pnand %p3518_p4, %p3644_p5 }
 0x855   : > { %p3524_p11 = por %p3523_p10, %p3522_p9 }
 0x856   : > { %p3520_p8 = pneg %p3519_p7 }
 0x857   : > { %p3526_p13 = por %p3525_p12, %p3524_p11 }
 0x859   : > { %p3527_p0 = pnand %p3526_p13, %p3520_p8 }
 0x85b   : > { %3530 = shalt.err (!%p3527_p0)
}
 0x85c   : > { %3282 = dma.vmem_to_hbm [thread:$0]  (%p3644_p5), %s5390_s14, 128, %s5388_s17, %s3083_s18  }
 0x85d PF: > { %p3288_p1 = scmp.ge.s32.totalorder %s3565_s23, 2  ;;  %s3109_s11 = sand.u32 1, %s3553_s20  }
 0x85e   : > { %s3110_s12 = scalar_lea.sflag [#allocation5], %s3109_s11 }
 0x85f   : > { %p3285_p2 = pnand %p3288_p1, %p3648_p6 }
 0x861   : > { %3548 = dma.done.wait (!%p3285_p2), %s3110_s12, 128  }
 0x862   : > { %3550 = vsyncadd (!%p3285_p2), %s3110_s12, 4294967168  ;;  %p16_p3 = scmp.ge.s32.totalorder %s3631_s25, 4   ;;  %s5635_s20 = smov %s3557_s21 }
 0x863   : > { %s5636_s21 = smov %s3561_s22  ;;  %s5637_s22 = smov %s3642_s28 }
 0x864   : > { %s5638_s23 = smov %s3631_s25  ;;  %18 = sbr.rel (!%p16_p3) target bundleno = 5 (0x5), region = 75 }
 0x86b   :  { %3115 = vsyncpa [#allocation5], 1 }
 0x86c   :  { %3117 = vsyncpa [#allocation5 + $0x1], 1 }

</bundles_post_ra>
